<compile_context>
chip_gen: v7x
topology: tpu7x:2x2x1
jax: 0.10.0
libtpu: 0.0.40
codegen_flags: <defaults>
</compile_context>

<pallas_src>
import functools
import math

import numpy as np
import jax
import jax.numpy as jnp
from jax.experimental import pallas as pl
from jax.experimental.pallas import tpu as pltpu


# Flip to run the two inception GEMMs in bf16 (f32 accumulation) for ~2-4x MXU
# throughput on v6e/v7x; kept False to preserve torch-f32 numerics.
INCEPTION_BF16 = False

_SQRT1_2 = 0.7071067811865476


# ------------------------- in-kernel math helpers --------------------------

def _erf(z):
    # Abramowitz & Stegun 7.1.26 (|err| < 1.5e-7); exp on the EUP, reciprocal
    # via pl.reciprocal(approx=True) so the polynomial stays off the VALU.
    a = jnp.abs(z)
    t = pl.reciprocal(1.0 + 0.3275911 * a, approx=True)
    poly = t * (0.254829592 + t * (-0.284496736 + t * (1.421413741 +
               t * (-1.453152027 + t * 1.061405429))))
    e = 1.0 - poly * jnp.exp(-a * a)
    return jnp.where(z >= 0, e, -e)


def _gelu(x):
    return 0.5 * x * (1.0 + _erf(x * _SQRT1_2))


def _round_up(x, m):
    return ((x + m - 1) // m) * m


def _pick_row_tile(M, cap=512):
    """Largest multiple-of-8 divisor of M that is <= cap (None if impossible)."""
    best = None
    d = 8
    while d <= min(M, cap):
        if M % d == 0:
            best = d
        d += 8
    return best


_VM = pl.BlockSpec(memory_space=pltpu.MemorySpace.VMEM)


# ----------------------------- generic linear ------------------------------

def _linear_kernel(x_ref, w_ref, b_ref, o_ref, *, act):
    y = jnp.dot(x_ref[...], w_ref[...],
                preferred_element_type=jnp.float32) + b_ref[...]
    if act:
        y = _gelu(y)
    o_ref[...] = y


def pallas_linear(x, w, b, *, act=False, cap=512):
    """y = [gelu](x @ w + b).  Row-tiled; weight stays resident per row block.
    TODO(synk): add a K-reduction grid axis for very large K*N weights."""
    x = x.astype(jnp.float32)
    w = w.astype(jnp.float32)
    b2 = b.reshape(1, -1).astype(jnp.float32)
    M, K = x.shape
    N = w.shape[1]
    kern = functools.partial(_linear_kernel, act=act)
    tm = _pick_row_tile(M, cap)
    if tm is not None:
        return pl.pallas_call(
            kern,
            out_shape=jax.ShapeDtypeStruct((M, N), jnp.float32),
            grid=(M // tm,),
            in_specs=[pl.BlockSpec((tm, K), lambda i: (i, 0)),
                      pl.BlockSpec((K, N), lambda i: (0, 0)),
                      pl.BlockSpec((1, N), lambda i: (0, 0))],
            out_specs=pl.BlockSpec((tm, N), lambda i: (i, 0)),
            compiler_params=pltpu.CompilerParams(
                dimension_semantics=("parallel",)),
        )(x, w, b2)
    return pl.pallas_call(
        kern, out_shape=jax.ShapeDtypeStruct((M, N), jnp.float32),
        in_specs=[_VM] * 3, out_specs=_VM,
    )(x, w, b2)


# ----------------------------- data embedding -------------------------------

def _embed_kernel(x_ref, w_ref, pos_ref, o_ref):
    o_ref[...] = (jnp.dot(x_ref[...], w_ref[...],
                          preferred_element_type=jnp.float32) + pos_ref[...])


def positional_embedding(T, d_model):
    pe = np.zeros((T, d_model), dtype=np.float32)
    position = np.arange(0, T, dtype=np.float32)[:, None]
    div_term = np.exp(np.arange(0, d_model, 2, dtype=np.float32) *
                      -(math.log(10000.0) / d_model))
    pe[:, 0::2] = np.sin(position * div_term)
    pe[:, 1::2] = np.cos(position * div_term)
    return jnp.asarray(pe)


def data_embedding(x, x_mark, params, cfg):
    """TokenEmbedding (circular Conv1d k=3, no bias) + TimeFeatureEmbedding +
    positional embedding as ONE matmul (token taps || marks concatenated along
    K).  Passing all-zero x_mark reproduces the x_mark=None path exactly."""
    B, T, C = x.shape
    D = cfg['d_model']
    feats = jnp.concatenate(
        [jnp.roll(x, 1, axis=1), x, jnp.roll(x, -1, axis=1), x_mark],
        axis=-1).astype(jnp.float32)                              # (B,T,3C+dm)
    wtok = jnp.transpose(params['token_w'], (2, 1, 0)).reshape(3 * C, D)
    wcat = jnp.concatenate([wtok, params['timef_w'].T],
                           axis=0).astype(jnp.float32)            # (3C+dm, D)
    Kc = feats.shape[-1]
    M = B * T
    pos = params['pos'][:T].astype(jnp.float32)                   # (T, D)
    tm = _pick_row_tile(T, 256)
    if tm is not None:
        tpb = T // tm
        out = pl.pallas_call(
            _embed_kernel,
            out_shape=jax.ShapeDtypeStruct((M, D), jnp.float32),
            grid=(M // tm,),
            in_specs=[pl.BlockSpec((tm, Kc), lambda i: (i, 0)),
                      pl.BlockSpec((Kc, D), lambda i: (0, 0)),
                      pl.BlockSpec((tm, D), lambda i: (i % tpb, 0))],
            out_specs=pl.BlockSpec((tm, D), lambda i: (i, 0)),
            compiler_params=pltpu.CompilerParams(
                dimension_semantics=("parallel",)),
        )(feats.reshape(M, Kc), wcat, pos)
    else:
        pos_b = jnp.broadcast_to(pos[None], (B, T, D)).reshape(M, D)
        out = pl.pallas_call(
            _embed_kernel, out_shape=jax.ShapeDtypeStruct((M, D), jnp.float32),
            in_specs=[_VM] * 3, out_specs=_VM,
        )(feats.reshape(M, Kc), wcat, pos_b)
    return out.reshape(B, T, D)


# -------------------------- residual + LayerNorm ----------------------------

def _res_ln_kernel(r_ref, x_ref, g_ref, b_ref, o_ref):
    y = r_ref[...] + x_ref[...]
    mu = jnp.mean(y, axis=-1, keepdims=True)
    yc = y - mu
    var = jnp.mean(yc * yc, axis=-1, keepdims=True)
    o_ref[...] = yc * jax.lax.rsqrt(var + 1e-5) * g_ref[...] + b_ref[...]


def residual_layernorm(res, x, g, b):
    """LayerNorm(res + x), row-tiled."""
    B, T, N = x.shape
    M = B * T
    r2 = res.reshape(M, N).astype(jnp.float32)
    x2 = x.reshape(M, N).astype(jnp.float32)
    g2 = g.reshape(1, N).astype(jnp.float32)
    b2 = b.reshape(1, N).astype(jnp.float32)
    tm = _pick_row_tile(M, 256)
    if tm is not None:
        out = pl.pallas_call(
            _res_ln_kernel,
            out_shape=jax.ShapeDtypeStruct((M, N), jnp.float32),
            grid=(M // tm,),
            in_specs=[pl.BlockSpec((tm, N), lambda i: (i, 0)),
                      pl.BlockSpec((tm, N), lambda i: (i, 0)),
                      pl.BlockSpec((1, N), lambda i: (0, 0)),
                      pl.BlockSpec((1, N), lambda i: (0, 0))],
            out_specs=pl.BlockSpec((tm, N), lambda i: (i, 0)),
            compiler_params=pltpu.CompilerParams(
                dimension_semantics=("parallel",)),
        )(r2, x2, g2, b2)
    else:
        out = pl.pallas_call(
            _res_ln_kernel, out_shape=jax.ShapeDtypeStruct((M, N), jnp.float32),
            in_specs=[_VM] * 4, out_specs=_VM,
        )(r2, x2, g2, b2)
    return out.reshape(B, T, N)


# ------------------------------ output heads --------------------------------

def _head_kernel(x_ref, w1_ref, b1_ref, w2_ref, b2_ref, o_ref):
    h = _gelu(x_ref[...])
    h = _gelu(jnp.dot(h, w1_ref[...], preferred_element_type=jnp.float32)
              + b1_ref[...])
    o_ref[...] = jnp.dot(h, w2_ref[...],
                         preferred_element_type=jnp.float32) + b2_ref[...]


def head_mlp(x, w1, b1, w2, b2):
    """GELU -> Linear -> GELU -> Linear fused; row-tiled (dropout = identity)."""
    B, T, D = x.shape
    M = B * T
    Hd = w1.shape[0]
    n_out = w2.shape[0]
    x2 = x.reshape(M, D).astype(jnp.float32)
    w1t = w1.T.astype(jnp.float32)
    b1r = b1.reshape(1, -1).astype(jnp.float32)
    w2t = w2.T.astype(jnp.float32)
    b2r = b2.reshape(1, -1).astype(jnp.float32)
    tm = _pick_row_tile(M, 256)
    if tm is not None:
        out = pl.pallas_call(
            _head_kernel,
            out_shape=jax.ShapeDtypeStruct((M, n_out), jnp.float32),
            grid=(M // tm,),
            in_specs=[pl.BlockSpec((tm, D), lambda i: (i, 0)),
                      pl.BlockSpec((D, Hd), lambda i: (0, 0)),
                      pl.BlockSpec((1, Hd), lambda i: (0, 0)),
                      pl.BlockSpec((Hd, n_out), lambda i: (0, 0)),
                      pl.BlockSpec((1, n_out), lambda i: (0, 0))],
            out_specs=pl.BlockSpec((tm, n_out), lambda i: (i, 0)),
            compiler_params=pltpu.CompilerParams(
                dimension_semantics=("parallel",)),
        )(x2, w1t, b1r, w2t, b2r)
    else:
        out = pl.pallas_call(
            _head_kernel, out_shape=jax.ShapeDtypeStruct((M, n_out), jnp.float32),
            in_specs=[_VM] * 5, out_specs=_VM,
        )(x2, w1t, b1r, w2t, b2r)
    return out.reshape(B, T, n_out)


# ------------------- fused TimesBlock inception kernel ----------------------

def _fold_inception(ws, bs, out_pad, in_pad=None):
    """Fold num_kernels parallel 'same' convs (mean-combined) into one
    (KK, KK, C_in_pad, C_out_pad) kernel; pad output (lane) channels to 128."""
    num_k = len(ws)
    KK = 2 * num_k - 1
    C_out, C_in = ws[0].shape[0], ws[0].shape[1]
    w_full = jnp.zeros((KK, KK, C_in, C_out), jnp.float32)
    for i, w in enumerate(ws):                     # w: (C_out, C_in, kk, kk)
        kk = 2 * i + 1
        off = (KK - kk) // 2
        w_full = w_full.at[off:off + kk, off:off + kk].add(
            jnp.transpose(w.astype(jnp.float32), (2, 3, 1, 0)))
    w_full = w_full / float(num_k)
    b_avg = jnp.stack(bs).astype(jnp.float32).mean(axis=0)
    ip = in_pad if in_pad is not None else C_in
    w_full = jnp.pad(w_full, ((0, 0), (0, 0),
                              (0, ip - C_in), (0, out_pad - C_out)))
    b_avg = jnp.pad(b_avg, ((0, out_pad - C_out),))
    return w_full, b_avg.reshape(1, out_pad)


def _inception_kernel(ns_ref, p_ref, x_ref, w1_ref, b1_ref, w2_ref, b2_ref,
                      o_ref, h_ref, *, H, W, KK):
    m = pl.program_id(0)
    n_seg = ns_ref[m]
    p = p_ref[m]
    R = (KK - 1) // 2
    N = x_ref.shape[-1]
    Fp = w1_ref.shape[-1]

    # Zero the halo'd scratch every step: only the interior is rewritten below,
    # so the conv#2 zero-padding border stays valid on every core of the
    # "parallel" grid.
    h_ref[...] = jnp.zeros_like(h_ref)

    # --- inception block #1: folded KKxKK conv + bias + GELU + grid mask ----
    acc = None
    for dy in range(KK):
        for dx in range(KK):
            patch = x_ref[0, dy:dy + H, dx:dx + W, :].reshape(H * W, N)
            d = jnp.dot(patch.astype(w1_ref.dtype), w1_ref[dy, dx],
                        preferred_element_type=jnp.float32)
            acc = d if acc is None else acc + d
    hval = _gelu(acc + b1_ref[...])                            # (H*W, Fp)

    rows = jax.lax.broadcasted_iota(jnp.int32, (H, W, Fp), 0)
    cols = jax.lax.broadcasted_iota(jnp.int32, (H, W, Fp), 1)
    mask = ((rows < n_seg) & (cols < p)).astype(jnp.float32)
    h_ref[R:R + H, R:R + W, :] = hval.reshape(H, W, Fp) * mask

    # --- inception block #2: folded KKxKK conv + bias ------------------------
    acc2 = None
    for dy in range(KK):
        for dx in range(KK):
            patch = h_ref[dy:dy + H, dx:dx + W, :].reshape(H * W, Fp)
            d = jnp.dot(patch.astype(w2_ref.dtype), w2_ref[dy, dx],
                        preferred_element_type=jnp.float32)
            acc2 = d if acc2 is None else acc2 + d
    o_ref[0] = acc2 + b2_ref[...]


def fused_inception(canvas_pad, nseg, pvals, w1, b1, w2, b2, *, H, W, KK):
    """Both Inception_Block_V1 layers + GELU + grid mask for every canvas in
    one pallas_call.  Grid over canvases; the (H, W, d_ff) intermediate lives
    in VMEM scratch (no HBM round trip, no im2col materialization)."""
    Mc, Hp, Wp, N = canvas_pad.shape
    Fp = w1.shape[-1]
    Op = w2.shape[-1]
    kern = functools.partial(_inception_kernel, H=H, W=W, KK=KK)
    return pl.pallas_call(
        kern,
        out_shape=jax.ShapeDtypeStruct((Mc, H * W, Op), jnp.float32),
        grid_spec=pltpu.PrefetchScalarGridSpec(
            num_scalar_prefetch=2,
            grid=(Mc,),
            in_specs=[
                pl.BlockSpec((1, Hp, Wp, N), lambda m, ns, pp: (m, 0, 0, 0)),
                pl.BlockSpec(w1.shape, lambda m, ns, pp: (0, 0, 0, 0)),
                pl.BlockSpec((1, Fp), lambda m, ns, pp: (0, 0)),
                pl.BlockSpec(w2.shape, lambda m, ns, pp: (0, 0, 0, 0)),
                pl.BlockSpec((1, Op), lambda m, ns, pp: (0, 0)),
            ],
            out_specs=pl.BlockSpec((1, H * W, Op), lambda m, ns, pp: (m, 0, 0)),
            scratch_shapes=[pltpu.VMEM((Hp, Wp, Fp), jnp.float32)],
        ),
        compiler_params=pltpu.CompilerParams(
            dimension_semantics=("parallel",)),
    )(nseg, pvals, canvas_pad, w1, b1, w2, b2)


def times_block(x, group_sizes, blk, cfg):
    """One TimesBlock WITHOUT the trailing residual add / LayerNorm (fused into
    residual_layernorm by the caller).  `x` concatenates independent streams
    along batch; `group_sizes` (static) gives each stream's batch size so FFT
    period selection is per stream.  Every (stream, period) pair is scattered
    into a static zero canvas (H, W) and all pairs share one fused inception
    pallas_call."""
    Btot, T, N = x.shape
    k = cfg['top_k']
    num_kernels = cfg['num_kernels']
    KK = 2 * num_kernels - 1
    R = num_kernels - 1

    p_min = max(1, T // max(1, T // 2))     # smallest selectable period
    H = -(-T // p_min)                      # static canvas bounds
    W = T
    Fp = _round_up(cfg['d_ff'], 128)
    Op = _round_up(N, 128)

    r_idx = jnp.arange(H, dtype=jnp.int32)[:, None]
    c_idx = jnp.arange(W, dtype=jnp.int32)[None, :]
    tt = jnp.arange(T, dtype=jnp.int32)

    canvases, nsegs, pvals, groups = [], [], [], []
    start = 0
    for bg in group_sizes:
        xg = x[start:start + bg]
        start += bg
        # ---- FFT_for_Period (XLA, on device, no host sync) ----
        amp = jnp.abs(jnp.fft.rfft(xg, axis=1))            # (bg, F, N)
        freq = amp.mean(axis=0).mean(axis=-1)
        freq = freq.at[0].set(0.0)
        _, top_idx = jax.lax.top_k(freq, k)
        pw = jax.nn.softmax(amp.mean(axis=-1)[:, top_idx], axis=1)   # (bg, k)
        periods = (T // jnp.maximum(top_idx, 1)).astype(jnp.int32)   # (k,)
        plist = []
        for i in range(k):
            p = periods[i]
            n_seg = (T + p - 1) // p
            t_grid = r_idx * p + c_idx                     # (H, W)
            in_grid = (r_idx < n_seg) & (c_idx < p)
            scat = in_grid & (t_grid < T)                  # zero-padded tail
            t_clip = jnp.clip(t_grid, 0, T - 1).reshape(-1)
            cg = jnp.take(xg, t_clip, axis=1, mode='clip').reshape(bg, H, W, N)
            cg = cg * scat.astype(cg.dtype)[None, :, :, None]
            canvases.append(cg)
            nsegs.append(jnp.full((bg,), n_seg, jnp.int32))
            pvals.append(jnp.full((bg,), p, jnp.int32))
            plist.append(p)
        groups.append((bg, pw, plist))

    canvas = jnp.concatenate(canvases, axis=0).astype(jnp.float32)  # (Mc,H,W,N)
    canvas_pad = jnp.pad(canvas, ((0, 0), (R, R), (R, R), (0, 0)))
    nseg_all = jnp.concatenate(nsegs)
    p_all = jnp.concatenate(pvals)

    w1f, b1f = _fold_inception(blk['inc1_w'], blk['inc1_b'], Fp)
    w2f, b2f = _fold_inception(blk['inc2_w'], blk['inc2_b'], Op, in_pad=Fp)
    if INCEPTION_BF16:
        canvas_pad = canvas_pad.astype(jnp.bfloat16)
        w1f = w1f.astype(jnp.bfloat16)
        w2f = w2f.astype(jnp.bfloat16)

    o = fused_inception(canvas_pad, nseg_all, p_all, w1f, b1f, w2f, b2f,
                        H=H, W=W, KK=KK)
    o = o[:, :, :N]                                         # drop lane padding

    # ---- fold canvases back to sequences, weight and sum the k branches ----
    res_parts = []
    off = 0
    for bg, pw, plist in groups:
        acc = jnp.zeros((bg, T, N), jnp.float32)
        for i, p in enumerate(plist):
            flat_idx = (tt // p) * W + (tt % p)             # (T,)
            seq = jnp.take(o[off:off + bg], flat_idx, axis=1, mode='clip')
            acc = acc + seq * pw[:, i][:, None, None]
            off += bg
        res_parts.append(acc)
    return jnp.concatenate(res_parts, axis=0)


# ------------------------------ model forward ------------------------------

def model_forward(params, cfg, x_enc, x_mark_enc, x_dec=None, x_mark_dec=None):
    B, T, _ = x_enc.shape
    d_model = cfg['d_model']
    pred_len = cfg['pred_len']
    seq_pred = cfg['seq_len'] + pred_len

    # -------- forecast-stream normalization --------
    means = x_enc.mean(axis=1, keepdims=True)
    xc = x_enc - means
    stdev = jnp.sqrt(jnp.var(xc, axis=1, keepdims=True) + 1e-5)
    xn = xc / stdev

    # -------- shared embedding (forecast + classification batched to 2B) ----
    x_all = jnp.concatenate([xn, x_enc], axis=0)
    mark_all = jnp.concatenate([x_mark_enc, jnp.zeros_like(x_mark_enc)], axis=0)
    emb = data_embedding(x_all, mark_all, params, cfg)       # (2B, T, D)
    enc_fc, enc_cls = emb[:B], emb[B:]

    # predict_linear1 on the forecast stream's time axis
    t = jnp.transpose(enc_fc, (0, 2, 1)).reshape(B * d_model, T)
    t = pallas_linear(t, params['pl1_w'].T, params['pl1_b'])
    enc_fc = jnp.transpose(t.reshape(B, d_model, seq_pred), (0, 2, 1))

    # -------- shared TimesBlock stack (streams batched when lengths match) --
    if seq_pred == T:
        streams = [jnp.concatenate([enc_fc, enc_cls], axis=0)]
        group_sizes_list = [(B, B)]
    else:
        streams = [enc_fc, enc_cls]
        group_sizes_list = [(B,), (B,)]

    outs = []
    for s, gs in zip(streams, group_sizes_list):
        enc = s
        for blk in params['blocks']:
            res = times_block(enc, gs, blk, cfg)
            enc = residual_layernorm(res, enc, params['ln_g'], params['ln_b'])
        outs.append(enc)
    if seq_pred == T:
        enc_fc_out, enc_cls_out = outs[0][:B], outs[0][B:]
    else:
        enc_fc_out, enc_cls_out = outs

    # -------- forecast head --------
    fc_out = head_mlp(enc_fc_out, params['proj_w1'], params['proj_b1'],
                      params['proj_w2'], params['proj_b2'])  # (B, seq_pred, c)
    # predict_linear2 has output width 1 -> degenerate lanes; keep it in XLA.
    dec = jnp.einsum('btc,t->bc', fc_out, params['pl2_w'][0]) + params['pl2_b'][0]
    dec_out = dec[:, None, :]                                # (B, 1, c_out)
    dec_out = dec_out * stdev[:, 0, :][:, None, :] + means[:, 0, :][:, None, :]

    # -------- classification head --------
    state_out = head_mlp(enc_cls_out, params['cls_w1'], params['cls_b1'],
                         params['cls_w2'], params['cls_b2'])

    pred = dec_out[:, -pred_len:, :] if pred_len > 0 else dec_out  # torch -0:
    return pred, state_out[:, -1:, :]


# ------------------------------ parameter init ------------------------------

def _uniform(key, shape, bound):
    return jax.random.uniform(key, shape, jnp.float32, -bound, bound)


def init_params(key, cfg):
    d_model, d_ff = cfg['d_model'], cfg['d_ff']
    enc_in, c_out = cfg['enc_in'], cfg['c_out']
    seq_len, pred_len = cfg['seq_len'], cfg['pred_len']
    seq_pred = seq_len + pred_len
    num = 16
    keys = iter(jax.random.split(key, 128))
    nk = lambda: next(keys)

    p = {}
    p['token_w'] = _uniform(nk(), (d_model, enc_in, 3), 1.0 / math.sqrt(enc_in * 3))
    p['timef_w'] = _uniform(nk(), (d_model, 4), 1.0 / math.sqrt(4))
    p['ln_g'] = jnp.ones((d_model,), jnp.float32)
    p['ln_b'] = jnp.zeros((d_model,), jnp.float32)
    p['pos'] = positional_embedding(seq_len, d_model)

    blocks = []
    for _ in range(cfg['e_layers']):
        blk = {'inc1_w': [], 'inc1_b': [], 'inc2_w': [], 'inc2_b': []}
        for i in range(cfg['num_kernels']):
            ks = 2 * i + 1
            b1 = 1.0 / math.sqrt(d_model * ks * ks)
            blk['inc1_w'].append(_uniform(nk(), (d_ff, d_model, ks, ks), b1))
            blk['inc1_b'].append(_uniform(nk(), (d_ff,), b1))
            b2 = 1.0 / math.sqrt(d_ff * ks * ks)
            blk['inc2_w'].append(_uniform(nk(), (d_model, d_ff, ks, ks), b2))
            blk['inc2_b'].append(_uniform(nk(), (d_model,), b2))
        blocks.append(blk)
    p['blocks'] = blocks

    b = 1.0 / math.sqrt(seq_len)
    p['pl1_w'] = _uniform(nk(), (seq_pred, seq_len), b)
    p['pl1_b'] = _uniform(nk(), (seq_pred,), b)
    b = 1.0 / math.sqrt(seq_pred)
    p['pl2_w'] = _uniform(nk(), (1, seq_pred), b)
    p['pl2_b'] = _uniform(nk(), (1,), b)

    h = num * d_model
    b = 1.0 / math.sqrt(d_model)
    p['proj_w1'] = _uniform(nk(), (h, d_model), b)
    p['proj_b1'] = _uniform(nk(), (h,), b)
    b = 1.0 / math.sqrt(h)
    p['proj_w2'] = _uniform(nk(), (c_out, h), b)
    p['proj_b2'] = _uniform(nk(), (c_out,), b)
    b = 1.0 / math.sqrt(d_model)
    p['cls_w1'] = _uniform(nk(), (h, d_model), b)
    p['cls_b1'] = _uniform(nk(), (h,), b)
    b = 1.0 / math.sqrt(h)
    p['cls_w2'] = _uniform(nk(), (c_out, h), b)
    p['cls_b2'] = _uniform(nk(), (c_out,), b)
    return p


# ----------------------------------- main -----------------------------------

if __name__ == "__main__":
    cfg = dict(task_name='long_term_forecast',
               seq_len=16, label_len=8, pred_len=0,
               enc_in=4, c_out=4, d_model=16, d_ff=32,
               e_layers=2, top_k=2, num_kernels=2,
               embed='timeF', freq='h', dropout=0.1)

    key = jax.random.PRNGKey(0)
    kx, km, kd, kmd, kp = jax.random.split(key, 5)
    B = 2
    x_enc = jax.random.normal(kx, (B, cfg['seq_len'], cfg['enc_in']), jnp.float32)
    x_mark_enc = jax.random.normal(km, (B, cfg['seq_len'], 4), jnp.float32)
    x_dec = jax.random.normal(kd, (B, cfg['label_len'] + cfg['pred_len'],
                                   cfg['enc_in']), jnp.float32)
    x_mark_dec = jax.random.normal(kmd, (B, cfg['label_len'] + cfg['pred_len'], 4),
                                   jnp.float32)

    params = init_params(kp, cfg)

    fwd = jax.jit(lambda p, xe, xme, xd, xmd: model_forward(p, cfg, xe, xme, xd, xmd))
    dec_out, state_out = fwd(params, x_enc, x_mark_enc, x_dec, x_mark_dec)
    jax.block_until_ready(dec_out)
    jax.block_until_ready(state_out)
    assert dec_out.shape == (B, 1, cfg['c_out'])
    assert state_out.shape == (B, 1, cfg['c_out'])
    print("KERNEL_OK")
</pallas_src>

<mosaic_0001>
module attributes {stable_mosaic.version = 11 : i64} {
  func.func @_embed_kernel(%arg0: i32, %arg1: memref<16x16xf32, #tpu.memory_space<vmem>>, %arg2: memref<16x16xf32, #tpu.memory_space<vmem>>, %arg3: memref<16x16xf32, #tpu.memory_space<vmem>>, %arg4: memref<16x16xf32, #tpu.memory_space<vmem>>) attributes {dimension_semantics = [#tpu.dimension_semantics<parallel>], iteration_bounds = array<i64: 4>, scalar_prefetch = 0 : i64, scratch_operands = 0 : i64, tpu.core_type = #tpu.core_type<tc>, window_params = [{transform_indices = @transform_0, window_bounds = array<i64: 16, 16>}, {pipeline_mode = #tpu.pipeline_mode<synchronous>, transform_indices = @transform_1, window_bounds = array<i64: 16, 16>}, {transform_indices = @transform_2, window_bounds = array<i64: 16, 16>}, {transform_indices = @transform_3, window_bounds = array<i64: 16, 16>}]} {
    %c0 = arith.constant 0 : index
    %c0_0 = arith.constant 0 : index
    %0 = vector.load %arg1[%c0, %c0_0] : memref<16x16xf32, #tpu.memory_space<vmem>>, vector<16x16xf32>
    %c0_1 = arith.constant 0 : index
    %c0_2 = arith.constant 0 : index
    %1 = vector.load %arg2[%c0_1, %c0_2] : memref<16x16xf32, #tpu.memory_space<vmem>>, vector<16x16xf32>
    %cst = arith.constant dense<0.000000e+00> : vector<16x16xf32>
    %2 = tpu.matmul %0, %1, %cst {dimension_numbers = #tpu.dot_dimension_numbers<[1], [0], [0], [1], [0, 0, 1, 1], [], []>} : vector<16x16xf32>, vector<16x16xf32>, vector<16x16xf32> -> vector<16x16xf32>
    %c0_3 = arith.constant 0 : index
    %c0_4 = arith.constant 0 : index
    %3 = vector.load %arg3[%c0_3, %c0_4] : memref<16x16xf32, #tpu.memory_space<vmem>>, vector<16x16xf32>
    %4 = arith.addf %2, %3 : vector<16x16xf32>
    %c0_5 = arith.constant 0 : index
    %c0_6 = arith.constant 0 : index
    %5 = vector.load %arg4[%c0_5, %c0_6] : memref<16x16xf32, #tpu.memory_space<vmem>>, vector<16x16xf32>
    tpu.vector_store %arg4[%c0_5, %c0_6], %4 {strides = array<i32>} : memref<16x16xf32, #tpu.memory_space<vmem>>, vector<16x16xf32>,
    return
  }
  func.func @transform_0(%arg0: i32) -> (i32, i32) {
    %c0_i32 = arith.constant 0 : i32
    %c0_i32_0 = arith.constant 0 : i32
    return %arg0, %c0_i32 : i32, i32
  }
  func.func @transform_1(%arg0: i32) -> (i32, i32) {
    %c0_i32 = arith.constant 0 : i32
    %c0_i32_0 = arith.constant 0 : i32
    %c0_i32_1 = arith.constant 0 : i32
    return %c0_i32, %c0_i32_0 : i32, i32
  }
  func.func @transform_2(%arg0: i32) -> (i32, i32) {
    %c1_i32 = arith.constant 1 : i32
    %c0_i32 = arith.constant 0 : i32
    %0 = arith.cmpi eq, %c1_i32, %c0_i32 : i32
    %c1_i32_0 = arith.constant 1 : i32
    %1 = arith.select %0, %c1_i32_0, %c1_i32 : i32
    %2 = arith.remsi %arg0, %1 : i32
    %c0_i32_1 = arith.constant 0 : i32
    %3 = arith.cmpi ne, %2, %c0_i32_1 : i32
    %c0_i32_2 = arith.constant 0 : i32
    %4 = arith.cmpi slt, %2, %c0_i32_2 : i32
    %c0_i32_3 = arith.constant 0 : i32
    %5 = arith.cmpi slt, %1, %c0_i32_3 : i32
    %6 = arith.xori %4, %5 : i1
    %7 = arith.andi %6, %3 : i1
    %8 = arith.addi %2, %1 : i32
    %9 = arith.select %7, %8, %2 : i32
    %c0_i32_4 = arith.constant 0 : i32
    %c0_i32_5 = arith.constant 0 : i32
    return %9, %c0_i32_4 : i32, i32
  }
  func.func @transform_3(%arg0: i32) -> (i32, i32) {
    %c0_i32 = arith.constant 0 : i32
    %c0_i32_0 = arith.constant 0 : i32
    return %arg0, %c0_i32 : i32, i32
  }
}

module attributes {stable_mosaic.version = 11 : i64} {
  func.func @_linear_kernel(%arg0: i32, %arg1: memref<32x16xf32, #tpu.memory_space<vmem>>, %arg2: memref<16x16xf32, #tpu.memory_space<vmem>>, %arg3: memref<1x16xf32, #tpu.memory_space<vmem>>, %arg4: memref<32x16xf32, #tpu.memory_space<vmem>>) attributes {dimension_semantics = [#tpu.dimension_semantics<parallel>], iteration_bounds = array<i64: 1>, scalar_prefetch = 0 : i64, scratch_operands = 0 : i64, tpu.core_type = #tpu.core_type<tc>, window_params = [{transform_indices = @transform_0, window_bounds = array<i64: 32, 16>}, {pipeline_mode = #tpu.pipeline_mode<synchronous>, transform_indices = @transform_1, window_bounds = array<i64: 16, 16>}, {pipeline_mode = #tpu.pipeline_mode<synchronous>, transform_indices = @transform_2, window_bounds = array<i64: 1, 16>}, {transform_indices = @transform_3, window_bounds = array<i64: 32, 16>}]} {
    %c0 = arith.constant 0 : index
    %c0_0 = arith.constant 0 : index
    %0 = vector.load %arg1[%c0, %c0_0] : memref<32x16xf32, #tpu.memory_space<vmem>>, vector<32x16xf32>
    %c0_1 = arith.constant 0 : index
    %c0_2 = arith.constant 0 : index
    %1 = vector.load %arg2[%c0_1, %c0_2] : memref<16x16xf32, #tpu.memory_space<vmem>>, vector<16x16xf32>
    %cst = arith.constant dense<0.000000e+00> : vector<32x16xf32>
    %2 = tpu.matmul %0, %1, %cst {dimension_numbers = #tpu.dot_dimension_numbers<[1], [0], [0], [1], [0, 0, 1, 1], [], []>} : vector<32x16xf32>, vector<16x16xf32>, vector<32x16xf32> -> vector<32x16xf32>
    %c0_3 = arith.constant 0 : index
    %c0_4 = arith.constant 0 : index
    %3 = vector.load %arg3[%c0_3, %c0_4] : memref<1x16xf32, #tpu.memory_space<vmem>>, vector<1x16xf32>
    %4 = vector.broadcast %3 : vector<1x16xf32> to vector<32x16xf32>
    %5 = arith.addf %2, %4 : vector<32x16xf32>
    %c0_5 = arith.constant 0 : index
    %c0_6 = arith.constant 0 : index
    %6 = vector.load %arg4[%c0_5, %c0_6] : memref<32x16xf32, #tpu.memory_space<vmem>>, vector<32x16xf32>
    tpu.vector_store %arg4[%c0_5, %c0_6], %5 {strides = array<i32>} : memref<32x16xf32, #tpu.memory_space<vmem>>, vector<32x16xf32>,
    return
  }
  func.func @transform_0(%arg0: i32) -> (i32, i32) {
    %c0_i32 = arith.constant 0 : i32
    %c0_i32_0 = arith.constant 0 : i32
    return %arg0, %c0_i32 : i32, i32
  }
  func.func @transform_1(%arg0: i32) -> (i32, i32) {
    %c0_i32 = arith.constant 0 : i32
    %c0_i32_0 = arith.constant 0 : i32
    %c0_i32_1 = arith.constant 0 : i32
    return %c0_i32, %c0_i32_0 : i32, i32
  }
  func.func @transform_2(%arg0: i32) -> (i32, i32) {
    %c0_i32 = arith.constant 0 : i32
    %c0_i32_0 = arith.constant 0 : i32
    %c0_i32_1 = arith.constant 0 : i32
    return %c0_i32, %c0_i32_0 : i32, i32
  }
  func.func @transform_3(%arg0: i32) -> (i32, i32) {
    %c0_i32 = arith.constant 0 : i32
    %c0_i32_0 = arith.constant 0 : i32
    return %arg0, %c0_i32 : i32, i32
  }
}

module attributes {stable_mosaic.version = 11 : i64} {
  func.func @_inception_kernel(%arg0: i32, %arg1: memref<8xi32, #tpu.memory_space<smem>>, %arg2: memref<8xi32, #tpu.memory_space<smem>>, %arg3: memref<1x10x18x16xf32, #tpu.memory_space<vmem>>, %arg4: memref<3x3x16x128xf32, #tpu.memory_space<vmem>>, %arg5: memref<1x128xf32, #tpu.memory_space<vmem>>, %arg6: memref<3x3x128x128xf32, #tpu.memory_space<vmem>>, %arg7: memref<1x128xf32, #tpu.memory_space<vmem>>, %arg8: memref<1x128x128xf32, #tpu.memory_space<vmem>>, %arg9: memref<10x18x128xf32, #tpu.memory_space<vmem>>) attributes {dimension_semantics = [#tpu.dimension_semantics<parallel>], iteration_bounds = array<i64: 8>, scalar_prefetch = 2 : i64, scratch_operands = 1 : i64, tpu.core_type = #tpu.core_type<tc>, window_params = [{transform_indices = @transform_0, window_bounds = array<i64: 1, 10, 18, 16>}, {pipeline_mode = #tpu.pipeline_mode<synchronous>, transform_indices = @transform_1, window_bounds = array<i64: 3, 3, 16, 128>}, {pipeline_mode = #tpu.pipeline_mode<synchronous>, transform_indices = @transform_2, window_bounds = array<i64: 1, 128>}, {pipeline_mode = #tpu.pipeline_mode<synchronous>, transform_indices = @transform_3, window_bounds = array<i64: 3, 3, 128, 128>}, {pipeline_mode = #tpu.pipeline_mode<synchronous>, transform_indices = @transform_4, window_bounds = array<i64: 1, 128>}, {transform_indices = @transform_5, window_bounds = array<i64: 1, 128, 128>}]} {
    %0 = arith.index_cast %arg0 : i32 to index
    %1 = memref.load %arg1[%0] : memref<8xi32, #tpu.memory_space<smem>>
    %2 = arith.index_cast %arg0 : i32 to index
    %3 = memref.load %arg2[%2] : memref<8xi32, #tpu.memory_space<smem>>
    %cst = arith.constant 0.000000e+00 : f32
    %4 = vector.broadcast %cst : f32 to vector<10x18x128xf32>
    %c0 = arith.constant 0 : index
    %c0_0 = arith.constant 0 : index
    %c0_1 = arith.constant 0 : index
    %5 = vector.load %arg9[%c0, %c0_0, %c0_1] : memref<10x18x128xf32, #tpu.memory_space<vmem>>, vector<10x18x128xf32>
    tpu.vector_store %arg9[%c0, %c0_0, %c0_1], %4 {strides = array<i32>} : memref<10x18x128xf32, #tpu.memory_space<vmem>>, vector<10x18x128xf32>,
    %c0_2 = arith.constant 0 : index
    %c0_3 = arith.constant 0 : index
    %c0_4 = arith.constant 0 : index
    %c0_5 = arith.constant 0 : index
    %6 = vector.load %arg3[%c0_2, %c0_3, %c0_4, %c0_5] : memref<1x10x18x16xf32, #tpu.memory_space<vmem>>, vector<1x8x16x16xf32>
    %7 = vector.shape_cast %6 : vector<1x8x16x16xf32> to vector<8x16x16xf32>
    %8 = vector.shape_cast %7 : vector<8x16x16xf32> to vector<128x16xf32>
    %c0_6 = arith.constant 0 : index
    %c0_7 = arith.constant 0 : index
    %c0_8 = arith.constant 0 : index
    %c0_9 = arith.constant 0 : index
    %9 = vector.load %arg4[%c0_6, %c0_7, %c0_8, %c0_9] : memref<3x3x16x128xf32, #tpu.memory_space<vmem>>, vector<1x1x16x128xf32>
    %10 = vector.shape_cast %9 : vector<1x1x16x128xf32> to vector<16x128xf32>
    %cst_10 = arith.constant dense<0.000000e+00> : vector<128x128xf32>
    %11 = tpu.matmul %8, %10, %cst_10 {dimension_numbers = #tpu.dot_dimension_numbers<[1], [0], [0], [1], [0, 0, 1, 1], [], []>} : vector<128x16xf32>, vector<16x128xf32>, vector<128x128xf32> -> vector<128x128xf32>
    %c0_11 = arith.constant 0 : index
    %c0_12 = arith.constant 0 : index
    %c1 = arith.constant 1 : index
    %c0_13 = arith.constant 0 : index
    %12 = vector.load %arg3[%c0_11, %c0_12, %c1, %c0_13] : memref<1x10x18x16xf32, #tpu.memory_space<vmem>>, vector<1x8x16x16xf32>
    %13 = vector.shape_cast %12 : vector<1x8x16x16xf32> to vector<8x16x16xf32>
    %14 = vector.shape_cast %13 : vector<8x16x16xf32> to vector<128x16xf32>
    %c0_14 = arith.constant 0 : index
    %c1_15 = arith.constant 1 : index
    %c0_16 = arith.constant 0 : index
    %c0_17 = arith.constant 0 : index
    %15 = vector.load %arg4[%c0_14, %c1_15, %c0_16, %c0_17] : memref<3x3x16x128xf32, #tpu.memory_space<vmem>>, vector<1x1x16x128xf32>
    %16 = vector.shape_cast %15 : vector<1x1x16x128xf32> to vector<16x128xf32>
    %cst_18 = arith.constant dense<0.000000e+00> : vector<128x128xf32>
    %17 = tpu.matmul %14, %16, %cst_18 {dimension_numbers = #tpu.dot_dimension_numbers<[1], [0], [0], [1], [0, 0, 1, 1], [], []>} : vector<128x16xf32>, vector<16x128xf32>, vector<128x128xf32> -> vector<128x128xf32>
    %18 = arith.addf %11, %17 : vector<128x128xf32>
    %c0_19 = arith.constant 0 : index
    %c0_20 = arith.constant 0 : index
    %c2 = arith.constant 2 : index
    %c0_21 = arith.constant 0 : index
    %19 = vector.load %arg3[%c0_19, %c0_20, %c2, %c0_21] : memref<1x10x18x16xf32, #tpu.memory_space<vmem>>, vector<1x8x16x16xf32>
    %20 = vector.shape_cast %19 : vector<1x8x16x16xf32> to vector<8x16x16xf32>
    %21 = vector.shape_cast %20 : vector<8x16x16xf32> to vector<128x16xf32>
    %c0_22 = arith.constant 0 : index
    %c2_23 = arith.constant 2 : index
    %c0_24 = arith.constant 0 : index
    %c0_25 = arith.constant 0 : index
    %22 = vector.load %arg4[%c0_22, %c2_23, %c0_24, %c0_25] : memref<3x3x16x128xf32, #tpu.memory_space<vmem>>, vector<1x1x16x128xf32>
    %23 = vector.shape_cast %22 : vector<1x1x16x128xf32> to vector<16x128xf32>
    %cst_26 = arith.constant dense<0.000000e+00> : vector<128x128xf32>
    %24 = tpu.matmul %21, %23, %cst_26 {dimension_numbers = #tpu.dot_dimension_numbers<[1], [0], [0], [1], [0, 0, 1, 1], [], []>} : vector<128x16xf32>, vector<16x128xf32>, vector<128x128xf32> -> vector<128x128xf32>
    %25 = arith.addf %18, %24 : vector<128x128xf32>
    %c0_27 = arith.constant 0 : index
    %c1_28 = arith.constant 1 : index
    %c0_29 = arith.constant 0 : index
    %c0_30 = arith.constant 0 : index
    %26 = vector.load %arg3[%c0_27, %c1_28, %c0_29, %c0_30] : memref<1x10x18x16xf32, #tpu.memory_space<vmem>>, vector<1x8x16x16xf32>
    %27 = vector.shape_cast %26 : vector<1x8x16x16xf32> to vector<8x16x16xf32>
    %28 = vector.shape_cast %27 : vector<8x16x16xf32> to vector<128x16xf32>
    %c1_31 = arith.constant 1 : index
    %c0_32 = arith.constant 0 : index
    %c0_33 = arith.constant 0 : index
    %c0_34 = arith.constant 0 : index
    %29 = vector.load %arg4[%c1_31, %c0_32, %c0_33, %c0_34] : memref<3x3x16x128xf32, #tpu.memory_space<vmem>>, vector<1x1x16x128xf32>
    %30 = vector.shape_cast %29 : vector<1x1x16x128xf32> to vector<16x128xf32>
    %cst_35 = arith.constant dense<0.000000e+00> : vector<128x128xf32>
    %31 = tpu.matmul %28, %30, %cst_35 {dimension_numbers = #tpu.dot_dimension_numbers<[1], [0], [0], [1], [0, 0, 1, 1], [], []>} : vector<128x16xf32>, vector<16x128xf32>, vector<128x128xf32> -> vector<128x128xf32>
    %32 = arith.addf %25, %31 : vector<128x128xf32>
    %c0_36 = arith.constant 0 : index
    %c1_37 = arith.constant 1 : index
    %c1_38 = arith.constant 1 : index
    %c0_39 = arith.constant 0 : index
    %33 = vector.load %arg3[%c0_36, %c1_37, %c1_38, %c0_39] : memref<1x10x18x16xf32, #tpu.memory_space<vmem>>, vector<1x8x16x16xf32>
    %34 = vector.shape_cast %33 : vector<1x8x16x16xf32> to vector<8x16x16xf32>
    %35 = vector.shape_cast %34 : vector<8x16x16xf32> to vector<128x16xf32>
    %c1_40 = arith.constant 1 : index
    %c1_41 = arith.constant 1 : index
    %c0_42 = arith.constant 0 : index
    %c0_43 = arith.constant 0 : index
    %36 = vector.load %arg4[%c1_40, %c1_41, %c0_42, %c0_43] : memref<3x3x16x128xf32, #tpu.memory_space<vmem>>, vector<1x1x16x128xf32>
    %37 = vector.shape_cast %36 : vector<1x1x16x128xf32> to vector<16x128xf32>
    %cst_44 = arith.constant dense<0.000000e+00> : vector<128x128xf32>
    %38 = tpu.matmul %35, %37, %cst_44 {dimension_numbers = #tpu.dot_dimension_numbers<[1], [0], [0], [1], [0, 0, 1, 1], [], []>} : vector<128x16xf32>, vector<16x128xf32>, vector<128x128xf32> -> vector<128x128xf32>
    %39 = arith.addf %32, %38 : vector<128x128xf32>
    %c0_45 = arith.constant 0 : index
    %c1_46 = arith.constant 1 : index
    %c2_47 = arith.constant 2 : index
    %c0_48 = arith.constant 0 : index
    %40 = vector.load %arg3[%c0_45, %c1_46, %c2_47, %c0_48] : memref<1x10x18x16xf32, #tpu.memory_space<vmem>>, vector<1x8x16x16xf32>
    %41 = vector.shape_cast %40 : vector<1x8x16x16xf32> to vector<8x16x16xf32>
    %42 = vector.shape_cast %41 : vector<8x16x16xf32> to vector<128x16xf32>
    %c1_49 = arith.constant 1 : index
    %c2_50 = arith.constant 2 : index
    %c0_51 = arith.constant 0 : index
    %c0_52 = arith.constant 0 : index
    %43 = vector.load %arg4[%c1_49, %c2_50, %c0_51, %c0_52] : memref<3x3x16x128xf32, #tpu.memory_space<vmem>>, vector<1x1x16x128xf32>
    %44 = vector.shape_cast %43 : vector<1x1x16x128xf32> to vector<16x128xf32>
    %cst_53 = arith.constant dense<0.000000e+00> : vector<128x128xf32>
    %45 = tpu.matmul %42, %44, %cst_53 {dimension_numbers = #tpu.dot_dimension_numbers<[1], [0], [0], [1], [0, 0, 1, 1], [], []>} : vector<128x16xf32>, vector<16x128xf32>, vector<128x128xf32> -> vector<128x128xf32>
    %46 = arith.addf %39, %45 : vector<128x128xf32>
    %c0_54 = arith.constant 0 : index
    %c2_55 = arith.constant 2 : index
    %c0_56 = arith.constant 0 : index
    %c0_57 = arith.constant 0 : index
    %47 = vector.load %arg3[%c0_54, %c2_55, %c0_56, %c0_57] : memref<1x10x18x16xf32, #tpu.memory_space<vmem>>, vector<1x8x16x16xf32>
    %48 = vector.shape_cast %47 : vector<1x8x16x16xf32> to vector<8x16x16xf32>
    %49 = vector.shape_cast %48 : vector<8x16x16xf32> to vector<128x16xf32>
    %c2_58 = arith.constant 2 : index
    %c0_59 = arith.constant 0 : index
    %c0_60 = arith.constant 0 : index
    %c0_61 = arith.constant 0 : index
    %50 = vector.load %arg4[%c2_58, %c0_59, %c0_60, %c0_61] : memref<3x3x16x128xf32, #tpu.memory_space<vmem>>, vector<1x1x16x128xf32>
    %51 = vector.shape_cast %50 : vector<1x1x16x128xf32> to vector<16x128xf32>
    %cst_62 = arith.constant dense<0.000000e+00> : vector<128x128xf32>
    %52 = tpu.matmul %49, %51, %cst_62 {dimension_numbers = #tpu.dot_dimension_numbers<[1], [0], [0], [1], [0, 0, 1, 1], [], []>} : vector<128x16xf32>, vector<16x128xf32>, vector<128x128xf32> -> vector<128x128xf32>
    %53 = arith.addf %46, %52 : vector<128x128xf32>
    %c0_63 = arith.constant 0 : index
    %c2_64 = arith.constant 2 : index
    %c1_65 = arith.constant 1 : index
    %c0_66 = arith.constant 0 : index
    %54 = vector.load %arg3[%c0_63, %c2_64, %c1_65, %c0_66] : memref<1x10x18x16xf32, #tpu.memory_space<vmem>>, vector<1x8x16x16xf32>
    %55 = vector.shape_cast %54 : vector<1x8x16x16xf32> to vector<8x16x16xf32>
    %56 = vector.shape_cast %55 : vector<8x16x16xf32> to vector<128x16xf32>
    %c2_67 = arith.constant 2 : index
    %c1_68 = arith.constant 1 : index
    %c0_69 = arith.constant 0 : index
    %c0_70 = arith.constant 0 : index
    %57 = vector.load %arg4[%c2_67, %c1_68, %c0_69, %c0_70] : memref<3x3x16x128xf32, #tpu.memory_space<vmem>>, vector<1x1x16x128xf32>
    %58 = vector.shape_cast %57 : vector<1x1x16x128xf32> to vector<16x128xf32>
    %cst_71 = arith.constant dense<0.000000e+00> : vector<128x128xf32>
    %59 = tpu.matmul %56, %58, %cst_71 {dimension_numbers = #tpu.dot_dimension_numbers<[1], [0], [0], [1], [0, 0, 1, 1], [], []>} : vector<128x16xf32>, vector<16x128xf32>, vector<128x128xf32> -> vector<128x128xf32>
    %60 = arith.addf %53, %59 : vector<128x128xf32>
    %c0_72 = arith.constant 0 : index
    %c2_73 = arith.constant 2 : index
    %c2_74 = arith.constant 2 : index
    %c0_75 = arith.constant 0 : index
    %61 = vector.load %arg3[%c0_72, %c2_73, %c2_74, %c0_75] : memref<1x10x18x16xf32, #tpu.memory_space<vmem>>, vector<1x8x16x16xf32>
    %62 = vector.shape_cast %61 : vector<1x8x16x16xf32> to vector<8x16x16xf32>
    %63 = vector.shape_cast %62 : vector<8x16x16xf32> to vector<128x16xf32>
    %c2_76 = arith.constant 2 : index
    %c2_77 = arith.constant 2 : index
    %c0_78 = arith.constant 0 : index
    %c0_79 = arith.constant 0 : index
    %64 = vector.load %arg4[%c2_76, %c2_77, %c0_78, %c0_79] : memref<3x3x16x128xf32, #tpu.memory_space<vmem>>, vector<1x1x16x128xf32>
    %65 = vector.shape_cast %64 : vector<1x1x16x128xf32> to vector<16x128xf32>
    %cst_80 = arith.constant dense<0.000000e+00> : vector<128x128xf32>
    %66 = tpu.matmul %63, %65, %cst_80 {dimension_numbers = #tpu.dot_dimension_numbers<[1], [0], [0], [1], [0, 0, 1, 1], [], []>} : vector<128x16xf32>, vector<16x128xf32>, vector<128x128xf32> -> vector<128x128xf32>
    %67 = arith.addf %60, %66 : vector<128x128xf32>
    %c0_81 = arith.constant 0 : index
    %c0_82 = arith.constant 0 : index
    %68 = vector.load %arg5[%c0_81, %c0_82] : memref<1x128xf32, #tpu.memory_space<vmem>>, vector<1x128xf32>
    %69 = vector.broadcast %68 : vector<1x128xf32> to vector<128x128xf32>
    %70 = arith.addf %67, %69 : vector<128x128xf32>
    %cst_83 = arith.constant 5.000000e-01 : f32
    %71 = vector.broadcast %cst_83 : f32 to vector<128x128xf32>
    %72 = arith.mulf %71, %70 : vector<128x128xf32>
    %cst_84 = arith.constant 0.707106769 : f32
    %73 = vector.broadcast %cst_84 : f32 to vector<128x128xf32>
    %74 = arith.mulf %70, %73 : vector<128x128xf32>
    %75 = math.absf %74 : vector<128x128xf32>
    %cst_85 = arith.constant 0.327591091 : f32
    %76 = vector.broadcast %cst_85 : f32 to vector<128x128xf32>
    %77 = arith.mulf %76, %75 : vector<128x128xf32>
    %cst_86 = arith.constant 1.000000e+00 : f32
    %78 = vector.broadcast %cst_86 : f32 to vector<128x128xf32>
    %79 = arith.addf %78, %77 : vector<128x128xf32>
    %80 = tpu.reciprocal %79 {approx = true} : vector<128x128xf32> -> vector<128x128xf32>
    %cst_87 = arith.constant 1.06140542 : f32
    %81 = vector.broadcast %cst_87 : f32 to vector<128x128xf32>
    %82 = arith.mulf %80, %81 : vector<128x128xf32>
    %cst_88 = arith.constant -1.45315206 : f32
    %83 = vector.broadcast %cst_88 : f32 to vector<128x128xf32>
    %84 = arith.addf %83, %82 : vector<128x128xf32>
    %85 = arith.mulf %80, %84 : vector<128x128xf32>
    %cst_89 = arith.constant 1.42141378 : f32
    %86 = vector.broadcast %cst_89 : f32 to vector<128x128xf32>
    %87 = arith.addf %86, %85 : vector<128x128xf32>
    %88 = arith.mulf %80, %87 : vector<128x128xf32>
    %cst_90 = arith.constant -0.284496725 : f32
    %89 = vector.broadcast %cst_90 : f32 to vector<128x128xf32>
    %90 = arith.addf %89, %88 : vector<128x128xf32>
    %91 = arith.mulf %80, %90 : vector<128x128xf32>
    %cst_91 = arith.constant 0.254829586 : f32
    %92 = vector.broadcast %cst_91 : f32 to vector<128x128xf32>
    %93 = arith.addf %92, %91 : vector<128x128xf32>
    %94 = arith.mulf %80, %93 : vector<128x128xf32>
    %cst_92 = arith.constant 0.000000e+00 : f32
    %95 = vector.broadcast %cst_92 : f32 to vector<128x128xf32>
    %96 = arith.subf %95, %75 : vector<128x128xf32>
    %97 = arith.mulf %96, %75 : vector<128x128xf32>
    %98 = math.exp %97 : vector<128x128xf32>
    %99 = arith.mulf %94, %98 : vector<128x128xf32>
    %cst_93 = arith.constant 1.000000e+00 : f32
    %100 = vector.broadcast %cst_93 : f32 to vector<128x128xf32>
    %101 = arith.subf %100, %99 : vector<128x128xf32>
    %cst_94 = arith.constant 0.000000e+00 : f32
    %102 = vector.broadcast %cst_94 : f32 to vector<128x128xf32>
    %103 = arith.cmpf oge, %74, %102 : vector<128x128xf32>
    %cst_95 = arith.constant 0.000000e+00 : f32
    %104 = vector.broadcast %cst_95 : f32 to vector<128x128xf32>
    %105 = arith.subf %104, %101 : vector<128x128xf32>
    %106 = arith.select %103, %101, %105 : vector<128x128xi1>, vector<128x128xf32>
    %cst_96 = arith.constant 1.000000e+00 : f32
    %107 = vector.broadcast %cst_96 : f32 to vector<128x128xf32>
    %108 = arith.addf %107, %106 : vector<128x128xf32>
    %109 = arith.mulf %72, %108 : vector<128x128xf32>
    %110 = tpu.iota {dimensions = array<i32: 0>} : vector<8x16x128xi32>
    %111 = tpu.iota {dimensions = array<i32: 1>} : vector<8x16x128xi32>
    %112 = vector.broadcast %1 : i32 to vector<8x16x128xi32>
    %113 = arith.cmpi slt, %110, %112 : vector<8x16x128xi32>
    %114 = vector.broadcast %3 : i32 to vector<8x16x128xi32>
    %115 = arith.cmpi slt, %111, %114 : vector<8x16x128xi32>
    %116 = arith.andi %113, %115 : vector<8x16x128xi1>
    %117 = arith.extui %116 : vector<8x16x128xi1> to vector<8x16x128xi32>
    %118 = arith.sitofp %117 : vector<8x16x128xi32> to vector<8x16x128xf32>
    %119 = vector.shape_cast %109 : vector<128x128xf32> to vector<8x16x128xf32>
    %120 = arith.mulf %119, %118 : vector<8x16x128xf32>
    %c1_97 = arith.constant 1 : index
    %c1_98 = arith.constant 1 : index
    %c0_99 = arith.constant 0 : index
    %121 = vector.load %arg9[%c1_97, %c1_98, %c0_99] : memref<10x18x128xf32, #tpu.memory_space<vmem>>, vector<8x16x128xf32>
    tpu.vector_store %arg9[%c1_97, %c1_98, %c0_99], %120 {strides = array<i32>} : memref<10x18x128xf32, #tpu.memory_space<vmem>>, vector<8x16x128xf32>,
    %c0_100 = arith.constant 0 : index
    %c0_101 = arith.constant 0 : index
    %c0_102 = arith.constant 0 : index
    %122 = vector.load %arg9[%c0_100, %c0_101, %c0_102] : memref<10x18x128xf32, #tpu.memory_space<vmem>>, vector<8x16x128xf32>
    %123 = vector.shape_cast %122 : vector<8x16x128xf32> to vector<128x128xf32>
    %c0_103 = arith.constant 0 : index
    %c0_104 = arith.constant 0 : index
    %c0_105 = arith.constant 0 : index
    %c0_106 = arith.constant 0 : index
    %124 = vector.load %arg6[%c0_103, %c0_104, %c0_105, %c0_106] : memref<3x3x128x128xf32, #tpu.memory_space<vmem>>, vector<1x1x128x128xf32>
    %125 = vector.shape_cast %124 : vector<1x1x128x128xf32> to vector<128x128xf32>
    %cst_107 = arith.constant dense<0.000000e+00> : vector<128x128xf32>
    %126 = tpu.matmul %123, %125, %cst_107 {dimension_numbers = #tpu.dot_dimension_numbers<[1], [0], [0], [1], [0, 0, 1, 1], [], []>} : vector<128x128xf32>, vector<128x128xf32>, vector<128x128xf32> -> vector<128x128xf32>
    %c0_108 = arith.constant 0 : index
    %c1_109 = arith.constant 1 : index
    %c0_110 = arith.constant 0 : index
    %127 = vector.load %arg9[%c0_108, %c1_109, %c0_110] : memref<10x18x128xf32, #tpu.memory_space<vmem>>, vector<8x16x128xf32>
    %128 = vector.shape_cast %127 : vector<8x16x128xf32> to vector<128x128xf32>
    %c0_111 = arith.constant 0 : index
    %c1_112 = arith.constant 1 : index
    %c0_113 = arith.constant 0 : index
    %c0_114 = arith.constant 0 : index
    %129 = vector.load %arg6[%c0_111, %c1_112, %c0_113, %c0_114] : memref<3x3x128x128xf32, #tpu.memory_space<vmem>>, vector<1x1x128x128xf32>
    %130 = vector.shape_cast %129 : vector<1x1x128x128xf32> to vector<128x128xf32>
    %cst_115 = arith.constant dense<0.000000e+00> : vector<128x128xf32>
    %131 = tpu.matmul %128, %130, %cst_115 {dimension_numbers = #tpu.dot_dimension_numbers<[1], [0], [0], [1], [0, 0, 1, 1], [], []>} : vector<128x128xf32>, vector<128x128xf32>, vector<128x128xf32> -> vector<128x128xf32>
    %132 = arith.addf %126, %131 : vector<128x128xf32>
    %c0_116 = arith.constant 0 : index
    %c2_117 = arith.constant 2 : index
    %c0_118 = arith.constant 0 : index
    %133 = vector.load %arg9[%c0_116, %c2_117, %c0_118] : memref<10x18x128xf32, #tpu.memory_space<vmem>>, vector<8x16x128xf32>
    %134 = vector.shape_cast %133 : vector<8x16x128xf32> to vector<128x128xf32>
    %c0_119 = arith.constant 0 : index
    %c2_120 = arith.constant 2 : index
    %c0_121 = arith.constant 0 : index
    %c0_122 = arith.constant 0 : index
    %135 = vector.load %arg6[%c0_119, %c2_120, %c0_121, %c0_122] : memref<3x3x128x128xf32, #tpu.memory_space<vmem>>, vector<1x1x128x128xf32>
    %136 = vector.shape_cast %135 : vector<1x1x128x128xf32> to vector<128x128xf32>
    %cst_123 = arith.constant dense<0.000000e+00> : vector<128x128xf32>
    %137 = tpu.matmul %134, %136, %cst_123 {dimension_numbers = #tpu.dot_dimension_numbers<[1], [0], [0], [1], [0, 0, 1, 1], [], []>} : vector<128x128xf32>, vector<128x128xf32>, vector<128x128xf32> -> vector<128x128xf32>
    %138 = arith.addf %132, %137 : vector<128x128xf32>
    %c1_124 = arith.constant 1 : index
    %c0_125 = arith.constant 0 : index
    %c0_126 = arith.constant 0 : index
    %139 = vector.load %arg9[%c1_124, %c0_125, %c0_126] : memref<10x18x128xf32, #tpu.memory_space<vmem>>, vector<8x16x128xf32>
    %140 = vector.shape_cast %139 : vector<8x16x128xf32> to vector<128x128xf32>
    %c1_127 = arith.constant 1 : index
    %c0_128 = arith.constant 0 : index
    %c0_129 = arith.constant 0 : index
    %c0_130 = arith.constant 0 : index
    %141 = vector.load %arg6[%c1_127, %c0_128, %c0_129, %c0_130] : memref<3x3x128x128xf32, #tpu.memory_space<vmem>>, vector<1x1x128x128xf32>
    %142 = vector.shape_cast %141 : vector<1x1x128x128xf32> to vector<128x128xf32>
    %cst_131 = arith.constant dense<0.000000e+00> : vector<128x128xf32>
    %143 = tpu.matmul %140, %142, %cst_131 {dimension_numbers = #tpu.dot_dimension_numbers<[1], [0], [0], [1], [0, 0, 1, 1], [], []>} : vector<128x128xf32>, vector<128x128xf32>, vector<128x128xf32> -> vector<128x128xf32>
    %144 = arith.addf %138, %143 : vector<128x128xf32>
    %c1_132 = arith.constant 1 : index
    %c1_133 = arith.constant 1 : index
    %c0_134 = arith.constant 0 : index
    %145 = vector.load %arg9[%c1_132, %c1_133, %c0_134] : memref<10x18x128xf32, #tpu.memory_space<vmem>>, vector<8x16x128xf32>
    %146 = vector.shape_cast %145 : vector<8x16x128xf32> to vector<128x128xf32>
    %c1_135 = arith.constant 1 : index
    %c1_136 = arith.constant 1 : index
    %c0_137 = arith.constant 0 : index
    %c0_138 = arith.constant 0 : index
    %147 = vector.load %arg6[%c1_135, %c1_136, %c0_137, %c0_138] : memref<3x3x128x128xf32, #tpu.memory_space<vmem>>, vector<1x1x128x128xf32>
    %148 = vector.shape_cast %147 : vector<1x1x128x128xf32> to vector<128x128xf32>
    %cst_139 = arith.constant dense<0.000000e+00> : vector<128x128xf32>
    %149 = tpu.matmul %146, %148, %cst_139 {dimension_numbers = #tpu.dot_dimension_numbers<[1], [0], [0], [1], [0, 0, 1, 1], [], []>} : vector<128x128xf32>, vector<128x128xf32>, vector<128x128xf32> -> vector<128x128xf32>
    %150 = arith.addf %144, %149 : vector<128x128xf32>
    %c1_140 = arith.constant 1 : index
    %c2_141 = arith.constant 2 : index
    %c0_142 = arith.constant 0 : index
    %151 = vector.load %arg9[%c1_140, %c2_141, %c0_142] : memref<10x18x128xf32, #tpu.memory_space<vmem>>, vector<8x16x128xf32>
    %152 = vector.shape_cast %151 : vector<8x16x128xf32> to vector<128x128xf32>
    %c1_143 = arith.constant 1 : index
    %c2_144 = arith.constant 2 : index
    %c0_145 = arith.constant 0 : index
    %c0_146 = arith.constant 0 : index
    %153 = vector.load %arg6[%c1_143, %c2_144, %c0_145, %c0_146] : memref<3x3x128x128xf32, #tpu.memory_space<vmem>>, vector<1x1x128x128xf32>
    %154 = vector.shape_cast %153 : vector<1x1x128x128xf32> to vector<128x128xf32>
    %cst_147 = arith.constant dense<0.000000e+00> : vector<128x128xf32>
    %155 = tpu.matmul %152, %154, %cst_147 {dimension_numbers = #tpu.dot_dimension_numbers<[1], [0], [0], [1], [0, 0, 1, 1], [], []>} : vector<128x128xf32>, vector<128x128xf32>, vector<128x128xf32> -> vector<128x128xf32>
    %156 = arith.addf %150, %155 : vector<128x128xf32>
    %c2_148 = arith.constant 2 : index
    %c0_149 = arith.constant 0 : index
    %c0_150 = arith.constant 0 : index
    %157 = vector.load %arg9[%c2_148, %c0_149, %c0_150] : memref<10x18x128xf32, #tpu.memory_space<vmem>>, vector<8x16x128xf32>
    %158 = vector.shape_cast %157 : vector<8x16x128xf32> to vector<128x128xf32>
    %c2_151 = arith.constant 2 : index
    %c0_152 = arith.constant 0 : index
    %c0_153 = arith.constant 0 : index
    %c0_154 = arith.constant 0 : index
    %159 = vector.load %arg6[%c2_151, %c0_152, %c0_153, %c0_154] : memref<3x3x128x128xf32, #tpu.memory_space<vmem>>, vector<1x1x128x128xf32>
    %160 = vector.shape_cast %159 : vector<1x1x128x128xf32> to vector<128x128xf32>
    %cst_155 = arith.constant dense<0.000000e+00> : vector<128x128xf32>
    %161 = tpu.matmul %158, %160, %cst_155 {dimension_numbers = #tpu.dot_dimension_numbers<[1], [0], [0], [1], [0, 0, 1, 1], [], []>} : vector<128x128xf32>, vector<128x128xf32>, vector<128x128xf32> -> vector<128x128xf32>
    %162 = arith.addf %156, %161 : vector<128x128xf32>
    %c2_156 = arith.constant 2 : index
    %c1_157 = arith.constant 1 : index
    %c0_158 = arith.constant 0 : index
    %163 = vector.load %arg9[%c2_156, %c1_157, %c0_158] : memref<10x18x128xf32, #tpu.memory_space<vmem>>, vector<8x16x128xf32>
    %164 = vector.shape_cast %163 : vector<8x16x128xf32> to vector<128x128xf32>
    %c2_159 = arith.constant 2 : index
    %c1_160 = arith.constant 1 : index
    %c0_161 = arith.constant 0 : index
    %c0_162 = arith.constant 0 : index
    %165 = vector.load %arg6[%c2_159, %c1_160, %c0_161, %c0_162] : memref<3x3x128x128xf32, #tpu.memory_space<vmem>>, vector<1x1x128x128xf32>
    %166 = vector.shape_cast %165 : vector<1x1x128x128xf32> to vector<128x128xf32>
    %cst_163 = arith.constant dense<0.000000e+00> : vector<128x128xf32>
    %167 = tpu.matmul %164, %166, %cst_163 {dimension_numbers = #tpu.dot_dimension_numbers<[1], [0], [0], [1], [0, 0, 1, 1], [], []>} : vector<128x128xf32>, vector<128x128xf32>, vector<128x128xf32> -> vector<128x128xf32>
    %168 = arith.addf %162, %167 : vector<128x128xf32>
    %c2_164 = arith.constant 2 : index
    %c2_165 = arith.constant 2 : index
    %c0_166 = arith.constant 0 : index
    %169 = vector.load %arg9[%c2_164, %c2_165, %c0_166] : memref<10x18x128xf32, #tpu.memory_space<vmem>>, vector<8x16x128xf32>
    %170 = vector.shape_cast %169 : vector<8x16x128xf32> to vector<128x128xf32>
    %c2_167 = arith.constant 2 : index
    %c2_168 = arith.constant 2 : index
    %c0_169 = arith.constant 0 : index
    %c0_170 = arith.constant 0 : index
    %171 = vector.load %arg6[%c2_167, %c2_168, %c0_169, %c0_170] : memref<3x3x128x128xf32, #tpu.memory_space<vmem>>, vector<1x1x128x128xf32>
    %172 = vector.shape_cast %171 : vector<1x1x128x128xf32> to vector<128x128xf32>
    %cst_171 = arith.constant dense<0.000000e+00> : vector<128x128xf32>
    %173 = tpu.matmul %170, %172, %cst_171 {dimension_numbers = #tpu.dot_dimension_numbers<[1], [0], [0], [1], [0, 0, 1, 1], [], []>} : vector<128x128xf32>, vector<128x128xf32>, vector<128x128xf32> -> vector<128x128xf32>
    %174 = arith.addf %168, %173 : vector<128x128xf32>
    %c0_172 = arith.constant 0 : index
    %c0_173 = arith.constant 0 : index
    %175 = vector.load %arg7[%c0_172, %c0_173] : memref<1x128xf32, #tpu.memory_space<vmem>>, vector<1x128xf32>
    %176 = vector.broadcast %175 : vector<1x128xf32> to vector<128x128xf32>
    %177 = arith.addf %174, %176 : vector<128x128xf32>
    %c0_174 = arith.constant 0 : index
    %c0_175 = arith.constant 0 : index
    %c0_176 = arith.constant 0 : index
    %178 = vector.load %arg8[%c0_174, %c0_175, %c0_176] : memref<1x128x128xf32, #tpu.memory_space<vmem>>, vector<1x128x128xf32>
    %179 = vector.shape_cast %178 : vector<1x128x128xf32> to vector<128x128xf32>
    %180 = vector.shape_cast %177 : vector<128x128xf32> to vector<1x128x128xf32>
    tpu.vector_store %arg8[%c0_174, %c0_175, %c0_176], %180 {strides = array<i32>} : memref<1x128x128xf32, #tpu.memory_space<vmem>>, vector<1x128x128xf32>,
    return
  }
  func.func @transform_0(%arg0: i32, %arg1: memref<8xi32, #tpu.memory_space<smem>>, %arg2: memref<8xi32, #tpu.memory_space<smem>>) -> (i32, i32, i32, i32) {
    %c0_i32 = arith.constant 0 : i32
    %c0_i32_0 = arith.constant 0 : i32
    %c0_i32_1 = arith.constant 0 : i32
    %c0_i32_2 = arith.constant 0 : i32
    return %arg0, %c0_i32, %c0_i32_0, %c0_i32_1 : i32, i32, i32, i32
  }
  func.func @transform_1(%arg0: i32, %arg1: memref<8xi32, #tpu.memory_space<smem>>, %arg2: memref<8xi32, #tpu.memory_space<smem>>) -> (i32, i32, i32, i32) {
    %c0_i32 = arith.constant 0 : i32
    %c0_i32_0 = arith.constant 0 : i32
    %c0_i32_1 = arith.constant 0 : i32
    %c0_i32_2 = arith.constant 0 : i32
    %c0_i32_3 = arith.constant 0 : i32
    return %c0_i32, %c0_i32_0, %c0_i32_1, %c0_i32_2 : i32, i32, i32, i32
  }
  func.func @transform_2(%arg0: i32, %arg1: memref<8xi32, #tpu.memory_space<smem>>, %arg2: memref<8xi32, #tpu.memory_space<smem>>) -> (i32, i32) {
    %c0_i32 = arith.constant 0 : i32
    %c0_i32_0 = arith.constant 0 : i32
    %c0_i32_1 = arith.constant 0 : i32
    return %c0_i32, %c0_i32_0 : i32, i32
  }
  func.func @transform_3(%arg0: i32, %arg1: memref<8xi32, #tpu.memory_space<smem>>, %arg2: memref<8xi32, #tpu.memory_space<smem>>) -> (i32, i32, i32, i32) {
    %c0_i32 = arith.constant 0 : i32
    %c0_i32_0 = arith.constant 0 : i32
    %c0_i32_1 = arith.constant 0 : i32
    %c0_i32_2 = arith.constant 0 : i32
    %c0_i32_3 = arith.constant 0 : i32
    return %c0_i32, %c0_i32_0, %c0_i32_1, %c0_i32_2 : i32, i32, i32, i32
  }
  func.func @transform_4(%arg0: i32, %arg1: memref<8xi32, #tpu.memory_space<smem>>, %arg2: memref<8xi32, #tpu.memory_space<smem>>) -> (i32, i32) {
    %c0_i32 = arith.constant 0 : i32
    %c0_i32_0 = arith.constant 0 : i32
    %c0_i32_1 = arith.constant 0 : i32
    return %c0_i32, %c0_i32_0 : i32, i32
  }
  func.func @transform_5(%arg0: i32, %arg1: memref<8xi32, #tpu.memory_space<smem>>, %arg2: memref<8xi32, #tpu.memory_space<smem>>) -> (i32, i32, i32) {
    %c0_i32 = arith.constant 0 : i32
    %c0_i32_0 = arith.constant 0 : i32
    %c0_i32_1 = arith.constant 0 : i32
    return %arg0, %c0_i32, %c0_i32_0 : i32, i32, i32
  }
}

module attributes {stable_mosaic.version = 11 : i64} {
  func.func @_res_ln_kernel(%arg0: i32, %arg1: memref<64x16xf32, #tpu.memory_space<vmem>>, %arg2: memref<64x16xf32, #tpu.memory_space<vmem>>, %arg3: memref<1x16xf32, #tpu.memory_space<vmem>>, %arg4: memref<1x16xf32, #tpu.memory_space<vmem>>, %arg5: memref<64x16xf32, #tpu.memory_space<vmem>>) attributes {dimension_semantics = [#tpu.dimension_semantics<parallel>], iteration_bounds = array<i64: 1>, scalar_prefetch = 0 : i64, scratch_operands = 0 : i64, tpu.core_type = #tpu.core_type<tc>, window_params = [{transform_indices = @transform_0, window_bounds = array<i64: 64, 16>}, {transform_indices = @transform_1, window_bounds = array<i64: 64, 16>}, {pipeline_mode = #tpu.pipeline_mode<synchronous>, transform_indices = @transform_2, window_bounds = array<i64: 1, 16>}, {pipeline_mode = #tpu.pipeline_mode<synchronous>, transform_indices = @transform_3, window_bounds = array<i64: 1, 16>}, {transform_indices = @transform_4, window_bounds = array<i64: 64, 16>}]} {
    %c0 = arith.constant 0 : index
    %c0_0 = arith.constant 0 : index
    %0 = vector.load %arg1[%c0, %c0_0] : memref<64x16xf32, #tpu.memory_space<vmem>>, vector<64x16xf32>
    %c0_1 = arith.constant 0 : index
    %c0_2 = arith.constant 0 : index
    %1 = vector.load %arg2[%c0_1, %c0_2] : memref<64x16xf32, #tpu.memory_space<vmem>>, vector<64x16xf32>
    %2 = arith.addf %0, %1 : vector<64x16xf32>
    %cst = arith.constant dense<0.000000e+00> : vector<64xf32>
    %3 = vector.multi_reduction <add>, %2, %cst [1] : vector<64x16xf32> to vector<64xf32>
    %4 = vector.shape_cast %3 : vector<64xf32> to vector<64x1xf32>
    %cst_3 = arith.constant 1.600000e+01 : f32
    %5 = vector.broadcast %cst_3 : f32 to vector<64x1xf32>
    %6 = arith.divf %4, %5 : vector<64x1xf32>
    %7 = vector.broadcast %6 : vector<64x1xf32> to vector<64x16xf32>
    %8 = arith.subf %2, %7 : vector<64x16xf32>
    %9 = arith.mulf %8, %8 : vector<64x16xf32>
    %cst_4 = arith.constant dense<0.000000e+00> : vector<64xf32>
    %10 = vector.multi_reduction <add>, %9, %cst_4 [1] : vector<64x16xf32> to vector<64xf32>
    %11 = vector.shape_cast %10 : vector<64xf32> to vector<64x1xf32>
    %cst_5 = arith.constant 1.600000e+01 : f32
    %12 = vector.broadcast %cst_5 : f32 to vector<64x1xf32>
    %13 = arith.divf %11, %12 : vector<64x1xf32>
    %cst_6 = arith.constant 9.99999974E-6 : f32
    %14 = vector.broadcast %cst_6 : f32 to vector<64x1xf32>
    %15 = arith.addf %13, %14 : vector<64x1xf32>
    %16 = math.rsqrt %15 : vector<64x1xf32>
    %17 = vector.broadcast %16 : vector<64x1xf32> to vector<64x16xf32>
    %18 = arith.mulf %8, %17 : vector<64x16xf32>
    %c0_7 = arith.constant 0 : index
    %c0_8 = arith.constant 0 : index
    %19 = vector.load %arg3[%c0_7, %c0_8] : memref<1x16xf32, #tpu.memory_space<vmem>>, vector<1x16xf32>
    %20 = vector.broadcast %19 : vector<1x16xf32> to vector<64x16xf32>
    %21 = arith.mulf %18, %20 : vector<64x16xf32>
    %c0_9 = arith.constant 0 : index
    %c0_10 = arith.constant 0 : index
    %22 = vector.load %arg4[%c0_9, %c0_10] : memref<1x16xf32, #tpu.memory_space<vmem>>, vector<1x16xf32>
    %23 = vector.broadcast %22 : vector<1x16xf32> to vector<64x16xf32>
    %24 = arith.addf %21, %23 : vector<64x16xf32>
    %c0_11 = arith.constant 0 : index
    %c0_12 = arith.constant 0 : index
    %25 = vector.load %arg5[%c0_11, %c0_12] : memref<64x16xf32, #tpu.memory_space<vmem>>, vector<64x16xf32>
    tpu.vector_store %arg5[%c0_11, %c0_12], %24 {strides = array<i32>} : memref<64x16xf32, #tpu.memory_space<vmem>>, vector<64x16xf32>,
    return
  }
  func.func @transform_0(%arg0: i32) -> (i32, i32) {
    %c0_i32 = arith.constant 0 : i32
    %c0_i32_0 = arith.constant 0 : i32
    return %arg0, %c0_i32 : i32, i32
  }
  func.func @transform_1(%arg0: i32) -> (i32, i32) {
    %c0_i32 = arith.constant 0 : i32
    %c0_i32_0 = arith.constant 0 : i32
    return %arg0, %c0_i32 : i32, i32
  }
  func.func @transform_2(%arg0: i32) -> (i32, i32) {
    %c0_i32 = arith.constant 0 : i32
    %c0_i32_0 = arith.constant 0 : i32
    %c0_i32_1 = arith.constant 0 : i32
    return %c0_i32, %c0_i32_0 : i32, i32
  }
  func.func @transform_3(%arg0: i32) -> (i32, i32) {
    %c0_i32 = arith.constant 0 : i32
    %c0_i32_0 = arith.constant 0 : i32
    %c0_i32_1 = arith.constant 0 : i32
    return %c0_i32, %c0_i32_0 : i32, i32
  }
  func.func @transform_4(%arg0: i32) -> (i32, i32) {
    %c0_i32 = arith.constant 0 : i32
    %c0_i32_0 = arith.constant 0 : i32
    return %arg0, %c0_i32 : i32, i32
  }
}

module attributes {stable_mosaic.version = 11 : i64} {
  func.func @_head_kernel(%arg0: i32, %arg1: memref<32x16xf32, #tpu.memory_space<vmem>>, %arg2: memref<16x256xf32, #tpu.memory_space<vmem>>, %arg3: memref<1x256xf32, #tpu.memory_space<vmem>>, %arg4: memref<256x4xf32, #tpu.memory_space<vmem>>, %arg5: memref<1x4xf32, #tpu.memory_space<vmem>>, %arg6: memref<32x4xf32, #tpu.memory_space<vmem>>) attributes {dimension_semantics = [#tpu.dimension_semantics<parallel>], iteration_bounds = array<i64: 1>, scalar_prefetch = 0 : i64, scratch_operands = 0 : i64, tpu.core_type = #tpu.core_type<tc>, window_params = [{transform_indices = @transform_0, window_bounds = array<i64: 32, 16>}, {pipeline_mode = #tpu.pipeline_mode<synchronous>, transform_indices = @transform_1, window_bounds = array<i64: 16, 256>}, {pipeline_mode = #tpu.pipeline_mode<synchronous>, transform_indices = @transform_2, window_bounds = array<i64: 1, 256>}, {pipeline_mode = #tpu.pipeline_mode<synchronous>, transform_indices = @transform_3, window_bounds = array<i64: 256, 4>}, {pipeline_mode = #tpu.pipeline_mode<synchronous>, transform_indices = @transform_4, window_bounds = array<i64: 1, 4>}, {transform_indices = @transform_5, window_bounds = array<i64: 32, 4>}]} {
    %c0 = arith.constant 0 : index
    %c0_0 = arith.constant 0 : index
    %0 = vector.load %arg1[%c0, %c0_0] : memref<32x16xf32, #tpu.memory_space<vmem>>, vector<32x16xf32>
    %cst = arith.constant 5.000000e-01 : f32
    %1 = vector.broadcast %cst : f32 to vector<32x16xf32>
    %2 = arith.mulf %1, %0 : vector<32x16xf32>
    %cst_1 = arith.constant 0.707106769 : f32
    %3 = vector.broadcast %cst_1 : f32 to vector<32x16xf32>
    %4 = arith.mulf %0, %3 : vector<32x16xf32>
    %5 = math.absf %4 : vector<32x16xf32>
    %cst_2 = arith.constant 0.327591091 : f32
    %6 = vector.broadcast %cst_2 : f32 to vector<32x16xf32>
    %7 = arith.mulf %6, %5 : vector<32x16xf32>
    %cst_3 = arith.constant 1.000000e+00 : f32
    %8 = vector.broadcast %cst_3 : f32 to vector<32x16xf32>
    %9 = arith.addf %8, %7 : vector<32x16xf32>
    %10 = tpu.reciprocal %9 {approx = true} : vector<32x16xf32> -> vector<32x16xf32>
    %cst_4 = arith.constant 1.06140542 : f32
    %11 = vector.broadcast %cst_4 : f32 to vector<32x16xf32>
    %12 = arith.mulf %10, %11 : vector<32x16xf32>
    %cst_5 = arith.constant -1.45315206 : f32
    %13 = vector.broadcast %cst_5 : f32 to vector<32x16xf32>
    %14 = arith.addf %13, %12 : vector<32x16xf32>
    %15 = arith.mulf %10, %14 : vector<32x16xf32>
    %cst_6 = arith.constant 1.42141378 : f32
    %16 = vector.broadcast %cst_6 : f32 to vector<32x16xf32>
    %17 = arith.addf %16, %15 : vector<32x16xf32>
    %18 = arith.mulf %10, %17 : vector<32x16xf32>
    %cst_7 = arith.constant -0.284496725 : f32
    %19 = vector.broadcast %cst_7 : f32 to vector<32x16xf32>
    %20 = arith.addf %19, %18 : vector<32x16xf32>
    %21 = arith.mulf %10, %20 : vector<32x16xf32>
    %cst_8 = arith.constant 0.254829586 : f32
    %22 = vector.broadcast %cst_8 : f32 to vector<32x16xf32>
    %23 = arith.addf %22, %21 : vector<32x16xf32>
    %24 = arith.mulf %10, %23 : vector<32x16xf32>
    %cst_9 = arith.constant 0.000000e+00 : f32
    %25 = vector.broadcast %cst_9 : f32 to vector<32x16xf32>
    %26 = arith.subf %25, %5 : vector<32x16xf32>
    %27 = arith.mulf %26, %5 : vector<32x16xf32>
    %28 = math.exp %27 : vector<32x16xf32>
    %29 = arith.mulf %24, %28 : vector<32x16xf32>
    %cst_10 = arith.constant 1.000000e+00 : f32
    %30 = vector.broadcast %cst_10 : f32 to vector<32x16xf32>
    %31 = arith.subf %30, %29 : vector<32x16xf32>
    %cst_11 = arith.constant 0.000000e+00 : f32
    %32 = vector.broadcast %cst_11 : f32 to vector<32x16xf32>
    %33 = arith.cmpf oge, %4, %32 : vector<32x16xf32>
    %cst_12 = arith.constant 0.000000e+00 : f32
    %34 = vector.broadcast %cst_12 : f32 to vector<32x16xf32>
    %35 = arith.subf %34, %31 : vector<32x16xf32>
    %36 = arith.select %33, %31, %35 : vector<32x16xi1>, vector<32x16xf32>
    %cst_13 = arith.constant 1.000000e+00 : f32
    %37 = vector.broadcast %cst_13 : f32 to vector<32x16xf32>
    %38 = arith.addf %37, %36 : vector<32x16xf32>
    %39 = arith.mulf %2, %38 : vector<32x16xf32>
    %c0_14 = arith.constant 0 : index
    %c0_15 = arith.constant 0 : index
    %40 = vector.load %arg2[%c0_14, %c0_15] : memref<16x256xf32, #tpu.memory_space<vmem>>, vector<16x256xf32>
    %cst_16 = arith.constant dense<0.000000e+00> : vector<32x256xf32>
    %41 = tpu.matmul %39, %40, %cst_16 {dimension_numbers = #tpu.dot_dimension_numbers<[1], [0], [0], [1], [0, 0, 1, 1], [], []>} : vector<32x16xf32>, vector<16x256xf32>, vector<32x256xf32> -> vector<32x256xf32>
    %c0_17 = arith.constant 0 : index
    %c0_18 = arith.constant 0 : index
    %42 = vector.load %arg3[%c0_17, %c0_18] : memref<1x256xf32, #tpu.memory_space<vmem>>, vector<1x256xf32>
    %43 = vector.broadcast %42 : vector<1x256xf32> to vector<32x256xf32>
    %44 = arith.addf %41, %43 : vector<32x256xf32>
    %cst_19 = arith.constant 5.000000e-01 : f32
    %45 = vector.broadcast %cst_19 : f32 to vector<32x256xf32>
    %46 = arith.mulf %45, %44 : vector<32x256xf32>
    %cst_20 = arith.constant 0.707106769 : f32
    %47 = vector.broadcast %cst_20 : f32 to vector<32x256xf32>
    %48 = arith.mulf %44, %47 : vector<32x256xf32>
    %49 = math.absf %48 : vector<32x256xf32>
    %cst_21 = arith.constant 0.327591091 : f32
    %50 = vector.broadcast %cst_21 : f32 to vector<32x256xf32>
    %51 = arith.mulf %50, %49 : vector<32x256xf32>
    %cst_22 = arith.constant 1.000000e+00 : f32
    %52 = vector.broadcast %cst_22 : f32 to vector<32x256xf32>
    %53 = arith.addf %52, %51 : vector<32x256xf32>
    %54 = tpu.reciprocal %53 {approx = true} : vector<32x256xf32> -> vector<32x256xf32>
    %cst_23 = arith.constant 1.06140542 : f32
    %55 = vector.broadcast %cst_23 : f32 to vector<32x256xf32>
    %56 = arith.mulf %54, %55 : vector<32x256xf32>
    %cst_24 = arith.constant -1.45315206 : f32
    %57 = vector.broadcast %cst_24 : f32 to vector<32x256xf32>
    %58 = arith.addf %57, %56 : vector<32x256xf32>
    %59 = arith.mulf %54, %58 : vector<32x256xf32>
    %cst_25 = arith.constant 1.42141378 : f32
    %60 = vector.broadcast %cst_25 : f32 to vector<32x256xf32>
    %61 = arith.addf %60, %59 : vector<32x256xf32>
    %62 = arith.mulf %54, %61 : vector<32x256xf32>
    %cst_26 = arith.constant -0.284496725 : f32
    %63 = vector.broadcast %cst_26 : f32 to vector<32x256xf32>
    %64 = arith.addf %63, %62 : vector<32x256xf32>
    %65 = arith.mulf %54, %64 : vector<32x256xf32>
    %cst_27 = arith.constant 0.254829586 : f32
    %66 = vector.broadcast %cst_27 : f32 to vector<32x256xf32>
    %67 = arith.addf %66, %65 : vector<32x256xf32>
    %68 = arith.mulf %54, %67 : vector<32x256xf32>
    %cst_28 = arith.constant 0.000000e+00 : f32
    %69 = vector.broadcast %cst_28 : f32 to vector<32x256xf32>
    %70 = arith.subf %69, %49 : vector<32x256xf32>
    %71 = arith.mulf %70, %49 : vector<32x256xf32>
    %72 = math.exp %71 : vector<32x256xf32>
    %73 = arith.mulf %68, %72 : vector<32x256xf32>
    %cst_29 = arith.constant 1.000000e+00 : f32
    %74 = vector.broadcast %cst_29 : f32 to vector<32x256xf32>
    %75 = arith.subf %74, %73 : vector<32x256xf32>
    %cst_30 = arith.constant 0.000000e+00 : f32
    %76 = vector.broadcast %cst_30 : f32 to vector<32x256xf32>
    %77 = arith.cmpf oge, %48, %76 : vector<32x256xf32>
    %cst_31 = arith.constant 0.000000e+00 : f32
    %78 = vector.broadcast %cst_31 : f32 to vector<32x256xf32>
    %79 = arith.subf %78, %75 : vector<32x256xf32>
    %80 = arith.select %77, %75, %79 : vector<32x256xi1>, vector<32x256xf32>
    %cst_32 = arith.constant 1.000000e+00 : f32
    %81 = vector.broadcast %cst_32 : f32 to vector<32x256xf32>
    %82 = arith.addf %81, %80 : vector<32x256xf32>
    %83 = arith.mulf %46, %82 : vector<32x256xf32>
    %c0_33 = arith.constant 0 : index
    %c0_34 = arith.constant 0 : index
    %84 = vector.load %arg4[%c0_33, %c0_34] : memref<256x4xf32, #tpu.memory_space<vmem>>, vector<256x4xf32>
    %cst_35 = arith.constant dense<0.000000e+00> : vector<32x4xf32>
    %85 = tpu.matmul %83, %84, %cst_35 {dimension_numbers = #tpu.dot_dimension_numbers<[1], [0], [0], [1], [0, 0, 1, 1], [], []>} : vector<32x256xf32>, vector<256x4xf32>, vector<32x4xf32> -> vector<32x4xf32>
    %c0_36 = arith.constant 0 : index
    %c0_37 = arith.constant 0 : index
    %86 = vector.load %arg5[%c0_36, %c0_37] : memref<1x4xf32, #tpu.memory_space<vmem>>, vector<1x4xf32>
    %87 = vector.broadcast %86 : vector<1x4xf32> to vector<32x4xf32>
    %88 = arith.addf %85, %87 : vector<32x4xf32>
    %c0_38 = arith.constant 0 : index
    %c0_39 = arith.constant 0 : index
    %89 = vector.load %arg6[%c0_38, %c0_39] : memref<32x4xf32, #tpu.memory_space<vmem>>, vector<32x4xf32>
    tpu.vector_store %arg6[%c0_38, %c0_39], %88 {strides = array<i32>} : memref<32x4xf32, #tpu.memory_space<vmem>>, vector<32x4xf32>,
    return
  }
  func.func @transform_0(%arg0: i32) -> (i32, i32) {
    %c0_i32 = arith.constant 0 : i32
    %c0_i32_0 = arith.constant 0 : i32
    return %arg0, %c0_i32 : i32, i32
  }
  func.func @transform_1(%arg0: i32) -> (i32, i32) {
    %c0_i32 = arith.constant 0 : i32
    %c0_i32_0 = arith.constant 0 : i32
    %c0_i32_1 = arith.constant 0 : i32
    return %c0_i32, %c0_i32_0 : i32, i32
  }
  func.func @transform_2(%arg0: i32) -> (i32, i32) {
    %c0_i32 = arith.constant 0 : i32
    %c0_i32_0 = arith.constant 0 : i32
    %c0_i32_1 = arith.constant 0 : i32
    return %c0_i32, %c0_i32_0 : i32, i32
  }
  func.func @transform_3(%arg0: i32) -> (i32, i32) {
    %c0_i32 = arith.constant 0 : i32
    %c0_i32_0 = arith.constant 0 : i32
    %c0_i32_1 = arith.constant 0 : i32
    return %c0_i32, %c0_i32_0 : i32, i32
  }
  func.func @transform_4(%arg0: i32) -> (i32, i32) {
    %c0_i32 = arith.constant 0 : i32
    %c0_i32_0 = arith.constant 0 : i32
    %c0_i32_1 = arith.constant 0 : i32
    return %c0_i32, %c0_i32_0 : i32, i32
  }
  func.func @transform_5(%arg0: i32) -> (i32, i32) {
    %c0_i32 = arith.constant 0 : i32
    %c0_i32_0 = arith.constant 0 : i32
    return %arg0, %c0_i32 : i32, i32
  }
}

</mosaic_0001>

<bundles_post_ra>
// kernel: _lambda_.8
= control target key start
LH: loop header
LB: loop body
LE: loop exit
PB: predicated region body
PF: predicated region fallthrough
CT: control target
= control target key end

     0   :  { %s384_s12 = smov 0   ;;  %s413_s0 = inlined_call_operand.vmem [shape: f32[64,16], index: 0, kind: input, shape index: {}]   ;;  %s414_s1 = inlined_call_operand.vmem [shape: f32[16,16], index: 1, kind: input, shape index: {}]   ;;  %s415_s2 = inlined_call_operand.vmem [shape: f32[16,16], index: 2, kind: input, shape index: {}]   ;;  %s416_s3 = inlined_call_operand.vmem [shape: f32[64,16], index: 3, kind: output, shape index: {}]  }
   0x1 LB: > { %s320_s13 = sadd.s32 4294967295, %s362_s12   ;;  %p324_p0 = scmp.ge.s32.totalorder %s362_s12, 1  ;;  %s362_s12 = sphi %s384_s12, %s13_s12  }
   0x2   : > { %p138_p1 = scmp.lt.s32.totalorder %s362_s12, 5 }
   0x4   : > { %p139_p2 = pnand %p324_p0, %p138_p1 }
   0x5   : > { %v176_v0 = vld [vmem:[%s414_s1] sm:$0xff] (!%p139_p2)  ;;  %v177_v1 = vld [vmem:[%s414_s1 + $0x8] sm:$0xff] (!%p139_p2)  ;;  %s325_s18 = sshll.u32 (!%p139_p2), %s320_s13, 1  ;;  %vm180_vm0 = vcmask (!%p139_p2), 130048  }
   0x6   : > { %142 = sbr.rel (%p139_p2) target bundleno = 234 (0xea), region = 32  ;;  %v344_v2 = vpack.c.bf16 (!%p139_p2), %v177_v1, %v176_v0  ;;  %p163_p3 = scmp.lt.s32.totalorder (!%p139_p2), %s325_s18, 7  ;;  %v178_v5 = vld [vmem:[%s415_s2] sm:$0xff] (!%p139_p2)  ;;  %v179_v6 = vld [vmem:[%s415_s2 + $0x8] sm:$0xff] (!%p139_p2) }
   0x8   : > { %345 = vmatprep.subr.bf16.mxu0 (!%p139_p2), %v344_v2 }
   0x9   : > { %347 = vmatpush3.bf16.msra.mxu0 (!%p139_p2), %v344_v2 }
   0xd   : > { %s418_s18 = smov (!%p163_p3, %s325_s18), 7 }
   0xe   : > { %s326_s19 = sshll.u32 %s418_s18, 3 }
   0xf   : > { %s166_s22 = scalar_lea.vmem %s413_s0, %s326_s19  ;;  %s172_s29 = scalar_lea.vmem %s416_s3, %s326_s19 }
  0x10   : > { %v174_v3 = vld [vmem:[%s166_s22] sm:$0xff]  ;;  %v175_v4 = vld [vmem:[%s166_s22 + $0x8] sm:$0xff] }
  0x11   : > { %341 = vmatprep.mubr.msk.f32.mxu0 %vm180_vm0, %v174_v3 }
  0x12   : > { %342 = vmatmul.mubr.msk.f32.vlgmr.msra.gmra.mrb[0].mxu0 %vm180_vm0, %v175_v4 }
  0xe5   : > { %v343_v7 = vpop.f32.mrb[0].mxu0 }
  0xe6   : > { %v253_v8 = vpop.f32.mrb[1].mxu0  ;;  %v259_v10 = vadd.f32 %v343_v7, %v179_v6 }
  0xe7   : > { %v254_v9 = vadd.f32 %v253_v8, %v178_v5 }
  0xe8   : > { %263 = vst.msk [vmem:[%s172_s29 + $0x8] sm:$0xff] %vm180_vm0, %v259_v10 }
  0xe9   : > { %262 = vst.msk [vmem:[%s172_s29] sm:$0xff] %vm180_vm0, %v254_v9 }
  0xea PF: > { %s13_s12 = sadd.s32 1, %s362_s12  }
  0xeb   : > { %p10_p4 = scmp.ge.s32.totalorder %s13_s12, 6  }
  0xed   :  { %12 = sbr.rel (!%p10_p4) target bundleno = 1 (0x1), region = 62 }

// kernel: _lambda_.9
= control target key start
LH: loop header
LB: loop body
LE: loop exit
PB: predicated region body
PF: predicated region fallthrough
CT: control target
= control target key end

     0   :  { %vm27_vm0 = vcmask 130048   ;;  %s221_s1 = inlined_call_operand.vmem [shape: f32[16,16], index: 1, kind: input, shape index: {}]   ;;  %s222_s0 = inlined_call_operand.vmem [shape: f32[32,16], index: 0, kind: input, shape index: {}]   ;;  %s223_s2 = inlined_call_operand.vmem [shape: f32[1,16], index: 2, kind: input, shape index: {}]   ;;  %s224_s3 = inlined_call_operand.vmem [shape: f32[32,16], index: 3, kind: output, shape index: {}]  }
   0x1   :  { %v18_v0 = vld [vmem:[%s221_s1] sm:$0xff]  ;;  %v19_v1 = vld [vmem:[%s221_s1 + $0x8] sm:$0xff]  ;;  %v16_v4 = vld [vmem:[%s222_s0 + $0x10] sm:$0xff] }
   0x2   :  { %v14_v2 = vld [vmem:[%s222_s0] sm:$0xff]  ;;  %v154_v3 = vpack.c.bf16 %v19_v1, %v18_v0  ;;  %151 = vmatprep.mubr.msk.f32.mxu1 %vm27_vm0, %v16_v4  ;;  %v15_v5 = vld [vmem:[%s222_s0 + $0x8] sm:$0xff]  ;;  %v17_v6 = vld [vmem:[%s222_s0 + $0x18] sm:$0xff] }
   0x3   :  { %148 = vmatprep.mubr.msk.f32.mxu0 %vm27_vm0, %v14_v2  ;;  %v133_v7 = vld [vmem:[%s223_s2] ss:$0 sm:$0xff] }
   0x4   :  { %155 = vmatprep.subr.bf16.mxu0 %v154_v3  ;;  %158 = vmatprep.subr.bf16.mxu1 %v154_v3 }
   0x5   :  { %157 = vmatpush3.bf16.msra.mxu0 %v154_v3  ;;  %159 = vmatpush3.bf16.msra.mxu1 %v154_v3 }
   0x8   :  { %149 = vmatmul.mubr.msk.f32.vlgmr.msra.gmra.mrb[0].mxu0 %vm27_vm0, %v15_v5  ;;  %152 = vmatmul.mubr.msk.f32.vlgmr.msra.gmra.mrb[0].mxu1 %vm27_vm0, %v17_v6 }
  0xdb   :  { %v150_v8 = vpop.f32.mrb[0].mxu0  ;;  %v153_v9 = vpop.f32.mrb[0].mxu1 }
  0xdc   :  { %v112_v10 = vadd.f32 %v150_v8, %v133_v7  ;;  %v122_v11 = vadd.f32 %v153_v9, %v133_v7  ;;  %v106_v12 = vpop.f32.mrb[1].mxu0  ;;  %v116_v13 = vpop.f32.mrb[1].mxu1 }
  0xdd   :  { %v107_v14 = vadd.f32 %v133_v7, %v106_v12  ;;  %v117_v15 = vadd.f32 %v133_v7, %v116_v13 }
  0xde   :  { %126 = vst.msk [vmem:[%s224_s3 + $0x8] sm:$0xff] %vm27_vm0, %v112_v10  ;;  %128 = vst.msk [vmem:[%s224_s3 + $0x18] sm:$0xff] %vm27_vm0, %v122_v11 }
  0xdf   :  { %125 = vst.msk [vmem:[%s224_s3] sm:$0xff] %vm27_vm0, %v107_v14  ;;  %127 = vst.msk [vmem:[%s224_s3 + $0x10] sm:$0xff] %vm27_vm0, %v117_v15 }

// kernel: _lambda_.10
= control target key start
LH: loop header
LB: loop body
LE: loop exit
PB: predicated region body
PF: predicated region fallthrough
CT: control target
= control target key end

     0   :  { %s8861_s0 = inlined_call_operand.vmem [shape: s32[8], index: 0, kind: input, shape index: {}]   ;;  %s8862_s2 = inlined_call_operand.vmem [shape: f32[8,10,18,16], index: 2, kind: input, shape index: {}]   ;;  %s8863_s3 = inlined_call_operand.vmem [shape: f32[3,3,16,128], index: 3, kind: input, shape index: {}]   ;;  %s8864_s4 = inlined_call_operand.vmem [shape: f32[1,128], index: 4, kind: input, shape index: {}]   ;;  %s8865_s5 = inlined_call_operand.vmem [shape: f32[3,3,128,128], index: 5, kind: input, shape index: {}]   ;;  %s8866_s6 = inlined_call_operand.vmem [shape: f32[1,128], index: 6, kind: input, shape index: {}]   ;;  %s8867_s7 = inlined_call_operand.vmem [shape: f32[8,128,128], index: 7, kind: output, shape index: {}]   ;;  %s8868_s1 = inlined_call_operand.vmem [shape: s32[8], index: 1, kind: input, shape index: {}]  }
   0x1   :  { %s12_s26 = sshll.u32 %s8861_s0, 4  ;;  %s16_s29 = sshll.u32 %s8868_s1, 4  ;;  %s13_s26 = int_to_ptr.vmem [resolvable:$true] %s12_s26  ;;  %s17_s29 = int_to_ptr.vmem [resolvable:$true] %s16_s29 }
   0x2   :  { %s6933_s30 = scalar_lea.vmem %s13_s26, 16  ;;  %p6938_p1 = scmp.lt.s32.totalorder %s13_s26, %s13_s26 }
   0x3   :  { %p6934_p0 = scmp.ne.s32.totalorder %s13_s26, %s6933_s30  ;;  %p6939_p2 = scmp.lt.s32.totalorder %s6933_s30, %s6933_s30 }
   0x5   :  { %p6940_p3 = por %p6939_p2, %p6938_p1 }
   0x7   :  { %p6941_p4 = pnand %p6940_p3, %p6934_p0 }
   0x9   :  { %6944 = shalt.err (!%p6941_p4)  }
   0xa   :  { %s6967_s8 = smov [#allocation4]   ;;  %s6945_s9 = scalar_lea.vmem %s17_s29, 16 }
   0xb   :  { %15 = dma.vmem_to_smem %s13_s26, 16, %s6967_s8, [#allocation3] }
   0xc   :  { %p6946_p5 = scmp.ne.s32.totalorder %s17_s29, %s6945_s9  ;;  %p6950_p6 = scmp.lt.s32.totalorder %s17_s29, %s17_s29 }
   0xd   :  { %p6951_p7 = scmp.lt.s32.totalorder %s6945_s9, %s6945_s9 }
   0xf   :  { %p6952_p8 = por %p6951_p7, %p6950_p6 }
  0x11   :  { %p6953_p9 = pnand %p6952_p8, %p6946_p5 }
  0x13   :  { %6956 = shalt.err (!%p6953_p9)  }
  0x14   :  { %s6968_s0 = smov [#allocation5]  }
  0x15   :  { %19 = dma.vmem_to_smem %s17_s29, 16, %s6968_s0, [#allocation3] }
  0x16   :  { %6961 = dma.done.wait [#allocation3], 32 }
  0x17   :  { %6962 = vsyncadd [#allocation3], 4294967264 }
  0x18   :  { %21 = sfence }
  0x19   :  { %s7016_s1 = smov 0  }
  0x1a LB: > { %s7022_s10 = sadd.s32 4294967295, %s6965_s1   ;;  %p4638_p10 = scmp.ge.s32.totalorder %s6965_s1, 1  ;;  %s6965_s1 = sphi %s7016_s1, %s27_s1  }
  0x1b   : > { %p199_p11 = scmp.lt.s32.totalorder %s6965_s1, 9 }
  0x1d   : > { %p200_p12 = pnand %p4638_p10, %p199_p11 }
  0x1f   : > { %203 = sbr.rel (%p200_p12) target bundleno = 1096 (0x448), region = 40 }
  0x26   : > { %v4642_v0 = vld [vmem:[%s8863_s3 + $0x10] sm:$0xff]  ;;  %v4643_v1 = vld [vmem:[%s8863_s3 + $0x18] sm:$0xff]  ;;  %p227_p13 = scmp.lt.s32.totalorder %s7022_s10, 7  ;;  %v285_v2 = vld [vmem:[%s8863_s3] sm:$0xff]  ;;  %vm306_vm0 = vcmask 130048   ;;  %s237_s17 = sld [smem:[#allocation4 + %s7022_s10]] }
  0x27   : > { %v6253_v3 = vpack.c.bf16 %v4643_v1, %v4642_v0  ;;  %v286_v4 = vld [vmem:[%s8863_s3 + $0x8] sm:$0xff]  ;;  %v4676_v6 = vld [vmem:[%s8863_s3 + $0x20] sm:$0xff]  ;;  %v4710_v26 = vld [vmem:[%s8863_s3 + $0x30] sm:$0xff]  ;;  %s238_s18 = sld [smem:[#allocation5 + %s7022_s10]] }
  0x28   : > { %s7040_s19 = scalar_select %p227_p13, %s7022_s10, 7  ;;  %v6257_v5 = vpack.c.bf16 %v286_v4, %v285_v2  ;;  %v4677_v7 = vld [vmem:[%s8863_s3 + $0x28] sm:$0xff]  ;;  %v4711_v27 = vld [vmem:[%s8863_s3 + $0x38] sm:$0xff]  ;;  %v4744_v45 = vld [vmem:[%s8863_s3 + $0x40] sm:$0xff] }
  0x29   : > { %6254 = vmatprep.subr.bf16.mxu0 %v6253_v3  ;;  %v6261_v11 = vpack.c.bf16 %v4677_v7, %v4676_v6  ;;  %v6265_v30 = vpack.c.bf16 %v4711_v27, %v4710_v26  ;;  %v4745_v46 = vld [vmem:[%s8863_s3 + $0x48] sm:$0xff]  ;;  %v4778_v63 = vld [vmem:[%s8863_s3 + $0x50] sm:$0xff]  ;;  %v4779_v0 = vld [vmem:[%s8863_s3 + $0x58] sm:$0xff] }
  0x2a   : > { %6256 = vmatpush3.bf16.msra.mxu0 %v6253_v3  ;;  %s6849_s20 = smul.u32 240, %s7040_s19  ;;  %v6269_v49 = vpack.c.bf16 %v4745_v46, %v4744_v45  ;;  %v6273_v1 = vpack.c.bf16 %v4779_v0, %v4778_v63  ;;  %v4812_v4 = vld [vmem:[%s8863_s3 + $0x60] sm:$0xff]  ;;  %v5032_v46 = vld [vmem:[%s8865_s5 + $0x428] sm:$0xff]  ;;  %v5038_v0 = vld [vmem:[%s8865_s5 + $0x458] sm:$0xff]  ;;  %s5046_s10 = sshll.u32 %s7040_s19, 7 }
  0x2b   : > { %6258 = vmatprep.subr.bf16.mxu0 %v6257_v5  ;;  %v4880_v27 = vld [vmem:[%s8863_s3 + $0x80] sm:$0xff]  ;;  %s8835_s9 = scalar_lea.vmem %s8867_s7, %s5046_s10 }
  0x2c   : > { %s7052_s27 = scalar_lea.vmem %s8862_s2, %s6849_s20 }
  0x2d   : > { %v287_v8 = vld [vmem:[%s7052_s27 + $0x1] sm:$0xff]  ;;  %v288_v9 = vld [vmem:[%s7052_s27 + $0x9] sm:$0xff]  ;;  %v7057_v10 = vld [vmem:[%s7052_s27 + $0x19] sm:$0xff] }
  0x2e   : > { %5501 = vmatprep.mubr.msk.f32.mxu0 %vm306_vm0, %v287_v8  ;;  %v7064_v12 = vld [vmem:[%s7052_s27 + $0x21] sm:$0xff]  ;;  %v7067_v13 = vld [vmem:[%s7052_s27 + $0x31] sm:$0xff]  ;;  %v7074_v14 = vld [vmem:[%s7052_s27 + $0x39] sm:$0xff] }
  0x2f   : > { %5502 = vmatmul.mubr.msk.f32.vlgmr.msra.gmra.mrb[0].mxu0 %vm306_vm0, %v288_v9  ;;  %v7077_v15 = vld [vmem:[%s7052_s27 + $0x49] sm:$0xff]  ;;  %v7084_v16 = vld [vmem:[%s7052_s27 + $0x51] sm:$0xff]  ;;  %v7087_v17 = vld [vmem:[%s7052_s27 + $0x61] sm:$0xff] }
  0x30   : > { %6260 = vmatpush3.bf16.msra.mxu0 %v6257_v5  ;;  %5504 = vmatprep.mubr.msk.f32.mxu0 %vm306_vm0, %v7057_v10  ;;  %v7094_v18 = vld [vmem:[%s7052_s27 + $0x69] sm:$0xff]  ;;  %v7097_v19 = vld [vmem:[%s7052_s27 + $0x79] sm:$0xff]  ;;  %v7104_v20 = vld [vmem:[%s7052_s27 + $0x81] sm:$0xff] }
  0x31   : > { %6262 = vmatprep.subr.bf16.mxu0 %v6261_v11  ;;  %v7107_v21 = vld [vmem:[%s7052_s27 + $0x91] sm:$0xff]  ;;  %v7114_v22 = vld [vmem:[%s7052_s27 + $0x99] sm:$0xff]  ;;  %v7117_v23 = vld [vmem:[%s7052_s27 + $0xa9] sm:$0xff] }
  0x32   : > { %v7124_v24 = vld [vmem:[%s7052_s27 + $0xb1] sm:$0xff]  ;;  %v269_v25 = vld [vmem:[%s7052_s27] sm:$0xff]  ;;  %v270_v28 = vld [vmem:[%s7052_s27 + $0x8] sm:$0xff] }
  0x33   : > { %5505 = vmatmul.mubr.msk.f32.gmra.mrb[2].mxu0 %vm306_vm0, %v7064_v12  ;;  %v7138_v29 = vld [vmem:[%s7052_s27 + $0x18] sm:$0xff]  ;;  %v7144_v31 = vld [vmem:[%s7052_s27 + $0x20] sm:$0xff]  ;;  %v7147_v32 = vld [vmem:[%s7052_s27 + $0x30] sm:$0xff] }
  0x34   : > { %5507 = vmatprep.mubr.msk.f32.mxu0 %vm306_vm0, %v7067_v13  ;;  %v7154_v33 = vld [vmem:[%s7052_s27 + $0x38] sm:$0xff]  ;;  %v7157_v34 = vld [vmem:[%s7052_s27 + $0x48] sm:$0xff]  ;;  %v7164_v35 = vld [vmem:[%s7052_s27 + $0x50] sm:$0xff] }
  0x35   : > { %v7167_v36 = vld [vmem:[%s7052_s27 + $0x60] sm:$0xff]  ;;  %v7174_v37 = vld [vmem:[%s7052_s27 + $0x68] sm:$0xff]  ;;  %v7177_v38 = vld [vmem:[%s7052_s27 + $0x78] sm:$0xff] }
  0x36   : > { %v7184_v39 = vld [vmem:[%s7052_s27 + $0x80] sm:$0xff]  ;;  %v7187_v40 = vld [vmem:[%s7052_s27 + $0x90] sm:$0xff]  ;;  %v7194_v41 = vld [vmem:[%s7052_s27 + $0x98] sm:$0xff] }
  0x37   : > { %5508 = vmatmul.mubr.msk.f32.gmra.mrb[4].mxu0 %vm306_vm0, %v7074_v14  ;;  %v7197_v42 = vld [vmem:[%s7052_s27 + $0xa8] sm:$0xff]  ;;  %v7204_v43 = vld [vmem:[%s7052_s27 + $0xb0] sm:$0xff]  ;;  %v7218_v48 = vld [vmem:[%s7052_s27 + $0x1a] sm:$0xff] }
  0x38   : > { %5510 = vmatprep.mubr.msk.f32.mxu0 %vm306_vm0, %v7077_v15  ;;  %v693_v44 = vld [vmem:[%s7052_s27 + $0x2] sm:$0xff]  ;;  %v694_v47 = vld [vmem:[%s7052_s27 + $0xa] sm:$0xff]  ;;  %v7227_v51 = vld [vmem:[%s7052_s27 + $0x32] sm:$0xff] }
  0x39   : > { %v7224_v50 = vld [vmem:[%s7052_s27 + $0x22] sm:$0xff]  ;;  %v7234_v52 = vld [vmem:[%s7052_s27 + $0x3a] sm:$0xff]  ;;  %v7237_v53 = vld [vmem:[%s7052_s27 + $0x4a] sm:$0xff] }
  0x3a   : > { %v7244_v54 = vld [vmem:[%s7052_s27 + $0x52] sm:$0xff]  ;;  %v7247_v55 = vld [vmem:[%s7052_s27 + $0x62] sm:$0xff]  ;;  %v7254_v56 = vld [vmem:[%s7052_s27 + $0x6a] sm:$0xff] }
  0x3b   : > { %5511 = vmatmul.mubr.msk.f32.gmra.mrb[6].mxu0 %vm306_vm0, %v7084_v16  ;;  %v7257_v57 = vld [vmem:[%s7052_s27 + $0x7a] sm:$0xff]  ;;  %v7264_v58 = vld [vmem:[%s7052_s27 + $0x82] sm:$0xff]  ;;  %v7267_v59 = vld [vmem:[%s7052_s27 + $0x92] sm:$0xff] }
  0x3c   : > { %5513 = vmatprep.mubr.msk.f32.mxu0 %vm306_vm0, %v7087_v17  ;;  %v7274_v60 = vld [vmem:[%s7052_s27 + $0x9a] sm:$0xff]  ;;  %v7277_v61 = vld [vmem:[%s7052_s27 + $0xaa] sm:$0xff]  ;;  %v7284_v62 = vld [vmem:[%s7052_s27 + $0xb2] sm:$0xff] }
  0x3d   : > { %v7321_v2 = vld [vmem:[%s7052_s27 + $0xc0] sm:$0xff]  ;;  %v7328_v3 = vld [vmem:[%s7052_s27 + $0xc8] sm:$0xff]  ;;  %v4846_v9 = vld [vmem:[%s8863_s3 + $0x70] sm:$0xff] }
  0x3e   : > { %v4813_v5 = vld [vmem:[%s8863_s3 + $0x68] sm:$0xff] }
  0x3f   : > { %5514 = vmatmul.mubr.msk.f32.gmra.mrb[8].mxu0 %vm306_vm0, %v7094_v18  ;;  %v6277_v6 = vpack.c.bf16 %v4813_v5, %v4812_v4  ;;  %v7365_v7 = vld [vmem:[%s7052_s27 + $0xc1] sm:$0xff]  ;;  %v7372_v8 = vld [vmem:[%s7052_s27 + $0xc9] sm:$0xff] }
  0x40   : > { %5516 = vmatprep.mubr.msk.f32.mxu0 %vm306_vm0, %v7097_v19  ;;  %v4777_v26 = vld [vmem:[%s7052_s27 + $0xca] sm:$0xff]  ;;  %v5039_v4 = vld [vmem:[%s8865_s5 + $0x460] sm:$0xff] }
  0x43   : > { %5517 = vmatmul.mubr.msk.f32.gmra.mrb[10].mxu0 %vm306_vm0, %v7104_v20 }
  0x44   : > { %5519 = vmatprep.mubr.msk.f32.mxu0 %vm306_vm0, %v7107_v21 }
  0x47   : > { %5520 = vmatmul.mubr.msk.f32.gmra.mrb[12].mxu0 %vm306_vm0, %v7114_v22 }
  0x48   : > { %5522 = vmatprep.mubr.msk.f32.mxu0 %vm306_vm0, %v7117_v23 }
  0x4b   : > { %5523 = vmatmul.mubr.msk.f32.gmra.mrb[14].mxu0 %vm306_vm0, %v7124_v24 }
  0x4c   : > { %5529 = vmatprep.mubr.msk.f32.mxu0 %vm306_vm0, %v269_v25  ;;  %v4776_v25 = vld [vmem:[%s7052_s27 + $0xc2] sm:$0xff] }
  0x4f   : > { %5530 = vmatmul.mubr.msk.f32.vlgmr.msra.gmra.mrb[0].mxu0 %vm306_vm0, %v270_v28  ;;  %v4881_v28 = vld [vmem:[%s8863_s3 + $0x88] sm:$0xff] }
  0x50   : > { %6264 = vmatpush3.bf16.msra.mxu0 %v6261_v11  ;;  %5532 = vmatprep.mubr.msk.f32.mxu0 %vm306_vm0, %v7138_v29  ;;  %v6969_v11 = vmov 0.0  }
  0x51   : > { %6266 = vmatprep.subr.bf16.mxu0 %v6265_v30  ;;  %243 = vst [vmem:[#allocation2 + $0x20] sm:$0xff] %v6969_v11  ;;  %244 = vst [vmem:[#allocation2 + $0x28] sm:$0x3] %v6969_v11 }
  0x52   : > { %239 = vst [vmem:[#allocation2] sm:$0xff] %v6969_v11  ;;  %240 = vst [vmem:[#allocation2 + $0x8] sm:$0xff] %v6969_v11 }
  0x53   : > { %5533 = vmatmul.mubr.msk.f32.gmra.mrb[2].mxu0 %vm306_vm0, %v7144_v31  ;;  %241 = vst [vmem:[#allocation2 + $0x10] sm:$0x3] %v6969_v11  ;;  %242 = vst [vmem:[#allocation2 + $0x18] sm:$0xff] %v6969_v11 }
  0x54   : > { %5535 = vmatprep.mubr.msk.f32.mxu0 %vm306_vm0, %v7147_v32  ;;  %245 = vst [vmem:[#allocation2 + $0x30] sm:$0xff] %v6969_v11  ;;  %246 = vst [vmem:[#allocation2 + $0x38] sm:$0xff] %v6969_v11 }
  0x55   : > { %247 = vst [vmem:[#allocation2 + $0x40] sm:$0x3] %v6969_v11  ;;  %248 = vst [vmem:[#allocation2 + $0x48] sm:$0xff] %v6969_v11 }
  0x56   : > { %249 = vst [vmem:[#allocation2 + $0x50] sm:$0xff] %v6969_v11  ;;  %250 = vst [vmem:[#allocation2 + $0x58] sm:$0x3] %v6969_v11 }
  0x57   : > { %5536 = vmatmul.mubr.msk.f32.gmra.mrb[4].mxu0 %vm306_vm0, %v7154_v33  ;;  %251 = vst [vmem:[#allocation2 + $0x60] sm:$0xff] %v6969_v11  ;;  %252 = vst [vmem:[#allocation2 + $0x68] sm:$0xff] %v6969_v11 }
  0x58   : > { %5538 = vmatprep.mubr.msk.f32.mxu0 %vm306_vm0, %v7157_v34  ;;  %253 = vst [vmem:[#allocation2 + $0x70] sm:$0x3] %v6969_v11  ;;  %254 = vst [vmem:[#allocation2 + $0x78] sm:$0xff] %v6969_v11 }
  0x59   : > { %255 = vst [vmem:[#allocation2 + $0x80] sm:$0xff] %v6969_v11  ;;  %256 = vst [vmem:[#allocation2 + $0x88] sm:$0x3] %v6969_v11  ;;  %v2858_v5 = vld [vmem:[#allocation2 + $0x1] sm:$0xff] }
  0x5a   : > { %257 = vst [vmem:[#allocation2 + $0x90] sm:$0xff] %v6969_v11  ;;  %258 = vst [vmem:[#allocation2 + $0x98] sm:$0xff] %v6969_v11  ;;  %5781 = vmatprep.mubr.f32.mxu1 %v2858_v5 }
  0x5b   : > { %5539 = vmatmul.mubr.msk.f32.gmra.mrb[6].mxu0 %vm306_vm0, %v7164_v35  ;;  %259 = vst [vmem:[#allocation2 + $0xa0] sm:$0x3] %v6969_v11  ;;  %260 = vst [vmem:[#allocation2 + $0xa8] sm:$0xff] %v6969_v11 }
  0x5c   : > { %5541 = vmatprep.mubr.msk.f32.mxu0 %vm306_vm0, %v7167_v36  ;;  %261 = vst [vmem:[#allocation2 + $0xb0] sm:$0xff] %v6969_v11  ;;  %262 = vst [vmem:[#allocation2 + $0xb8] sm:$0x3] %v6969_v11 }
  0x5d   : > { %263 = vst [vmem:[#allocation2 + $0xc0] sm:$0xff] %v6969_v11  ;;  %264 = vst [vmem:[#allocation2 + $0xc8] sm:$0xff] %v6969_v11 }
  0x5e   : > { %265 = vst [vmem:[#allocation2 + $0xd0] sm:$0x3] %v6969_v11  ;;  %266 = vst [vmem:[#allocation2 + $0xd8] sm:$0xff] %v6969_v11 }
  0x5f   : > { %5542 = vmatmul.mubr.msk.f32.gmra.mrb[8].mxu0 %vm306_vm0, %v7174_v37  ;;  %267 = vst [vmem:[#allocation2 + $0xe0] sm:$0xff] %v6969_v11  ;;  %268 = vst [vmem:[#allocation2 + $0xe8] sm:$0x3] %v6969_v11 }
  0x60   : > { %5544 = vmatprep.mubr.msk.f32.mxu0 %vm306_vm0, %v7177_v38 }
  0x63   : > { %5545 = vmatmul.mubr.msk.f32.gmra.mrb[10].mxu0 %vm306_vm0, %v7184_v39 }
  0x64   : > { %5547 = vmatprep.mubr.msk.f32.mxu0 %vm306_vm0, %v7187_v40 }
  0x67   : > { %5548 = vmatmul.mubr.msk.f32.gmra.mrb[12].mxu0 %vm306_vm0, %v7194_v41 }
  0x68   : > { %5550 = vmatprep.mubr.msk.f32.mxu0 %vm306_vm0, %v7197_v42 }
  0x6b   : > { %5551 = vmatmul.mubr.msk.f32.gmra.mrb[14].mxu0 %vm306_vm0, %v7204_v43 }
  0x6c   : > { %5557 = vmatprep.mubr.msk.f32.mxu0 %vm306_vm0, %v693_v44  ;;  %v5031_v44 = vld [vmem:[%s8865_s5 + $0x420] sm:$0xff] }
  0x6f   : > { %5558 = vmatmul.mubr.msk.f32.vlgmr.msra.gmra.mrb[0].mxu0 %vm306_vm0, %v694_v47  ;;  %v7600_v47 = vpack.c.bf16 %v5032_v46, %v5031_v44 }
  0x70   : > { %6268 = vmatpush3.bf16.msra.mxu0 %v6265_v30  ;;  %5560 = vmatprep.mubr.msk.f32.mxu0 %vm306_vm0, %v7218_v48  ;;  %v4810_v30 = vld [vmem:[%s7052_s27 + $0xd8] sm:$0xff] }
  0x71   : > { %6270 = vmatprep.subr.bf16.mxu0 %v6269_v49  ;;  %8890 = vst [vmem:[#allocation9_spill] sm:$0xff] %v7600_v47 }
  0x73   : > { %5561 = vmatmul.mubr.msk.f32.gmra.mrb[2].mxu0 %vm306_vm0, %v7224_v50 }
  0x74   : > { %5563 = vmatprep.mubr.msk.f32.mxu0 %vm306_vm0, %v7227_v51 }
  0x77   : > { %5564 = vmatmul.mubr.msk.f32.gmra.mrb[4].mxu0 %vm306_vm0, %v7234_v52 }
  0x78   : > { %5566 = vmatprep.mubr.msk.f32.mxu0 %vm306_vm0, %v7237_v53 }
  0x7b   : > { %5567 = vmatmul.mubr.msk.f32.gmra.mrb[6].mxu0 %vm306_vm0, %v7244_v54 }
  0x7c   : > { %5569 = vmatprep.mubr.msk.f32.mxu0 %vm306_vm0, %v7247_v55 }
  0x7f   : > { %5570 = vmatmul.mubr.msk.f32.gmra.mrb[8].mxu0 %vm306_vm0, %v7254_v56 }
  0x80   : > { %5572 = vmatprep.mubr.msk.f32.mxu0 %vm306_vm0, %v7257_v57 }
  0x83   : > { %5573 = vmatmul.mubr.msk.f32.gmra.mrb[10].mxu0 %vm306_vm0, %v7264_v58 }
  0x84   : > { %5575 = vmatprep.mubr.msk.f32.mxu0 %vm306_vm0, %v7267_v59 }
  0x87   : > { %5576 = vmatmul.mubr.msk.f32.gmra.mrb[12].mxu0 %vm306_vm0, %v7274_v60 }
  0x88   : > { %5578 = vmatprep.mubr.msk.f32.mxu0 %vm306_vm0, %v7277_v61 }
  0x8b   : > { %5579 = vmatmul.mubr.msk.f32.gmra.mrb[14].mxu0 %vm306_vm0, %v7284_v62 }
  0x8c   : > { %5585 = vmatprep.mubr.msk.f32.mxu0 %vm306_vm0, %v7138_v29  ;;  %v6285_v29 = vpack.c.bf16 %v4881_v28, %v4880_v27  ;;  %v5042_v27 = vld [vmem:[%s8865_s5 + $0x478] sm:$0xff] }
  0x8f   : > { %5586 = vmatmul.mubr.msk.f32.vlgmr.msra.gmra.mrb[0].mxu0 %vm306_vm0, %v7144_v31  ;;  %v4811_v31 = vld [vmem:[%s7052_s27 + $0xe0] sm:$0xff] }
  0x90   : > { %6272 = vmatpush3.bf16.msra.mxu0 %v6269_v49  ;;  %5588 = vmatprep.mubr.msk.f32.mxu0 %vm306_vm0, %v7147_v32  ;;  %v4926_v49 = vld [vmem:[%s8865_s5 + $0xd8] sm:$0xff] }
  0x91   : > { %6274 = vmatprep.subr.bf16.mxu0 %v6273_v1 }
  0x93   : > { %5589 = vmatmul.mubr.msk.f32.gmra.mrb[2].mxu0 %vm306_vm0, %v7154_v33 }
  0x94   : > { %5591 = vmatprep.mubr.msk.f32.mxu0 %vm306_vm0, %v7157_v34 }
  0x97   : > { %5592 = vmatmul.mubr.msk.f32.gmra.mrb[4].mxu0 %vm306_vm0, %v7164_v35 }
  0x98   : > { %5594 = vmatprep.mubr.msk.f32.mxu0 %vm306_vm0, %v7167_v36 }
  0x9b   : > { %5595 = vmatmul.mubr.msk.f32.gmra.mrb[6].mxu0 %vm306_vm0, %v7174_v37 }
  0x9c   : > { %5597 = vmatprep.mubr.msk.f32.mxu0 %vm306_vm0, %v7177_v38 }
  0x9f   : > { %5598 = vmatmul.mubr.msk.f32.gmra.mrb[8].mxu0 %vm306_vm0, %v7184_v39 }
  0xa0   : > { %5600 = vmatprep.mubr.msk.f32.mxu0 %vm306_vm0, %v7187_v40 }
  0xa3   : > { %5601 = vmatmul.mubr.msk.f32.gmra.mrb[10].mxu0 %vm306_vm0, %v7194_v41 }
  0xa4   : > { %5603 = vmatprep.mubr.msk.f32.mxu0 %vm306_vm0, %v7197_v42 }
  0xa7   : > { %5604 = vmatmul.mubr.msk.f32.gmra.mrb[12].mxu0 %vm306_vm0, %v7204_v43 }
  0xa8   : > { %5606 = vmatprep.mubr.msk.f32.mxu0 %vm306_vm0, %v7321_v2 }
  0xab   : > { %5607 = vmatmul.mubr.msk.f32.gmra.mrb[14].mxu0 %vm306_vm0, %v7328_v3 }
  0xac   : > { %5613 = vmatprep.mubr.msk.f32.mxu0 %vm306_vm0, %v7057_v10  ;;  %v4847_v10 = vld [vmem:[%s8863_s3 + $0x78] sm:$0xff] }
  0xaf   : > { %5614 = vmatmul.mubr.msk.f32.vlgmr.msra.gmra.mrb[0].mxu0 %vm306_vm0, %v7064_v12  ;;  %v6281_v12 = vpack.c.bf16 %v4847_v10, %v4846_v9  ;;  %v2844_v10 = vld [vmem:[%s8865_s5 + $0x10] sm:$0xff] }
  0xb0   : > { %6276 = vmatpush3.bf16.msra.mxu0 %v6273_v1  ;;  %5616 = vmatprep.mubr.msk.f32.mxu0 %vm306_vm0, %v7067_v13 }
  0xb1   : > { %6278 = vmatprep.subr.bf16.mxu0 %v6277_v6 }
  0xb3   : > { %5617 = vmatmul.mubr.msk.f32.gmra.mrb[2].mxu0 %vm306_vm0, %v7074_v14 }
  0xb4   : > { %5619 = vmatprep.mubr.msk.f32.mxu0 %vm306_vm0, %v7077_v15 }
  0xb7   : > { %5620 = vmatmul.mubr.msk.f32.gmra.mrb[4].mxu0 %vm306_vm0, %v7084_v16 }
  0xb8   : > { %5622 = vmatprep.mubr.msk.f32.mxu0 %vm306_vm0, %v7087_v17 }
  0xbb   : > { %5623 = vmatmul.mubr.msk.f32.gmra.mrb[6].mxu0 %vm306_vm0, %v7094_v18 }
  0xbc   : > { %5625 = vmatprep.mubr.msk.f32.mxu0 %vm306_vm0, %v7097_v19 }
  0xbf   : > { %5626 = vmatmul.mubr.msk.f32.gmra.mrb[8].mxu0 %vm306_vm0, %v7104_v20 }
  0xc0   : > { %5628 = vmatprep.mubr.msk.f32.mxu0 %vm306_vm0, %v7107_v21 }
  0xc3   : > { %5629 = vmatmul.mubr.msk.f32.gmra.mrb[10].mxu0 %vm306_vm0, %v7114_v22 }
  0xc4   : > { %5631 = vmatprep.mubr.msk.f32.mxu0 %vm306_vm0, %v7117_v23 }
  0xc7   : > { %5632 = vmatmul.mubr.msk.f32.gmra.mrb[12].mxu0 %vm306_vm0, %v7124_v24 }
  0xc8   : > { %5634 = vmatprep.mubr.msk.f32.mxu0 %vm306_vm0, %v7365_v7 }
  0xcb   : > { %5635 = vmatmul.mubr.msk.f32.gmra.mrb[14].mxu0 %vm306_vm0, %v7372_v8 }
  0xcc   : > { %5641 = vmatprep.mubr.msk.f32.mxu0 %vm306_vm0, %v7218_v48  ;;  %v4925_v48 = vld [vmem:[%s8865_s5 + $0xd0] sm:$0xff] }
  0xcf   : > { %5642 = vmatmul.mubr.msk.f32.vlgmr.msra.gmra.mrb[0].mxu0 %vm306_vm0, %v7224_v50  ;;  %v5033_v50 = vld [vmem:[%s8865_s5 + $0x430] sm:$0xff] }
  0xd0   : > { %6280 = vmatpush3.bf16.msra.mxu0 %v6277_v6  ;;  %5644 = vmatprep.mubr.msk.f32.mxu0 %vm306_vm0, %v7227_v51 }
  0xd1   : > { %6282 = vmatprep.subr.bf16.mxu0 %v6281_v12 }
  0xd3   : > { %5645 = vmatmul.mubr.msk.f32.gmra.mrb[2].mxu0 %vm306_vm0, %v7234_v52 }
  0xd4   : > { %5647 = vmatprep.mubr.msk.f32.mxu0 %vm306_vm0, %v7237_v53 }
  0xd7   : > { %5648 = vmatmul.mubr.msk.f32.gmra.mrb[4].mxu0 %vm306_vm0, %v7244_v54 }
  0xd8   : > { %5650 = vmatprep.mubr.msk.f32.mxu0 %vm306_vm0, %v7247_v55 }
  0xdb   : > { %5651 = vmatmul.mubr.msk.f32.gmra.mrb[6].mxu0 %vm306_vm0, %v7254_v56 }
  0xdc   : > { %5653 = vmatprep.mubr.msk.f32.mxu0 %vm306_vm0, %v7257_v57 }
  0xdf   : > { %5654 = vmatmul.mubr.msk.f32.gmra.mrb[8].mxu0 %vm306_vm0, %v7264_v58 }
  0xe0   : > { %5656 = vmatprep.mubr.msk.f32.mxu0 %vm306_vm0, %v7267_v59 }
  0xe3   : > { %5657 = vmatmul.mubr.msk.f32.gmra.mrb[10].mxu0 %vm306_vm0, %v7274_v60 }
  0xe4   : > { %5659 = vmatprep.mubr.msk.f32.mxu0 %vm306_vm0, %v7277_v61 }
  0xe7   : > { %5660 = vmatmul.mubr.msk.f32.gmra.mrb[12].mxu0 %vm306_vm0, %v7284_v62 }
  0xe8   : > { %5662 = vmatprep.mubr.msk.f32.mxu0 %vm306_vm0, %v4776_v25 }
  0xeb   : > { %5663 = vmatmul.mubr.msk.f32.gmra.mrb[14].mxu0 %vm306_vm0, %v4777_v26 }
  0xec   : > { %5669 = vmatprep.mubr.msk.f32.mxu0 %vm306_vm0, %v7147_v32  ;;  %v5027_v32 = vld [vmem:[%s8865_s5 + $0x400] sm:$0xff] }
  0xef   : > { %5670 = vmatmul.mubr.msk.f32.vlgmr.msra.gmra.mrb[0].mxu0 %vm306_vm0, %v7154_v33 }
  0xf0   : > { %6284 = vmatpush3.bf16.msra.mxu0 %v6281_v12  ;;  %5672 = vmatprep.mubr.msk.f32.mxu0 %vm306_vm0, %v7157_v34  ;;  %v5028_v34 = vld [vmem:[%s8865_s5 + $0x408] sm:$0xff]  ;;  %v2845_v12 = vld [vmem:[%s8865_s5 + $0x18] sm:$0xff] }
  0xf1   : > { %6286 = vmatprep.subr.bf16.mxu0 %v6285_v29 }
  0xf3   : > { %5673 = vmatmul.mubr.msk.f32.gmra.mrb[2].mxu0 %vm306_vm0, %v7164_v35  ;;  %v7568_v35 = vpack.c.bf16 %v5028_v34, %v5027_v32  ;;  %v2742_v32 = vstv %s238_s18 }
  0xf4   : > { %5675 = vmatprep.mubr.msk.f32.mxu0 %vm306_vm0, %v7167_v36  ;;  %v4921_v36 = vld [vmem:[%s8865_s5 + $0xb0] sm:$0xff] }
  0xf5   : > { %8888 = vst [vmem:[#allocation7_spill] sm:$0xff] %v7568_v35 }
  0xf7   : > { %5676 = vmatmul.mubr.msk.f32.gmra.mrb[4].mxu0 %vm306_vm0, %v7174_v37  ;;  %v4922_v37 = vld [vmem:[%s8865_s5 + $0xb8] sm:$0xff] }
  0xf8   : > { %5678 = vmatprep.mubr.msk.f32.mxu0 %vm306_vm0, %v7177_v38  ;;  %v5029_v38 = vld [vmem:[%s8865_s5 + $0x410] sm:$0xff] }
  0xfb   : > { %5679 = vmatmul.mubr.msk.f32.gmra.mrb[6].mxu0 %vm306_vm0, %v7184_v39  ;;  %v6301_v39 = vpack.c.bf16 %v4922_v37, %v4921_v36  ;;  %v2852_v36 = vld [vmem:[%s8865_s5 + $0x50] sm:$0xff]  ;;  %v2853_v37 = vld [vmem:[%s8865_s5 + $0x58] sm:$0xff] }
  0xfc   : > { %5681 = vmatprep.mubr.msk.f32.mxu0 %vm306_vm0, %v7187_v40  ;;  %v5030_v40 = vld [vmem:[%s8865_s5 + $0x418] sm:$0xff] }
  0xff   : > { %5682 = vmatmul.mubr.msk.f32.gmra.mrb[8].mxu0 %vm306_vm0, %v7194_v41  ;;  %v7584_v41 = vpack.c.bf16 %v5030_v40, %v5029_v38 }
 0x100   : > { %5684 = vmatprep.mubr.msk.f32.mxu0 %vm306_vm0, %v7197_v42  ;;  %v4923_v42 = vld [vmem:[%s8865_s5 + $0xc0] sm:$0xff] }
 0x101   : > { %8889 = vst [vmem:[#allocation8_spill] sm:$0xff] %v7584_v41 }
 0x103   : > { %5685 = vmatmul.mubr.msk.f32.gmra.mrb[10].mxu0 %vm306_vm0, %v7204_v43  ;;  %v4924_v43 = vld [vmem:[%s8865_s5 + $0xc8] sm:$0xff] }
 0x104   : > { %5687 = vmatprep.mubr.msk.f32.mxu0 %vm306_vm0, %v7321_v2  ;;  %v6305_v45 = vpack.c.bf16 %v4924_v43, %v4923_v42  ;;  %v2842_v2 = vld [vmem:[%s8865_s5] sm:$0xff]  ;;  %v4934_v42 = vld [vmem:[%s8865_s5 + $0x118] sm:$0xff] }
 0x107   : > { %5688 = vmatmul.mubr.msk.f32.gmra.mrb[12].mxu0 %vm306_vm0, %v7328_v3  ;;  %v2843_v3 = vld [vmem:[%s8865_s5 + $0x8] sm:$0xff] }
 0x108   : > { %5690 = vmatprep.mubr.msk.f32.mxu0 %vm306_vm0, %v4810_v30  ;;  %v6321_v6 = vpack.c.bf16 %v2843_v3, %v2842_v2  ;;  %v2847_v30 = vld [vmem:[%s8865_s5 + $0x28] sm:$0xff] }
 0x10b   : > { %5691 = vmatmul.mubr.msk.f32.gmra.mrb[14].mxu0 %vm306_vm0, %v4811_v31 }
 0x10c   : > { %5697 = vmatprep.mubr.msk.f32.mxu0 %vm306_vm0, %v7067_v13  ;;  %v4844_v13 = vld [vmem:[%s7052_s27 + $0xd9] sm:$0xff] }
 0x10f   : > { %5698 = vmatmul.mubr.msk.f32.vlgmr.msra.gmra.mrb[0].mxu0 %vm306_vm0, %v7074_v14  ;;  %v4845_v14 = vld [vmem:[%s7052_s27 + $0xe1] sm:$0xff] }
 0x110   : > { %6288 = vmatpush3.bf16.msra.mxu0 %v6285_v29  ;;  %5700 = vmatprep.mubr.msk.f32.mxu0 %vm306_vm0, %v7077_v15  ;;  %v4878_v15 = vld [vmem:[%s7052_s27 + $0xda] sm:$0xff] }
 0x111   : > { %6546 = vmatprep.subr.bf16.mxu0 %v7568_v35  ;;  %v2846_v29 = vld [vmem:[%s8865_s5 + $0x20] sm:$0xff] }
 0x112   : > { %v6329_v31 = vpack.c.bf16 %v2847_v30, %v2846_v29 }
 0x113   : > { %5701 = vmatmul.mubr.msk.f32.gmra.mrb[2].mxu0 %vm306_vm0, %v7084_v16  ;;  %v4879_v16 = vld [vmem:[%s7052_s27 + $0xe2] sm:$0xff] }
 0x114   : > { %5703 = vmatprep.mubr.msk.f32.mxu0 %vm306_vm0, %v7087_v17  ;;  %v4915_v17 = vld [vmem:[%s8865_s5 + $0x80] sm:$0xff] }
 0x117   : > { %5704 = vmatmul.mubr.msk.f32.gmra.mrb[4].mxu0 %vm306_vm0, %v7094_v18  ;;  %v4916_v18 = vld [vmem:[%s8865_s5 + $0x88] sm:$0xff] }
 0x118   : > { %5706 = vmatprep.mubr.msk.f32.mxu0 %vm306_vm0, %v7097_v19  ;;  %v6289_v19 = vpack.c.bf16 %v4916_v18, %v4915_v17  ;;  %v2850_v18 = vld [vmem:[%s8865_s5 + $0x40] sm:$0xff] }
 0x11a   : > { %6290 = vmatprep.subr.bf16.mxu1 %v6289_v19 }
 0x11b   : > { %5707 = vmatmul.mubr.msk.f32.gmra.mrb[6].mxu0 %vm306_vm0, %v7104_v20  ;;  %6292 = vmatpush3.bf16.msra.mxu1 %v6289_v19  ;;  %v4917_v20 = vld [vmem:[%s8865_s5 + $0x90] sm:$0xff]  ;;  %v2851_v19 = vld [vmem:[%s8865_s5 + $0x48] sm:$0xff] }
 0x11c   : > { %5709 = vmatprep.mubr.msk.f32.mxu0 %vm306_vm0, %v7107_v21  ;;  %v4918_v21 = vld [vmem:[%s8865_s5 + $0x98] sm:$0xff] }
 0x11f   : > { %5710 = vmatmul.mubr.msk.f32.gmra.mrb[8].mxu0 %vm306_vm0, %v7114_v22  ;;  %v6293_v22 = vpack.c.bf16 %v4918_v21, %v4917_v20  ;;  %v7707_v20 = vld [vmem:[%s8864_s4] ss:$0 sm:$0xff]  ;;  %v6337_v21 = vpack.c.bf16 %v2851_v19, %v2850_v18 }
 0x120   : > { %5712 = vmatprep.mubr.msk.f32.mxu0 %vm306_vm0, %v7117_v23  ;;  %v4919_v23 = vld [vmem:[%s8865_s5 + $0xa0] sm:$0xff] }
 0x121   : > { %6294 = vmatprep.subr.bf16.mxu1 %v6293_v22 }
 0x122   : > { %6296 = vmatpush3.bf16.msra.mxu1 %v6293_v22 }
 0x123   : > { %5713 = vmatmul.mubr.msk.f32.gmra.mrb[10].mxu0 %vm306_vm0, %v7124_v24  ;;  %v4920_v24 = vld [vmem:[%s8865_s5 + $0xa8] sm:$0xff] }
 0x124   : > { %5715 = vmatprep.mubr.msk.f32.mxu0 %vm306_vm0, %v7365_v7  ;;  %v6297_v33 = vpack.c.bf16 %v4920_v24, %v4919_v23  ;;  %v5040_v7 = vld [vmem:[%s8865_s5 + $0x468] sm:$0xff]  ;;  %v7709_v24 = vstv %s237_s17 }
 0x125   : > { %v7664_v9 = vpack.c.bf16 %v5040_v7, %v5039_v4  ;;  %vm2734_vm1 = vcmp.gt.s32.totalorder %v7709_v24, 0  ;;  %vm2735_vm4 = vcmp.gt.s32.totalorder %v7709_v24, 1  ;;  %vm2736_vm7 = vcmp.gt.s32.totalorder %v7709_v24, 2 }
 0x126   : > { %6298 = vmatprep.subr.bf16.mxu1 %v6297_v33  ;;  %vm2737_vm10 = vcmp.gt.s32.totalorder %v7709_v24, 3 }
 0x127   : > { %5716 = vmatmul.mubr.msk.f32.gmra.mrb[12].mxu0 %vm306_vm0, %v7372_v8  ;;  %6300 = vmatpush3.bf16.msra.mxu1 %v6297_v33  ;;  %v2859_v8 = vld [vmem:[#allocation2 + $0x9] sm:$0xff]  ;;  %8894 = vst [vmem:[#allocation13_spill] sm:$0xff] %v7664_v9 }
 0x128   : > { %5718 = vmatprep.mubr.msk.f32.mxu0 %vm306_vm0, %v4844_v13  ;;  %6302 = vmatprep.subr.bf16.mxu1 %v6301_v39  ;;  %v2730_v13 = vlaneseq }
 0x12a   : > { %v2731_v17 = vshrl.u32 %v2730_v13, 7 }
 0x12b   : > { %5719 = vmatmul.mubr.msk.f32.gmra.mrb[14].mxu0 %vm306_vm0, %v4845_v14  ;;  %6304 = vmatpush3.bf16.msra.mxu1 %v6301_v39  ;;  %v2848_v14 = vld [vmem:[%s8865_s5 + $0x30] sm:$0xff]  ;;  %v6341_v39 = vpack.c.bf16 %v2853_v37, %v2852_v36 }
 0x12c   : > { %5725 = vmatprep.mubr.msk.f32.mxu0 %vm306_vm0, %v7227_v51  ;;  %6306 = vmatprep.subr.bf16.mxu1 %v6305_v45  ;;  %v6309_v51 = vpack.c.bf16 %v4926_v49, %v4925_v48  ;;  %v2732_v22 = vadd.s32 8, %v2731_v17  ;;  %vm7734_vm3 = vcmp.lt.s32.totalorder %v2731_v17, %v2742_v32 }
 0x12d   : > { %vm7765_vm6 = vmand %vm2734_vm1, %vm7734_vm3 }
 0x12e   : > { %vm7727_vm2 = vcmp.lt.s32.totalorder %v2732_v22, %v2742_v32  ;;  %vm7789_vm9 = vmand %vm2735_vm4, %vm7734_vm3 }
 0x12f   : > { %5726 = vmatmul.mubr.msk.f32.vlgmr.msra.gmra.mrb[0].mxu0 %vm306_vm0, %v7234_v52  ;;  %6308 = vmatpush3.bf16.msra.mxu1 %v6305_v45  ;;  %v5034_v52 = vld [vmem:[%s8865_s5 + $0x438] sm:$0xff]  ;;  %vm7753_vm5 = vmand %vm2734_vm1, %vm7727_vm2 }
 0x130   : > { %5728 = vmatprep.mubr.msk.f32.mxu0 %vm306_vm0, %v7237_v53  ;;  %6548 = vmatpush3.bf16.msra.mxu0 %v7568_v35  ;;  %v7616_v53 = vpack.c.bf16 %v5034_v52, %v5033_v50  ;;  %v2854_v50 = vld [vmem:[%s8865_s5 + $0x60] sm:$0xff]  ;;  %vm7777_vm8 = vmand %vm2735_vm4, %vm7727_vm2 }
 0x131   : > { %6550 = vmatprep.subr.bf16.mxu0 %v7584_v41  ;;  %6310 = vmatprep.subr.bf16.mxu1 %v6309_v51  ;;  %vm2750_vm11 = vmand %vm2736_vm7, %vm7727_vm2  ;;  %v7812_v29 = vsel %vm7777_vm8, 1.0, %v6969_v11 }
 0x132   : > { %8891 = vst [vmem:[#allocation10_spill] sm:$0xff] %v7616_v53  ;;  %vm7818_vm12 = vmand %vm2736_vm7, %vm7734_vm3  ;;  %v7831_v17 = vsel %vm2750_vm11, 1.0, %v6969_v11  ;;  %vm2738_vm7 = vcmp.gt.s32.totalorder %v7709_v24, 4  ;;  %vm2739_vm11 = vcmp.gt.s32.totalorder %v7709_v24, 5 }
 0x133   : > { %5729 = vmatmul.mubr.msk.f32.gmra.mrb[2].mxu0 %vm306_vm0, %v7244_v54  ;;  %6312 = vmatpush3.bf16.msra.mxu1 %v6309_v51  ;;  %v4927_v54 = vld [vmem:[%s8865_s5 + $0xe0] sm:$0xff]  ;;  %v2855_v51 = vld [vmem:[%s8865_s5 + $0x68] sm:$0xff]  ;;  %vm2752_vm13 = vmand %vm2737_vm10, %vm7727_vm2 }
 0x134   : > { %5731 = vmatprep.mubr.msk.f32.mxu0 %vm306_vm0, %v7247_v55  ;;  %6552 = vmatpush3.bf16.msra.mxu0 %v7584_v41  ;;  %v4928_v55 = vld [vmem:[%s8865_s5 + $0xe8] sm:$0xff] }
 0x135   : > { %6554 = vmatprep.subr.bf16.mxu0 %v7600_v47 }
 0x137   : > { %5732 = vmatmul.mubr.msk.f32.gmra.mrb[4].mxu0 %vm306_vm0, %v7254_v56  ;;  %v5035_v56 = vld [vmem:[%s8865_s5 + $0x440] sm:$0xff] }
 0x138   : > { %5734 = vmatprep.mubr.msk.f32.mxu0 %vm306_vm0, %v7257_v57  ;;  %6556 = vmatpush3.bf16.msra.mxu0 %v7600_v47  ;;  %v6313_v57 = vpack.c.bf16 %v4928_v55, %v4927_v54 }
 0x139   : > { %6558 = vmatprep.subr.bf16.mxu0 %v7616_v53 }
 0x13a   : > { %6314 = vmatprep.subr.bf16.mxu1 %v6313_v57 }
 0x13b   : > { %5735 = vmatmul.mubr.msk.f32.gmra.mrb[6].mxu0 %vm306_vm0, %v7264_v58  ;;  %v5036_v58 = vld [vmem:[%s8865_s5 + $0x448] sm:$0xff]  ;;  %6316 = vmatpush3.bf16.msra.mxu1 %v6313_v57 }
 0x13c   : > { %5737 = vmatprep.mubr.msk.f32.mxu0 %vm306_vm0, %v7267_v59  ;;  %6560 = vmatpush3.bf16.msra.mxu0 %v7616_v53  ;;  %v7632_v59 = vpack.c.bf16 %v5036_v58, %v5035_v56  ;;  %v6345_v56 = vpack.c.bf16 %v2855_v51, %v2854_v50 }
 0x13e   : > { %8892 = vst [vmem:[#allocation11_spill] sm:$0xff] %v7632_v59  ;;  %6562 = vmatprep.subr.bf16.mxu0 %v7632_v59 }
 0x13f   : > { %5738 = vmatmul.mubr.msk.f32.gmra.mrb[8].mxu0 %vm306_vm0, %v7274_v60  ;;  %v4929_v60 = vld [vmem:[%s8865_s5 + $0xf0] sm:$0xff] }
 0x140   : > { %5740 = vmatprep.mubr.msk.f32.mxu0 %vm306_vm0, %v7277_v61  ;;  %v4930_v61 = vld [vmem:[%s8865_s5 + $0xf8] sm:$0xff]  ;;  %6564 = vmatpush3.bf16.msra.mxu0 %v7632_v59 }
 0x141   : > { %v6317_v63 = vpack.c.bf16 %v4930_v61, %v4929_v60 }
 0x143   : > { %5741 = vmatmul.mubr.msk.f32.gmra.mrb[10].mxu0 %vm306_vm0, %v7284_v62  ;;  %v5037_v62 = vld [vmem:[%s8865_s5 + $0x450] sm:$0xff]  ;;  %6318 = vmatprep.subr.bf16.mxu1 %v6317_v63 }
 0x144   : > { %5743 = vmatprep.mubr.msk.f32.mxu0 %vm306_vm0, %v4776_v25  ;;  %v7648_v1 = vpack.c.bf16 %v5038_v0, %v5037_v62  ;;  %6320 = vmatpush3.bf16.msra.mxu1 %v6317_v63  ;;  %v5041_v25 = vld [vmem:[%s8865_s5 + $0x470] sm:$0xff] }
 0x145   : > { %6322 = vmatprep.subr.bf16.mxu1 %v6321_v6  ;;  %v7680_v28 = vpack.c.bf16 %v5042_v27, %v5041_v25  ;;  %v7807_v27 = vsel %vm7765_vm6, 1.0, %v6969_v11 }
 0x146   : > { %8893 = vst [vmem:[#allocation12_spill] sm:$0xff] %v7648_v1  ;;  %6566 = vmatprep.subr.bf16.mxu0 %v7648_v1 }
 0x147   : > { %5744 = vmatmul.mubr.msk.f32.gmra.mrb[12].mxu0 %vm306_vm0, %v4777_v26  ;;  %5782 = vmatmul.mubr.f32.vlgmr.msra.gmra.mrb[0].mxu1 %v2859_v8  ;;  %v6325_v26 = vpack.c.bf16 %v2845_v12, %v2844_v10  ;;  %8895 = vst [vmem:[#allocation14_spill] sm:$0xff] %v7680_v28  ;;  %v7802_v12 = vsel %vm7753_vm5, 1.0, %v6969_v11 }
 0x148   : > { %5746 = vmatprep.mubr.msk.f32.mxu0 %vm306_vm0, %v4878_v15  ;;  %6568 = vmatpush3.bf16.msra.mxu0 %v7648_v1  ;;  %v2849_v15 = vld [vmem:[%s8865_s5 + $0x38] sm:$0xff] }
 0x149   : > { %6324 = vmatpush3.bf16.msra.mxu1 %v6321_v6  ;;  %6570 = vmatprep.subr.bf16.mxu0 %v7664_v9 }
 0x14a   : > { %6326 = vmatprep.subr.bf16.mxu1 %v6325_v26 }
 0x14b   : > { %5747 = vmatmul.mubr.msk.f32.gmra.mrb[14].mxu0 %vm306_vm0, %v4879_v16  ;;  %v6333_v16 = vpack.c.bf16 %v2849_v15, %v2848_v14  ;;  %v7825_v15 = vsel %vm7789_vm9, 1.0, %v6969_v11  ;;  %vm8050_vm9 = vmand %vm2737_vm10, %vm7734_vm3 }
 0x14c   : > { %6572 = vmatpush3.bf16.msra.mxu0 %v7664_v9  ;;  %vm8073_vm10 = vmand %vm2738_vm7, %vm7727_vm2 }
 0x14d   : > { %6328 = vmatpush3.bf16.msra.mxu1 %v6325_v26  ;;  %6574 = vmatprep.subr.bf16.mxu0 %v7680_v28 }
 0x14e   : > { %6330 = vmatprep.subr.bf16.mxu1 %v6329_v31 }
 0x150   : > { %6576 = vmatpush3.bf16.msra.mxu0 %v7680_v28 }
 0x151   : > { %6332 = vmatpush3.bf16.msra.mxu1 %v6329_v31 }
 0x152   : > { %6334 = vmatprep.subr.bf16.mxu1 %v6333_v16 }
 0x155   : > { %6336 = vmatpush3.bf16.msra.mxu1 %v6333_v16 }
 0x156   : > { %6338 = vmatprep.subr.bf16.mxu1 %v6337_v21 }
 0x159   : > { %6340 = vmatpush3.bf16.msra.mxu1 %v6337_v21 }
 0x15a   : > { %6342 = vmatprep.subr.bf16.mxu1 %v6341_v39 }
 0x15d   : > { %6344 = vmatpush3.bf16.msra.mxu1 %v6341_v39  ;;  %v7849_v39 = vsel %vm7818_vm12, 1.0, %v6969_v11  ;;  %vm8089_vm12 = vmand %vm2738_vm7, %vm7734_vm3 }
 0x15e   : > { %6346 = vmatprep.subr.bf16.mxu1 %v6345_v56 }
 0x161   : > { %6348 = vmatpush3.bf16.msra.mxu1 %v6345_v56 }
 0x202   : > { %v5727_v23 = vpop.f32.mrb[0].mxu0 }
 0x203   : > { %v7712_v33 = vadd.f32 %v5727_v23, %v7707_v20  ;;  %v2196_v34 = vpop.f32.mrb[1].mxu0 }
 0x204   : > { %v7721_v38 = vadd.f32 %v7707_v20, %v2196_v34 }
 0x205   : > { %v7724_v40 = vmul.f32 0.70710677, %v7712_v33 }
 0x206   : > { %v7732_v43 = vmul.f32 0.70710677, %v7721_v38  ;;  %v5730_v45 = vpop.f32.mrb[2].mxu0  ;;  %v7858_v50 = vmul.f32 0.5, %v7721_v38 }
 0x207   : > { %v2347_v46 = vand.u32 2147483647, %v7724_v40  ;;  %v7740_v48 = vadd.f32 %v5730_v45, %v7707_v20  ;;  %v2206_v49 = vpop.f32.mrb[3].mxu0  ;;  %v7852_v45 = vsel %vm2752_vm13, 1.0, %v6969_v11  ;;  %vm2651_vm14 = vcmp.ge.f32.partialorder %v7724_v40, 0.0  ;;  %vm8104_vm13 = vmand %vm2739_vm11, %vm7727_vm2 }
 0x208   : > { %v2346_v54 = vand.u32 2147483647, %v7732_v43  ;;  %v7759_v55 = vadd.f32 %v7707_v20, %v2206_v49  ;;  %v7855_v49 = vmul.f32 0.5, %v7712_v33  ;;  %vm2650_vm15 = vcmp.ge.f32.partialorder %v7732_v43, 0.0 }
 0x209   : > { %v2363_v57 = vmul.f32 0.3275911, %v2347_v46  ;;  %v7770_v60 = vmul.f32 0.70710677, %v7740_v48  ;;  %v2555_v5 = vsub.f32 0.0, %v2347_v46 }
 0x20a   : > { %v2362_v61 = vmul.f32 0.3275911, %v2346_v54  ;;  %v7782_v63 = vmul.f32 0.70710677, %v7759_v55  ;;  %v5733_v4 = vpop.f32.mrb[4].mxu0  ;;  %v2554_v7 = vsub.f32 0.0, %v2346_v54 }
 0x20b   : > { %v2379_v0 = vadd.f32 1.0, %v2363_v57  ;;  %v2349_v2 = vand.u32 2147483647, %v7770_v60  ;;  %v2216_v10 = vpop.f32.mrb[5].mxu0  ;;  %v7828_v16 = vadd.f32 %v5733_v4, %v7707_v20  ;;  %v2571_v19 = vmul.f32 %v2555_v5, %v2347_v46 }
 0x20c   : > { %v2378_v6 = vadd.f32 1.0, %v2362_v61  ;;  %v2348_v8 = vand.u32 2147483647, %v7782_v63  ;;  %v2570_v21 = vmul.f32 %v2554_v7, %v2346_v54  ;;  %v7838_v23 = vadd.f32 %v7707_v20, %v2216_v10 }
 0x20d   : > { %6861 = vrcp.f32 %v2379_v0  ;;  %v2365_v25 = vmul.f32 0.3275911, %v2349_v2  ;;  %v2557_v26 = vsub.f32 0.0, %v2349_v2  ;;  %v7841_v36 = vmul.f32 0.70710677, %v7828_v16 }
 0x20e   : > { %6863 = vrcp.f32 %v2378_v6  ;;  %v2364_v30 = vmul.f32 0.3275911, %v2348_v8  ;;  %v5736_v13 = vpop.f32.mrb[6].mxu0  ;;  %v2556_v34 = vsub.f32 0.0, %v2348_v8  ;;  %v7844_v37 = vmul.f32 0.70710677, %v7838_v23 }
 0x20f   : > { %v2381_v14 = vadd.f32 1.0, %v2365_v25  ;;  %v2226_v18 = vpop.f32.mrb[7].mxu0  ;;  %v2573_v32 = vmul.f32 %v2557_v26, %v2349_v2  ;;  %v2351_v51 = vand.u32 2147483647, %v7841_v36  ;;  %v7862_v52 = vadd.f32 %v5736_v13, %v7707_v20 }
 0x210   : > { %v2380_v22 = vadd.f32 1.0, %v2364_v30  ;;  %v2588_v56 = vmul.f32 1.442695, %v2571_v19  ;;  %v2586_v57 = vmul.f32 1.442695, %v2570_v21  ;;  %v7868_v11 = vadd.f32 %v7707_v20, %v2226_v18 }
 0x211   : > { %6865 = vrcp.f32 %v2381_v14  ;;  %v2350_v58 = vand.u32 2147483647, %v7844_v37  ;;  %v2592_v61 = vmul.f32 1.442695, %v2573_v32  ;;  %v2572_v33 = vmul.f32 %v2556_v34, %v2348_v8 }
 0x212   : > { %6867 = vrcp.f32 %v2380_v22  ;;  %v5739_v46 = vpop.f32.mrb[8].mxu0  ;;  %v2367_v62 = vmul.f32 0.3275911, %v2351_v51  ;;  %v7871_v38 = vmul.f32 0.70710677, %v7862_v52  ;;  %v7874_v0 = vmul.f32 0.5, %v7740_v48 }
 0x213   : > { %v7864_v54 = vpop.f32.mrb[9].mxu0  ;;  %v2559_v2 = vsub.f32 0.0, %v2351_v51  ;;  %v2366_v3 = vmul.f32 0.3275911, %v2350_v58  ;;  %v7877_v4 = vmul.f32 0.70710677, %v7868_v11  ;;  %6869 = vpow2.f32 %v2588_v56 }
 0x214   : > { %v7882_v6 = vmul.f32 0.5, %v7759_v55  ;;  %v2383_v7 = vadd.f32 1.0, %v2367_v62  ;;  %v2558_v10 = vsub.f32 0.0, %v2350_v58  ;;  %v2353_v8 = vand.u32 2147483647, %v7871_v38 }
 0x215   : > { %v2382_v30 = vadd.f32 1.0, %v2366_v3  ;;  %v2352_v31 = vand.u32 2147483647, %v7877_v4  ;;  %v2590_v55 = vmul.f32 1.442695, %v2572_v33  ;;  %v2575_v21 = vmul.f32 %v2559_v2, %v2351_v51 }
 0x216   : > { %v7885_v25 = vpop.f32.mrb[10].mxu0  ;;  %6871 = vrcp.f32 %v2383_v7  ;;  %v2369_v18 = vmul.f32 0.3275911, %v2353_v8  ;;  %v2561_v22 = vsub.f32 0.0, %v2353_v8  ;;  %v7907_v59 = vadd.f32 %v5739_v46, %v7707_v20 }
 0x217   : > { %v7879_v5 = vpop.eup %6861  ;;  %v7891_v13 = vpop.f32.mrb[11].mxu0  ;;  %6873 = vrcp.f32 %v2382_v30  ;;  %v2368_v3 = vmul.f32 0.3275911, %v2352_v31  ;;  %vm2653_vm0 = vcmp.ge.f32.partialorder %v7770_v60, 0.0  ;;  %vm2652_vm1 = vcmp.ge.f32.partialorder %v7782_v63, 0.0 }
 0x218   : > { %v7887_v26 = vpop.eup %6863  ;;  %v2411_v48 = vmul.f32 1.0614054, %v7879_v5  ;;  %6875 = vpow2.f32 %v2586_v57  ;;  %v2385_v56 = vadd.f32 1.0, %v2369_v18  ;;  %v2577_v51 = vmul.f32 %v2561_v22, %v2353_v8  ;;  %8911 = vst [vmem:[#allocation16_spill] sm:$0xff] %v7907_v59 }
 0x219   : > { %v2410_v14 = vmul.f32 1.0614054, %v7887_v26  ;;  %v2384_v1 = vadd.f32 1.0, %v2368_v3  ;;  %v2596_v18 = vmul.f32 1.442695, %v2575_v21  ;;  %vm2655_vm4 = vcmp.ge.f32.partialorder %v7841_v36, 0.0 }
 0x21a   : > { %v2427_v19 = vadd.f32 -1.4531521, %v2411_v48  ;;  %v7894_v32 = vpop.f32.mrb[12].mxu0  ;;  %v2574_v48 = vmul.f32 %v2558_v10, %v2350_v58  ;;  %6877 = vrcp.f32 %v2385_v56  ;;  %v2600_v46 = vmul.f32 1.442695, %v2577_v51 }
 0x21b   : > { %v7896_v34 = vpop.eup %6865  ;;  %v2426_v62 = vadd.f32 -1.4531521, %v2410_v14  ;;  %v7898_v28 = vpop.f32.mrb[13].mxu0  ;;  %6879 = vrcp.f32 %v2384_v1  ;;  %vm2654_vm5 = vcmp.ge.f32.partialorder %v7844_v37, 0.0  ;;  %vm2657_vm6 = vcmp.ge.f32.partialorder %v7871_v38, 0.0 }
 0x21c   : > { %8910 = vst [vmem:[#allocation15_spill] sm:$0xff] %v7898_v28  ;;  %v7900_v9 = vpop.eup %6867  ;;  %v2443_v33 = vmul.f32 %v7879_v5, %v2427_v19  ;;  %v2413_v7 = vmul.f32 1.0614054, %v7896_v34  ;;  %v2560_v19 = vsub.f32 0.0, %v2352_v31  ;;  %6881 = vpow2.f32 %v2592_v61 }
 0x21d   : > { %v2442_v2 = vmul.f32 %v7887_v26, %v2426_v62  ;;  %v2412_v30 = vmul.f32 1.0614054, %v7900_v9  ;;  %v2594_v8 = vmul.f32 1.442695, %v2574_v48  ;;  %v6870_v3 = vpop.eup %6869  ;;  %6883 = vpow2.f32 %v2590_v55 }
 0x21e   : > { %v2459_v14 = vadd.f32 1.4214138, %v2443_v33  ;;  %v2429_v57 = vadd.f32 -1.4531521, %v2413_v7  ;;  %v7909_v41 = vpop.f32.mrb[14].mxu0  ;;  %v2576_v56 = vmul.f32 %v2560_v19, %v2352_v31  ;;  %6885 = vpow2.f32 %v2596_v18 }
 0x21f   : > { %v2458_v53 = vadd.f32 1.4214138, %v2442_v2  ;;  %v2428_v47 = vadd.f32 -1.4531521, %v2412_v30  ;;  %8912 = vst [vmem:[#allocation17_spill] sm:$0xff] %v7909_v41  ;;  %v7913_v22 = vpop.f32.mrb[15].mxu0  ;;  %6887 = vpow2.f32 %v2594_v8 }
 0x220   : > { %v2475_v58 = vmul.f32 %v7879_v5, %v2459_v14  ;;  %v2445_v10 = vmul.f32 %v7896_v34, %v2429_v57  ;;  %8913 = vst [vmem:[#allocation18_spill] sm:$0xff] %v7913_v22  ;;  %v7918_v7 = vmul.f32 0.70710677, %v7907_v59  ;;  %v7920_v2 = vpop.eup %6871  ;;  %v2598_v48 = vmul.f32 1.442695, %v2576_v56 }
 0x221   : > { %v2474_v62 = vmul.f32 %v7887_v26, %v2458_v53  ;;  %v2444_v21 = vmul.f32 %v7900_v9, %v2428_v47  ;;  %v7922_v14 = vpop.eup %6873  ;;  %v2415_v31 = vmul.f32 1.0614054, %v7920_v2  ;;  %6889 = vpow2.f32 %v2600_v46 }
 0x222   : > { %v2491_v33 = vadd.f32 -0.28449672, %v2475_v58  ;;  %v2461_v1 = vadd.f32 1.4214138, %v2445_v10  ;;  %8914 = vst [vmem:[#allocation19_spill] sm:$0xff] %v7918_v7  ;;  %v6876_v51 = vpop.eup %6875  ;;  %6891 = vpow2.f32 %v2598_v48  ;;  %vm2656_vm8 = vcmp.ge.f32.partialorder %v7877_v4, 0.0 }
 0x223   : > { %v2490_v30 = vadd.f32 -0.28449672, %v2474_v62  ;;  %v2460_v61 = vadd.f32 1.4214138, %v2444_v21  ;;  %v2414_v19 = vmul.f32 1.0614054, %v7922_v14 }
 0x224   : > { %v2507_v53 = vmul.f32 %v7879_v5, %v2491_v33  ;;  %v2477_v47 = vmul.f32 %v7896_v34, %v2461_v1  ;;  %v7931_v58 = vand.u32 2147483647, %v7918_v7  ;;  %v2431_v62 = vadd.f32 -1.4531521, %v2415_v31  ;;  %v7933_v21 = vpop.eup %6877 }
 0x225   : > { %v2506_v55 = vmul.f32 %v7887_v26, %v2490_v30  ;;  %v2476_v57 = vmul.f32 %v7900_v9, %v2460_v61  ;;  %v2430_v33 = vadd.f32 -1.4531521, %v2414_v19 }
 0x226   : > { %v2523_v18 = vadd.f32 0.2548296, %v2507_v53  ;;  %v2493_v10 = vadd.f32 -0.28449672, %v2477_v47  ;;  %v2447_v61 = vmul.f32 %v7920_v2, %v2431_v62  ;;  %v2417_v53 = vmul.f32 1.0614054, %v7933_v21  ;;  %v7941_v47 = vpop.eup %6879 }
 0x227   : > { %v2522_v56 = vadd.f32 0.2548296, %v2506_v55  ;;  %v2492_v8 = vadd.f32 -0.28449672, %v2476_v57  ;;  %v2446_v55 = vmul.f32 %v7922_v14, %v2430_v33  ;;  %v7947_v48 = vmul.f32 0.3275911, %v7931_v58 }
 0x228   : > { %v2539_v1 = vmul.f32 %v7879_v5, %v2523_v18  ;;  %v2509_v30 = vmul.f32 %v7896_v34, %v2493_v10  ;;  %v6882_v5 = vpop.eup %6881  ;;  %v2463_v18 = vadd.f32 1.4214138, %v2447_v61  ;;  %v2433_v10 = vadd.f32 -1.4531521, %v2417_v53 }
 0x229   : > { %v2538_v46 = vmul.f32 %v7887_v26, %v2522_v56  ;;  %v2508_v31 = vmul.f32 %v7900_v9, %v2492_v8  ;;  %v2462_v7 = vadd.f32 1.4214138, %v2446_v55  ;;  %v2416_v22 = vmul.f32 1.0614054, %v7941_v47  ;;  %v6884_v26 = vpop.eup %6883 }
 0x22a   : > { %v2619_v57 = vmul.f32 %v6870_v3, %v2539_v1  ;;  %v2525_v19 = vadd.f32 0.2548296, %v2509_v30  ;;  %v2479_v33 = vmul.f32 %v7920_v2, %v2463_v18  ;;  %v2449_v3 = vmul.f32 %v7933_v21, %v2433_v10  ;;  %v6886_v1 = vpop.eup %6885 }
 0x22b   : > { %v2618_v35 = vmul.f32 %v6876_v51, %v2538_v46  ;;  %v2524_v62 = vadd.f32 0.2548296, %v2508_v31  ;;  %v2478_v61 = vmul.f32 %v7922_v14, %v2462_v7  ;;  %v2432_v53 = vadd.f32 -1.4531521, %v2416_v22  ;;  %v6888_v46 = vpop.eup %6887 }
 0x22c   : > { %v2635_v56 = vsub.f32 1.0, %v2619_v57  ;;  %v2541_v8 = vmul.f32 %v7896_v34, %v2525_v19  ;;  %v2495_v59 = vadd.f32 -0.28449672, %v2479_v33  ;;  %v2465_v57 = vadd.f32 1.4214138, %v2449_v3  ;;  %v6890_v18 = vpop.eup %6889 }
 0x22d   : > { %v2634_v30 = vsub.f32 1.0, %v2618_v35  ;;  %v2540_v51 = vmul.f32 %v7900_v9, %v2524_v62  ;;  %v2494_v19 = vadd.f32 -0.28449672, %v2478_v61  ;;  %v2448_v28 = vmul.f32 %v7941_v47, %v2432_v53  ;;  %v7962_v22 = vpop.eup %6891 }
 0x22e   : > { %v2667_v31 = vsub.f32 0.0, %v2635_v56  ;;  %v2621_v55 = vmul.f32 %v6882_v5, %v2541_v8  ;;  %v2511_v9 = vmul.f32 %v7920_v2, %v2495_v59  ;;  %v2481_v7 = vmul.f32 %v7933_v21, %v2465_v57 }
 0x22f   : > { %v2666_v41 = vsub.f32 0.0, %v2634_v30  ;;  %v2620_v34 = vmul.f32 %v6884_v26, %v2540_v51  ;;  %v2510_v26 = vmul.f32 %v7922_v14, %v2494_v19  ;;  %v2464_v59 = vadd.f32 1.4214138, %v2448_v28 }
 0x230   : > { %v2683_v10 = vsel %vm2651_vm14, %v2635_v56, %v2667_v31  ;;  %v2637_v35 = vsub.f32 1.0, %v2621_v55  ;;  %v2527_v51 = vadd.f32 0.2548296, %v2511_v9  ;;  %v2497_v61 = vadd.f32 -0.28449672, %v2481_v7 }
 0x231   : > { %v2699_v62 = vadd.f32 1.0, %v2683_v10  ;;  %v2682_v5 = vsel %vm2650_vm15, %v2634_v30, %v2666_v41  ;;  %v2636_v8 = vsub.f32 1.0, %v2620_v34  ;;  %v2526_v53 = vadd.f32 0.2548296, %v2510_v26 }
 0x232   : > { %v2698_v33 = vadd.f32 1.0, %v2682_v5  ;;  %v2669_v3 = vsub.f32 0.0, %v2637_v35  ;;  %v2543_v43 = vmul.f32 %v7920_v2, %v2527_v51  ;;  %v2513_v41 = vmul.f32 %v7933_v21, %v2497_v61 }
 0x233   : > { %v2715_v40 = vmul.f32 %v2699_v62, %v7855_v49  ;;  %v2668_v56 = vsub.f32 0.0, %v2636_v8  ;;  %v2542_v49 = vmul.f32 %v7922_v14, %v2526_v53  ;;  %v2480_v2 = vmul.f32 %v7941_v47, %v2464_v59 }
 0x234   : > { %v2714_v31 = vmul.f32 %v2698_v33, %v7858_v50  ;;  %v2685_v55 = vsel %vm2653_vm0, %v2637_v35, %v2669_v3  ;;  %v2623_v10 = vmul.f32 %v6886_v1, %v2543_v43  ;;  %v2529_v50 = vadd.f32 0.2548296, %v2513_v41 }
 0x235   : > { %v2794_v30 = vmul.f32 %v7802_v12, %v2715_v40  ;;  %v2701_v57 = vadd.f32 1.0, %v2685_v55  ;;  %v2684_v34 = vsel %vm2652_vm1, %v2636_v8, %v2668_v56  ;;  %v2622_v35 = vmul.f32 %v6888_v46, %v2542_v49  ;;  %vm8249_vm1 = vmand %vm2739_vm11, %vm7734_vm3 }
 0x236   : > { %v2793_v19 = vmul.f32 %v7807_v27, %v2714_v31  ;;  %v2700_v28 = vadd.f32 1.0, %v2684_v34  ;;  %v2387_v9 = vadd.f32 1.0, %v7947_v48  ;;  %v2639_v63 = vsub.f32 1.0, %v2623_v10 }
 0x237   : > { %2811 = vst [vmem:[#allocation2 + $0x21] sm:$0xff] %v2794_v30  ;;  %v2717_v60 = vmul.f32 %v2701_v57, %v7874_v0  ;;  %v2545_v7 = vmul.f32 %v7933_v21, %v2529_v50  ;;  %v7985_v27 = vadd.f32 %v7707_v20, %v7864_v54  ;;  %v2638_v1 = vsub.f32 1.0, %v2622_v35 }
 0x238   : > { %2810 = vst [vmem:[#allocation2 + $0x19] sm:$0xff] %v2793_v19  ;;  %v2716_v12 = vmul.f32 %v2700_v28, %v7882_v6  ;;  %v2496_v62 = vadd.f32 -0.28449672, %v2480_v2  ;;  %6893 = vrcp.f32 %v2387_v9  ;;  %v2319_v46 = vmul.f32 0.5, %v7828_v16 }
 0x239   : > { %v2796_v14 = vmul.f32 %v7812_v29, %v2717_v60  ;;  %v2671_v48 = vsub.f32 0.0, %v2639_v63  ;;  %v2625_v5 = vmul.f32 %v6890_v18, %v2545_v7  ;;  %v2670_v6 = vsub.f32 0.0, %v2638_v1 }
 0x23a   : > { %v2795_v0 = vmul.f32 %v7825_v15, %v2716_v12  ;;  %v2512_v21 = vmul.f32 %v7941_v47, %v2496_v62  ;;  %v7994_v54 = vadd.f32 %v7885_v25, %v7707_v20  ;;  %v7998_v15 = vmul.f32 0.70710677, %v7985_v27 }
 0x23b   : > { %2813 = vst [vmem:[#allocation2 + $0x39] sm:$0xff] %v2796_v14  ;;  %v2687_v29 = vsel %vm2655_vm4, %v2639_v63, %v2671_v48  ;;  %v2641_v8 = vsub.f32 1.0, %v2625_v5  ;;  %v2318_v18 = vmul.f32 0.5, %v7838_v23  ;;  %v2686_v26 = vsel %vm2654_vm5, %v2638_v1, %v2670_v6  ;;  %v8919_v5 = vld [vmem:[#allocation15_spill] sm:$0xff] }
 0x23c   : > { %2812 = vst [vmem:[#allocation2 + $0x31] sm:$0xff] %v2795_v0  ;;  %v2703_v16 = vadd.f32 1.0, %v2687_v29  ;;  %v2528_v36 = vadd.f32 0.2548296, %v2512_v21  ;;  %v2702_v33 = vadd.f32 1.0, %v2686_v26  ;;  %v2563_v51 = vsub.f32 0.0, %v7931_v58 }
 0x23d   : > { %v2673_v3 = vsub.f32 0.0, %v2641_v8  ;;  %v8003_v25 = vand.u32 2147483647, %v7998_v15  ;;  %v8008_v40 = vmul.f32 0.70710677, %v7994_v54  ;;  %v2321_v23 = vmul.f32 0.5, %v7862_v52 }
 0x23e   : > { %v2719_v61 = vmul.f32 %v2703_v16, %v2319_v46  ;;  %v2544_v37 = vmul.f32 %v7941_v47, %v2528_v36  ;;  %v2718_v53 = vmul.f32 %v2702_v33, %v2318_v18  ;;  %v8012_v55 = vld [vmem:[#allocation2 + $0x21] sm:$0xff]  ;;  %v2579_v52 = vmul.f32 %v2563_v51, %v7931_v58 }
 0x23f   : > { %v2860_v56 = vld [vmem:[#allocation2 + $0x19] sm:$0xff]  ;;  %v2689_v59 = vsel %vm2657_vm6, %v2641_v8, %v2673_v3  ;;  %v2370_v31 = vmul.f32 0.3275911, %v8003_v25  ;;  %v8017_v47 = vand.u32 2147483647, %v8008_v40  ;;  %v8024_v34 = vadd.f32 %v7707_v20, %v7891_v13 }
 0x240   : > { %5784 = vmatprep.mubr.f32.mxu1 %v2860_v56  ;;  %v2798_v43 = vmul.f32 %v7831_v17, %v2719_v61  ;;  %v2705_v41 = vadd.f32 1.0, %v2689_v59  ;;  %v2624_v38 = vmul.f32 %v7962_v22, %v2544_v37  ;;  %v2797_v30 = vmul.f32 %v7849_v39, %v2718_v53 }
 0x241   : > { %5785 = vmatmul.mubr.f32.gmra.mrb[2].mxu1 %v8012_v55  ;;  %v2386_v57 = vadd.f32 1.0, %v2370_v31  ;;  %v2373_v19 = vmul.f32 0.3275911, %v8017_v47  ;;  %v8031_v28 = vadd.f32 %v7894_v32, %v7707_v20  ;;  %v2604_v9 = vmul.f32 1.442695, %v2579_v52 }
 0x242   : > { %5787 = vmatprep.mubr.f32.mxu1 %v2795_v0  ;;  %v8026_v49 = vpop.eup %6893  ;;  %2815 = vst [vmem:[#allocation2 + $0x51] sm:$0xff] %v2798_v43  ;;  %v2721_v17 = vmul.f32 %v2705_v41, %v2321_v23  ;;  %v2640_v22 = vsub.f32 1.0, %v2624_v38  ;;  %2814 = vst [vmem:[#allocation2 + $0x49] sm:$0xff] %v2797_v30  ;;  %v8038_v13 = vld [vmem:[#allocation2 + $0x39] sm:$0xff]  ;;  %v2562_v12 = vsub.f32 0.0, %v8003_v25  ;;  %v2320_v7 = vmul.f32 0.5, %v7868_v11 }
 0x243   : > { %v8033_v39 = vld [vmem:[#allocation2 + $0x32] sm:$0xff]  ;;  %v2419_v58 = vmul.f32 1.0614054, %v8026_v49  ;;  %6895 = vrcp.f32 %v2386_v57  ;;  %v8040_v10 = vld [vmem:[#allocation2 + $0x3a] sm:$0xff]  ;;  %v2389_v60 = vadd.f32 1.0, %v2373_v19  ;;  %v8083_v6 = vadd.f32 %v7707_v20, %v8919_v5 }
 0x244   : > { %6229 = vmatprep.mubr.f32.mxu0 %v8033_v39  ;;  %v2800_v50 = vmul.f32 %v7852_v45, %v2721_v17  ;;  %v2672_v32 = vsub.f32 0.0, %v2640_v22  ;;  %v8055_v45 = vmul.f32 0.70710677, %v8024_v34  ;;  %v8059_v63 = vmul.f32 0.70710677, %v8031_v28  ;;  %v8064_v0 = vld [vmem:[#allocation2] sm:$0xff] }
 0x245   : > { %5788 = vmatmul.mubr.f32.gmra.mrb[4].mxu1 %v8038_v13  ;;  %6230 = vmatmul.mubr.f32.vlgmr.msra.gmra.mrb[16].mxu0 %v8040_v10  ;;  %v2435_v2 = vadd.f32 -1.4531521, %v2419_v58  ;;  %6897 = vrcp.f32 %v2389_v60  ;;  %v4905_v46 = vsel %vm8050_vm9, 1.0, %v8064_v0  ;;  %v2578_v18 = vmul.f32 %v2562_v12, %v8003_v25  ;;  %v8925_v19 = vld [vmem:[#allocation16_spill] sm:$0xff] }
 0x246   : > { %5790 = vmatprep.mubr.f32.mxu1 %v2797_v30  ;;  %2817 = vst [vmem:[#allocation2 + $0x69] sm:$0xff] %v2800_v50  ;;  %v2688_v4 = vsel %vm2656_vm8, %v2640_v22, %v2672_v32  ;;  %v2356_v62 = vand.u32 2147483647, %v8055_v45  ;;  %v8079_v11 = vand.u32 2147483647, %v8059_v63  ;;  %6899 = vpow2.f32 %v2604_v9  ;;  %v8924_v30 = vld [vmem:[#allocation17_spill] sm:$0xff] }
 0x247   : > { %v2704_v14 = vadd.f32 1.0, %v2688_v4  ;;  %v2451_v1 = vmul.f32 %v8026_v49, %v2435_v2  ;;  %v8096_v36 = vmul.f32 0.70710677, %v8083_v6  ;;  %v2565_v51 = vsub.f32 0.0, %v8017_v47 }
 0x248   : > { %v2372_v16 = vmul.f32 0.3275911, %v2356_v62  ;;  %v2375_v26 = vmul.f32 0.3275911, %v8079_v11  ;;  %v4908_v56 = vsel %vm8073_vm10, 1.0, %v8064_v0  ;;  %v4907_v53 = vsel %vm8089_vm12, 1.0, %v8064_v0 }
 0x249   : > { %5791 = vmatmul.mubr.f32.gmra.mrb[6].mxu1 %v2798_v43  ;;  %v2720_v21 = vmul.f32 %v2704_v14, %v2320_v7  ;;  %v2467_v29 = vadd.f32 1.4214138, %v2451_v1  ;;  %v8108_v25 = vld [vmem:[#allocation2 + $0x4a] sm:$0xff]  ;;  %v8117_v59 = vand.u32 2147483647, %v8096_v36  ;;  %v8120_v31 = vld [vmem:[#allocation2 + $0x52] sm:$0xff]  ;;  %v8126_v52 = vadd.f32 %v8924_v30, %v7707_v20 }
 0x24a   : > { %v2388_v37 = vadd.f32 1.0, %v2372_v16  ;;  %v2391_v23 = vadd.f32 1.0, %v2375_v26  ;;  %6232 = vmatprep.mubr.f32.mxu0 %v8108_v25  ;;  %v2564_v38 = vsub.f32 0.0, %v2356_v62  ;;  %v8135_v58 = vmul.f32 0.5, %v8925_v19 }
 0x24b   : > { %v2799_v33 = vmul.f32 %v4905_v46, %v2720_v21  ;;  %v2483_v3 = vmul.f32 %v8026_v49, %v2467_v29  ;;  %6233 = vmatmul.mubr.f32.gmra.mrb[18].mxu0 %v8120_v31  ;;  %v2374_v22 = vmul.f32 0.3275911, %v8117_v59  ;;  %v2602_v60 = vmul.f32 1.442695, %v2578_v18  ;;  %v8926_v46 = vld [vmem:[#allocation18_spill] sm:$0xff]  ;;  %v2857_v21 = vld [vmem:[%s8865_s5 + $0x78] sm:$0xff] }
 0x24c   : > { %6901 = vrcp.f32 %v2388_v37  ;;  %v2581_v35 = vmul.f32 %v2565_v51, %v8017_v47  ;;  %v2567_v4 = vsub.f32 0.0, %v8079_v11  ;;  %v8143_v7 = vmul.f32 0.70710677, %v8126_v52  ;;  %v2856_v47 = vld [vmem:[%s8865_s5 + $0x70] sm:$0xff] }
 0x24d   : > { %v8122_v43 = vpop.eup %6895  ;;  %2816 = vst [vmem:[#allocation2 + $0x61] sm:$0xff] %v2799_v33  ;;  %v2499_v41 = vadd.f32 -0.28449672, %v2483_v3  ;;  %5793 = vmatprep.mubr.f32.mxu1 %v2799_v33  ;;  %6903 = vrcp.f32 %v2391_v23  ;;  %v2390_v12 = vadd.f32 1.0, %v2374_v22  ;;  %v2580_v1 = vmul.f32 %v2564_v38, %v2356_v62  ;;  %v8927_v29 = vld [vmem:[#allocation19_spill] sm:$0xff]  ;;  %v4931_v3 = vld [vmem:[%s8865_s5 + $0x100] sm:$0xff] }
 0x24e   : > { %v2418_v57 = vmul.f32 1.0614054, %v8122_v43  ;;  %5794 = vmatmul.mubr.f32.gmra.mrb[8].mxu1 %v2800_v50  ;;  %v8148_v5 = vadd.f32 %v7707_v20, %v8926_v46  ;;  %vm2659_vm14 = vcmp.ge.f32.partialorder %v8927_v29, 0.0  ;;  %v8158_v16 = vmul.f32 0.5, %v7985_v27  ;;  %v4932_v27 = vld [vmem:[%s8865_s5 + $0x108] sm:$0xff] }
 0x24f   : > { %v2515_v32 = vmul.f32 %v8026_v49, %v2499_v41  ;;  %v8139_v2 = vpop.eup %6897  ;;  %6905 = vrcp.f32 %v2390_v12  ;;  %v8162_v62 = vand.u32 2147483647, %v8143_v7  ;;  %v2608_v33 = vmul.f32 1.442695, %v2581_v35 }
 0x250   : > { %v2434_v9 = vadd.f32 -1.4531521, %v2418_v57  ;;  %v2421_v50 = vmul.f32 1.0614054, %v8139_v2  ;;  %6907 = vpow2.f32 %v2602_v60  ;;  %v6900_v51 = vpop.eup %6899  ;;  %v2583_v23 = vmul.f32 %v2567_v4, %v8079_v11 }
 0x251   : > { %v2531_v14 = vadd.f32 0.2548296, %v2515_v32  ;;  %v2377_v41 = vmul.f32 0.3275911, %v8162_v62  ;;  %v2606_v22 = vmul.f32 1.442695, %v2580_v1  ;;  %6909 = vpow2.f32 %v2608_v33 }
 0x252   : > { %v2450_v18 = vmul.f32 %v8122_v43, %v2434_v9  ;;  %v2437_v26 = vadd.f32 -1.4531521, %v2421_v50  ;;  %v8177_v19 = vmul.f32 0.70710677, %v8148_v5  ;;  %v8180_v32 = vld [vmem:[#allocation2 + $0x6a] sm:$0xff]  ;;  %v2566_v11 = vsub.f32 0.0, %v8117_v59 }
 0x253   : > { %v2547_v20 = vmul.f32 %v8026_v49, %v2531_v14  ;;  %v6349_v49 = vpack.c.bf16 %v2857_v21, %v2856_v47  ;;  %v2393_v35 = vadd.f32 1.0, %v2377_v41  ;;  %v8185_v9 = vpack.c.bf16 %v4932_v27, %v4931_v3 }
 0x254   : > { %v2466_v37 = vadd.f32 1.4214138, %v2450_v18  ;;  %v8173_v38 = vld [vmem:[#allocation2 + $0x62] sm:$0xff]  ;;  %v2453_v57 = vmul.f32 %v8139_v2, %v2437_v26  ;;  %v8190_v50 = vand.u32 2147483647, %v8177_v19  ;;  %vm2658_vm15 = vcmp.ge.f32.partialorder %v7998_v15, 0.0 }
 0x255   : > { %v2627_v30 = vmul.f32 %v6900_v51, %v2547_v20  ;;  %6235 = vmatprep.mubr.f32.mxu0 %v8173_v38  ;;  %6350 = vmatprep.subr.bf16.mxu1 %v6349_v49  ;;  %v2612_v21 = vmul.f32 1.442695, %v2583_v23  ;;  %6911 = vrcp.f32 %v2393_v35  ;;  %v2582_v51 = vmul.f32 %v2566_v11, %v8117_v59 }
 0x256   : > { %v2482_v60 = vmul.f32 %v8122_v43, %v2466_v37  ;;  %6236 = vmatmul.mubr.f32.gmra.mrb[20].mxu0 %v8180_v32  ;;  %v8187_v4 = vpop.eup %6901  ;;  %v2469_v14 = vadd.f32 1.4214138, %v2453_v57  ;;  %6352 = vmatpush3.bf16.msra.mxu1 %v6349_v49  ;;  %v2376_v33 = vmul.f32 0.3275911, %v8190_v50  ;;  %6913 = vpow2.f32 %v2606_v22 }
 0x257   : > { %v2643_v12 = vsub.f32 1.0, %v2627_v30  ;;  %v8192_v1 = vpop.eup %6903  ;;  %v2420_v47 = vmul.f32 1.0614054, %v8187_v4  ;;  %6354 = vmatprep.subr.bf16.mxu1 %v8185_v9  ;;  %vm2661_vm0 = vcmp.ge.f32.partialorder %v8008_v40, 0.0  ;;  %vm2740_vm4 = vcmp.gt.s32.totalorder %v7709_v24, 6 }
 0x258   : > { %v2498_v46 = vadd.f32 -0.28449672, %v2482_v60  ;;  %v2485_v20 = vmul.f32 %v8139_v2, %v2469_v14  ;;  %v2423_v26 = vmul.f32 1.0614054, %v8192_v1  ;;  %v2392_v49 = vadd.f32 1.0, %v2376_v33  ;;  %vm8275_vm7 = vmand %vm2740_vm4, %vm7727_vm2 }
 0x259   : > { %v2675_v18 = vsub.f32 0.0, %v2643_v12  ;;  %v2436_v27 = vadd.f32 -1.4531521, %v2420_v47  ;;  %v8203_v30 = vpop.eup %6905  ;;  %v2569_v14 = vsub.f32 0.0, %v8162_v62  ;;  %v2610_v47 = vmul.f32 1.442695, %v2582_v51  ;;  %vm8291_vm9 = vmand %vm2740_vm4, %vm7734_vm3 }
 0x25a   : > { %v2514_v3 = vmul.f32 %v8122_v43, %v2498_v46  ;;  %v2501_v23 = vadd.f32 -0.28449672, %v2485_v20  ;;  %v2439_v41 = vadd.f32 -1.4531521, %v2423_v26  ;;  %v6908_v17 = vpop.eup %6907  ;;  %v2422_v59 = vmul.f32 1.0614054, %v8203_v30 }
 0x25b   : > { %v2691_v37 = vsel %vm2659_vm14, %v2643_v12, %v2675_v18  ;;  %v2452_v35 = vmul.f32 %v8187_v4, %v2436_v27  ;;  %6915 = vrcp.f32 %v2392_v49  ;;  %vm2660_vm5 = vcmp.ge.f32.partialorder %v8055_v45, 0.0 }
 0x25c   : > { %v2707_v57 = vadd.f32 1.0, %v2691_v37  ;;  %v2530_v60 = vadd.f32 0.2548296, %v2514_v3  ;;  %v2517_v46 = vmul.f32 %v8139_v2, %v2501_v23  ;;  %v2455_v22 = vmul.f32 %v8192_v1, %v2439_v41 }
 0x25d   : > { %v2468_v12 = vadd.f32 1.4214138, %v2452_v35  ;;  %6917 = vpow2.f32 %v2612_v21  ;;  %v2438_v26 = vadd.f32 -1.4531521, %v2422_v59  ;;  %v2585_v37 = vmul.f32 %v2569_v14, %v8162_v62 }
 0x25e   : > { %v2723_v29 = vmul.f32 %v2707_v57, %v8135_v58  ;;  %v2546_v11 = vmul.f32 %v8122_v43, %v2530_v60  ;;  %v2533_v18 = vadd.f32 0.2548296, %v2517_v46  ;;  %v2471_v20 = vadd.f32 1.4214138, %v2455_v22  ;;  %v6910_v58 = vpop.eup %6909 }
 0x25f   : > { %v2484_v27 = vmul.f32 %v8187_v4, %v2468_v12  ;;  %v2325_v43 = vmul.f32 0.5, %v7994_v54  ;;  %v2454_v21 = vmul.f32 %v8203_v30, %v2438_v26  ;;  %v8224_v41 = vpop.eup %6911  ;;  %6919 = vpow2.f32 %v2610_v47 }
 0x260   : > { %v8216_v33 = vmul.f32 %v4908_v56, %v2723_v29  ;;  %v2626_v3 = vmul.f32 %v6908_v17, %v2546_v11  ;;  %v2549_v51 = vmul.f32 %v8139_v2, %v2533_v18  ;;  %v2487_v23 = vmul.f32 %v8192_v1, %v2471_v20  ;;  %v6914_v2 = vpop.eup %6913 }
 0x261   : > { %v2500_v56 = vadd.f32 -0.28449672, %v2484_v27  ;;  %v2568_v17 = vsub.f32 0.0, %v8190_v50  ;;  %v2470_v57 = vadd.f32 1.4214138, %v2454_v21  ;;  %vm2663_vm6 = vcmp.ge.f32.partialorder %v8059_v63, 0.0 }
 0x262   : > { %2819 = vst [vmem:[#allocation2 + $0x81] sm:$0xff] %v8216_v33  ;;  %v2642_v48 = vsub.f32 1.0, %v2626_v3  ;;  %v2629_v62 = vmul.f32 %v6910_v58, %v2549_v51  ;;  %v2503_v49 = vadd.f32 -0.28449672, %v2487_v23  ;;  %v2425_v54 = vmul.f32 1.0614054, %v8224_v41 }
 0x263   : > { %v2516_v35 = vmul.f32 %v8187_v4, %v2500_v56  ;;  %v2616_v14 = vmul.f32 1.442695, %v2585_v37  ;;  %v2486_v59 = vmul.f32 %v8203_v30, %v2470_v57  ;;  %v2584_v18 = vmul.f32 %v2568_v17, %v8190_v50 }
 0x264   : > { %v2674_v60 = vsub.f32 0.0, %v2642_v48  ;;  %v2645_v46 = vsub.f32 1.0, %v2629_v62  ;;  %v2519_v22 = vmul.f32 %v8192_v1, %v2503_v49  ;;  %v2441_v29 = vadd.f32 -1.4531521, %v2425_v54 }
 0x265   : > { %v2532_v12 = vadd.f32 0.2548296, %v2516_v35  ;;  %v8237_v20 = vpop.eup %6915  ;;  %v2502_v27 = vadd.f32 -0.28449672, %v2486_v59  ;;  %6921 = vpow2.f32 %v2616_v14  ;;  %v2614_v57 = vmul.f32 1.442695, %v2584_v18 }
 0x266   : > { %v2690_v11 = vsel %vm2658_vm15, %v2642_v48, %v2674_v60  ;;  %v2677_v3 = vsub.f32 0.0, %v2645_v46  ;;  %v2535_v47 = vadd.f32 0.2548296, %v2519_v22  ;;  %v2457_v58 = vmul.f32 %v8224_v41, %v2441_v29 }
 0x267   : > { %v2706_v26 = vadd.f32 1.0, %v2690_v11  ;;  %v2548_v37 = vmul.f32 %v8187_v4, %v2532_v12  ;;  %v2424_v51 = vmul.f32 1.0614054, %v8237_v20  ;;  %v6918_v15 = vpop.eup %6917  ;;  %v2518_v50 = vmul.f32 %v8203_v30, %v2502_v27 }
 0x268   : > { %v2693_v40 = vsel %vm2661_vm0, %v2645_v46, %v2677_v3  ;;  %v2551_v21 = vmul.f32 %v8192_v1, %v2535_v47  ;;  %v2473_v17 = vadd.f32 1.4214138, %v2457_v58  ;;  %v4909_v14 = vsel %vm8249_vm1, 1.0, %v8064_v0 }
 0x269   : > { %v2722_v23 = vmul.f32 %v2706_v26, %v8158_v16  ;;  %v2709_v48 = vadd.f32 1.0, %v2693_v40  ;;  %v2628_v56 = vmul.f32 %v6914_v2, %v2548_v37  ;;  %v2440_v62 = vadd.f32 -1.4531521, %v2424_v51 }
 0x26a   : > { %v2631_v1 = vmul.f32 %v6918_v15, %v2551_v21  ;;  %v2534_v49 = vadd.f32 0.2548296, %v2518_v50  ;;  %v2489_v60 = vmul.f32 %v8224_v41, %v2473_v17  ;;  %6923 = vpow2.f32 %v2614_v57 }
 0x26b   : > { %v2801_v16 = vmul.f32 %v4907_v53, %v2722_v23  ;;  %v2725_v54 = vmul.f32 %v2709_v48, %v2325_v43  ;;  %v2644_v2 = vsub.f32 1.0, %v2628_v56  ;;  %v2456_v35 = vmul.f32 %v8237_v20, %v2440_v62  ;;  %v6920_v53 = vpop.eup %6919 }
 0x26c   : > { %v2647_v46 = vsub.f32 1.0, %v2631_v1  ;;  %v2550_v8 = vmul.f32 %v8203_v30, %v2534_v49  ;;  %v8930_v43 = vsel %vm8104_vm13, 1.0, %v8064_v0  ;;  %v2505_v29 = vadd.f32 -0.28449672, %v2489_v60 }
 0x26d   : > { %2818 = vst [vmem:[#allocation2 + $0x79] sm:$0xff] %v2801_v16  ;;  %5796 = vmatprep.mubr.f32.mxu1 %v2801_v16  ;;  %v2804_v22 = vmul.f32 %v8930_v43, %v2725_v54  ;;  %v2676_v59 = vsub.f32 0.0, %v2644_v2  ;;  %v2472_v11 = vadd.f32 1.4214138, %v2456_v35  ;;  %v2324_v45 = vmul.f32 0.5, %v8024_v34  ;;  %v8393_v34 = vld [vmem:[#allocation2 + $0x68] sm:$0xff] }
 0x26e   : > { %5797 = vmatmul.mubr.f32.gmra.mrb[10].mxu1 %v8216_v33  ;;  %v2679_v12 = vsub.f32 0.0, %v2647_v46  ;;  %v2630_v18 = vmul.f32 %v6920_v53, %v2550_v8  ;;  %v2521_v30 = vmul.f32 %v8224_v41, %v2505_v29  ;;  %v2327_v63 = vmul.f32 0.5, %v8031_v28  ;;  %v4933_v8 = vld [vmem:[%s8865_s5 + $0x110] sm:$0xff]  ;;  %v4954_v29 = vld [vmem:[%s8865_s5 + $0x1b8] sm:$0xff] }
 0x26f   : > { %2821 = vst [vmem:[#allocation2 + $0x99] sm:$0xff] %v2804_v22  ;;  %v2692_v26 = vsel %vm2660_vm5, %v2644_v2, %v2676_v59  ;;  %v2488_v33 = vmul.f32 %v8237_v20, %v2472_v11  ;;  %v6922_v37 = vpop.eup %6921  ;;  %v4912_v40 = vsel %vm8275_vm7, 1.0, %v8064_v0  ;;  %vm2662_vm8 = vcmp.ge.f32.partialorder %v8096_v36, 0.0 }
 0x270   : > { %v2708_v3 = vadd.f32 1.0, %v2692_v26  ;;  %v2695_v47 = vsel %vm2663_vm6, %v2647_v46, %v2679_v12  ;;  %v2646_v27 = vsub.f32 1.0, %v2630_v18  ;;  %v2537_v51 = vadd.f32 0.2548296, %v2521_v30  ;;  %v4935_v12 = vld [vmem:[%s8865_s5 + $0x120] sm:$0xff]  ;;  %v4936_v18 = vld [vmem:[%s8865_s5 + $0x128] sm:$0xff] }
 0x271   : > { %v2711_v58 = vadd.f32 1.0, %v2695_v47  ;;  %v2504_v15 = vadd.f32 -0.28449672, %v2488_v33  ;;  %v2326_v4 = vmul.f32 0.5, %v8083_v6  ;;  %v4911_v49 = vsel %vm8291_vm9, 1.0, %v8064_v0 }
 0x272   : > { %v2724_v23 = vmul.f32 %v2708_v3, %v2324_v45  ;;  %v2678_v21 = vsub.f32 0.0, %v2646_v27  ;;  %v2553_v28 = vmul.f32 %v8224_v41, %v2537_v51  ;;  %vm2741_vm10 = vcmp.gt.s32.totalorder %v7709_v24, 7  ;;  %v8346_v24 = vld [vmem:[#allocation2 + $0x18] sm:$0xff]  ;;  %v8354_v45 = vld [vmem:[#allocation2 + $0x20] sm:$0xff] }
 0x273   : > { %v2727_v50 = vmul.f32 %v2711_v58, %v2327_v63  ;;  %v2520_v48 = vmul.f32 %v8237_v20, %v2504_v15  ;;  %vm2665_vm11 = vcmp.ge.f32.partialorder %v8143_v7, 0.0  ;;  %vm8310_vm12 = vmand %vm2741_vm10, %vm7727_vm2  ;;  %v2329_v7 = vmul.f32 0.5, %v8126_v52  ;;  %v4938_v3 = vld [vmem:[%s8865_s5 + $0x138] sm:$0xff]  ;;  %v4940_v63 = vld [vmem:[%s8865_s5 + $0x148] sm:$0xff] }
 0x274   : > { %v2803_v56 = vmul.f32 %v4909_v14, %v2724_v23  ;;  %v2694_v17 = vsel %vm2662_vm8, %v2646_v27, %v2678_v21  ;;  %v2633_v1 = vmul.f32 %v6922_v37, %v2553_v28  ;;  %v6924_v6 = vpop.eup %6923  ;;  %v4914_v43 = vsel %vm8310_vm12, 1.0, %v8064_v0  ;;  %vm8332_vm13 = vmand %vm2741_vm10, %vm7734_vm3  ;;  %v8369_v27 = vld [vmem:[#allocation2 + $0x38] sm:$0xff]  ;;  %v4939_v37 = vld [vmem:[%s8865_s5 + $0x140] sm:$0xff] }
 0x275   : > { %v2806_v62 = vmul.f32 %v4912_v40, %v2727_v50  ;;  %v2710_v16 = vadd.f32 1.0, %v2694_v17  ;;  %v2536_v36 = vadd.f32 0.2548296, %v2520_v48  ;;  %vm2664_vm2 = vcmp.ge.f32.partialorder %v8177_v19, 0.0  ;;  %v8378_v58 = vld [vmem:[#allocation2 + $0x48] sm:$0xff]  ;;  %v8381_v15 = vld [vmem:[#allocation2 + $0x50] sm:$0xff] }
 0x276   : > { %2820 = vst [vmem:[#allocation2 + $0x91] sm:$0xff] %v2803_v56  ;;  %5799 = vmatprep.mubr.f32.mxu1 %v2803_v56  ;;  %v2649_v54 = vsub.f32 1.0, %v2633_v1  ;;  %v6357_v52 = vpack.c.bf16 %v4934_v42, %v4933_v8  ;;  %v2328_v44 = vmul.f32 0.5, %v8148_v5  ;;  %v4913_v61 = vsel %vm8332_vm13, 1.0, %v8064_v0  ;;  %v4937_v5 = vld [vmem:[%s8865_s5 + $0x130] sm:$0xff]  ;;  %v4942_v40 = vld [vmem:[%s8865_s5 + $0x158] sm:$0xff] }
 0x277   : > { %2823 = vst [vmem:[#allocation2 + $0xb1] sm:$0xff] %v2806_v62  ;;  %v2726_v57 = vmul.f32 %v2710_v16, %v2326_v4  ;;  %v2552_v41 = vmul.f32 %v8237_v20, %v2536_v36  ;;  %5800 = vmatmul.mubr.f32.gmra.mrb[12].mxu1 %v2804_v22  ;;  %v6361_v33 = vpack.c.bf16 %v4936_v18, %v4935_v12  ;;  %v4941_v23 = vld [vmem:[%s8865_s5 + $0x150] sm:$0xff]  ;;  %v8390_v21 = vld [vmem:[#allocation2 + $0x60] sm:$0xff]  ;;  %v4944_v48 = vld [vmem:[%s8865_s5 + $0x168] sm:$0xff] }
 0x278   : > { %v2681_v60 = vsub.f32 0.0, %v2649_v54  ;;  %v6365_v47 = vpack.c.bf16 %v4938_v3, %v4937_v5  ;;  %v6369_v51 = vpack.c.bf16 %v4940_v63, %v4939_v37  ;;  %v6373_v50 = vpack.c.bf16 %v4942_v40, %v4941_v23  ;;  %v4943_v28 = vld [vmem:[%s8865_s5 + $0x160] sm:$0xff]  ;;  %v8402_v56 = vld [vmem:[#allocation2 + $0x78] sm:$0xff]  ;;  %v4949_v14 = vld [vmem:[%s8865_s5 + $0x190] sm:$0xff] }
 0x279   : > { %v8303_v2 = vmul.f32 %v4911_v49, %v2726_v57  ;;  %v2632_v35 = vmul.f32 %v6924_v6, %v2552_v41  ;;  %v6377_v4 = vpack.c.bf16 %v4944_v48, %v4943_v28  ;;  %v8405_v17 = vld [vmem:[#allocation2 + $0x80] sm:$0xff]  ;;  %v4946_v16 = vld [vmem:[%s8865_s5 + $0x178] sm:$0xff]  ;;  %v4956_v12 = vld [vmem:[%s8865_s5 + $0x1c8] sm:$0xff] }
 0x27a   : > { %v2697_v46 = vsel %vm2665_vm11, %v2649_v54, %v2681_v60  ;;  %v4947_v57 = vld [vmem:[%s8865_s5 + $0x180] sm:$0xff]  ;;  %v4948_v54 = vld [vmem:[%s8865_s5 + $0x188] sm:$0xff]  ;;  %v4962_v5 = vld [vmem:[%s8865_s5 + $0x1f8] sm:$0xff] }
 0x27b   : > { %2822 = vst [vmem:[#allocation2 + $0xa9] sm:$0xff] %v8303_v2  ;;  %v2648_v20 = vsub.f32 1.0, %v2632_v35  ;;  %5802 = vmatprep.mubr.f32.mxu1 %v8303_v2  ;;  %v2713_v53 = vadd.f32 1.0, %v2697_v46  ;;  %v3181_v6 = vld [vmem:[#allocation2 + $0x2] sm:$0xff]  ;;  %v6385_v60 = vpack.c.bf16 %v4948_v54, %v4947_v57  ;;  %v4950_v46 = vld [vmem:[%s8865_s5 + $0x198] sm:$0xff]  ;;  %v4965_v28 = vld [vmem:[%s8865_s5 + $0x210] sm:$0xff] }
 0x27c   : > { %5803 = vmatmul.mubr.f32.gmra.mrb[14].mxu1 %v2806_v62  ;;  %v4945_v62 = vld [vmem:[%s8865_s5 + $0x170] sm:$0xff]  ;;  %v6389_v8 = vpack.c.bf16 %v4950_v46, %v4949_v14  ;;  %v4951_v42 = vld [vmem:[%s8865_s5 + $0x1a0] sm:$0xff]  ;;  %v4966_v48 = vld [vmem:[%s8865_s5 + $0x218] sm:$0xff] }
 0x27d   : > { %v2680_v22 = vsub.f32 0.0, %v2648_v20  ;;  %5837 = vmatprep.mubr.f32.mxu1 %v8064_v0  ;;  %v2729_v59 = vmul.f32 %v2713_v53, %v2329_v7  ;;  %v8414_v1 = vld [vmem:[#allocation2 + $0x90] sm:$0xff]  ;;  %v6381_v36 = vpack.c.bf16 %v4946_v16, %v4945_v62  ;;  %v8417_v49 = vld [vmem:[#allocation2 + $0x98] sm:$0xff]  ;;  %v4952_v7 = vld [vmem:[%s8865_s5 + $0x1a8] sm:$0xff] }
 0x27e   : > { %v8444_v53 = vld [vmem:[#allocation2 + $0x1a] sm:$0xff]  ;;  %v8492_v3 = vld [vmem:[#allocation2 + $0x92] sm:$0xff]  ;;  %v4968_v16 = vld [vmem:[%s8865_s5 + $0x228] sm:$0xff] }
 0x27f   : > { %v2696_v11 = vsel %vm2664_vm2, %v2648_v20, %v2680_v22  ;;  %v8342_v26 = vmul.f32 %v4914_v43, %v2729_v59  ;;  %v3182_v20 = vld [vmem:[#allocation2 + $0xa] sm:$0xff]  ;;  %v6393_v43 = vpack.c.bf16 %v4952_v7, %v4951_v42  ;;  %v8447_v22 = vld [vmem:[#allocation2 + $0x22] sm:$0xff]  ;;  %v8495_v37 = vld [vmem:[#allocation2 + $0x9a] sm:$0xff] }
 0x280   : > { %v2712_v19 = vadd.f32 1.0, %v2696_v11  ;;  %5838 = vmatmul.mubr.f32.vlgmr.msra.gmra.mrb[0].mxu1 %v8064_v0  ;;  %v4953_v59 = vld [vmem:[%s8865_s5 + $0x1b0] sm:$0xff]  ;;  %v4955_v11 = vld [vmem:[%s8865_s5 + $0x1c0] sm:$0xff]  ;;  %v4970_v57 = vld [vmem:[%s8865_s5 + $0x238] sm:$0xff] }
 0x281   : > { %6356 = vmatpush3.bf16.msra.mxu1 %v8185_v9  ;;  %5840 = vmatprep.mubr.f32.mxu1 %v8346_v24  ;;  %2825 = vst [vmem:[#allocation2 + $0xc9] sm:$0xff] %v8342_v26  ;;  %v8365_v9 = vld [vmem:[#allocation2 + $0x30] sm:$0xff]  ;;  %v6401_v18 = vpack.c.bf16 %v4956_v12, %v4955_v11  ;;  %v4963_v63 = vld [vmem:[%s8865_s5 + $0x200] sm:$0xff]  ;;  %v4974_v46 = vld [vmem:[%s8865_s5 + $0x258] sm:$0xff] }
 0x282   : > { %v2728_v30 = vmul.f32 %v2712_v19, %v2328_v44  ;;  %6358 = vmatprep.subr.bf16.mxu1 %v6357_v52  ;;  %v8426_v41 = vld [vmem:[#allocation2 + $0xa8] sm:$0xff]  ;;  %v8429_v35 = vld [vmem:[#allocation2 + $0xb0] sm:$0xff]  ;;  %v4958_v44 = vld [vmem:[%s8865_s5 + $0x1d8] sm:$0xff] }
 0x283   : > { %v4960_v19 = vld [vmem:[%s8865_s5 + $0x1e8] sm:$0xff]  ;;  %v4967_v62 = vld [vmem:[%s8865_s5 + $0x220] sm:$0xff]  ;;  %v4973_v14 = vld [vmem:[%s8865_s5 + $0x250] sm:$0xff] }
 0x284   : > { %v8362_v0 = vmul.f32 %v4913_v61, %v2728_v30  ;;  %5841 = vmatmul.mubr.f32.gmra.mrb[2].mxu1 %v8354_v45  ;;  %v8480_v61 = vld [vmem:[#allocation2 + $0x7a] sm:$0xff]  ;;  %v8483_v30 = vld [vmem:[#allocation2 + $0x82] sm:$0xff]  ;;  %v8504_v23 = vld [vmem:[#allocation2 + $0xaa] sm:$0xff] }
 0x285   : > { %6360 = vmatpush3.bf16.msra.mxu1 %v6357_v52  ;;  %5843 = vmatprep.mubr.f32.mxu1 %v8365_v9  ;;  %v6397_v52 = vpack.c.bf16 %v4954_v29, %v4953_v59  ;;  %v4971_v54 = vld [vmem:[%s8865_s5 + $0x240] sm:$0xff]  ;;  %v4976_v42 = vld [vmem:[%s8865_s5 + $0x268] sm:$0xff]  ;;  %v4978_v59 = vld [vmem:[%s8865_s5 + $0x278] sm:$0xff] }
 0x286   : > { %2824 = vst [vmem:[#allocation2 + $0xc1] sm:$0xff] %v8362_v0  ;;  %6362 = vmatprep.subr.bf16.mxu1 %v6361_v33  ;;  %v4980_v11 = vld [vmem:[%s8865_s5 + $0x288] sm:$0xff] }
 0x288   : > { %5844 = vmatmul.mubr.f32.gmra.mrb[4].mxu1 %v8369_v27 }
 0x289   : > { %6364 = vmatpush3.bf16.msra.mxu1 %v6361_v33  ;;  %5846 = vmatprep.mubr.f32.mxu1 %v8378_v58  ;;  %v4961_v33 = vld [vmem:[%s8865_s5 + $0x1f0] sm:$0xff] }
 0x28a   : > { %6366 = vmatprep.subr.bf16.mxu1 %v6365_v47 }
 0x28c   : > { %5847 = vmatmul.mubr.f32.gmra.mrb[6].mxu1 %v8381_v15 }
 0x28d   : > { %6368 = vmatpush3.bf16.msra.mxu1 %v6365_v47  ;;  %5849 = vmatprep.mubr.f32.mxu1 %v8390_v21  ;;  %v6413_v47 = vpack.c.bf16 %v4962_v5, %v4961_v33  ;;  %v8572_v12 = vld [vmem:[#allocation2 + $0xc0] sm:$0xff]  ;;  %v4984_v33 = vld [vmem:[%s8865_s5 + $0x2a8] sm:$0xff]  ;;  %v8591_v5 = vld [vmem:[#allocation2 + $0x31] sm:$0xff] }
 0x28e   : > { %6370 = vmatprep.subr.bf16.mxu1 %v6369_v51 }
 0x290   : > { %5850 = vmatmul.mubr.f32.gmra.mrb[8].mxu1 %v8393_v34 }
 0x291   : > { %6372 = vmatpush3.bf16.msra.mxu1 %v6369_v51  ;;  %5852 = vmatprep.mubr.f32.mxu1 %v8402_v56  ;;  %v4964_v51 = vld [vmem:[%s8865_s5 + $0x208] sm:$0xff] }
 0x292   : > { %6374 = vmatprep.subr.bf16.mxu1 %v6373_v50  ;;  %v6417_v40 = vpack.c.bf16 %v4964_v51, %v4963_v63  ;;  %v4985_v63 = vld [vmem:[%s8865_s5 + $0x2b0] sm:$0xff]  ;;  %v4986_v51 = vld [vmem:[%s8865_s5 + $0x2b8] sm:$0xff] }
 0x294   : > { %5853 = vmatmul.mubr.f32.gmra.mrb[10].mxu1 %v8405_v17 }
 0x295   : > { %6376 = vmatpush3.bf16.msra.mxu1 %v6373_v50  ;;  %5855 = vmatprep.mubr.f32.mxu1 %v8414_v1  ;;  %v8507_v50 = vld [vmem:[#allocation2 + $0xb2] sm:$0xff] }
 0x296   : > { %6378 = vmatprep.subr.bf16.mxu1 %v6377_v4 }
 0x298   : > { %5856 = vmatmul.mubr.f32.gmra.mrb[12].mxu1 %v8417_v49 }
 0x299   : > { %6380 = vmatpush3.bf16.msra.mxu1 %v6377_v4  ;;  %5858 = vmatprep.mubr.f32.mxu1 %v8426_v41  ;;  %v6421_v4 = vpack.c.bf16 %v4966_v48, %v4965_v28  ;;  %v8604_v28 = vld [vmem:[#allocation2 + $0x51] sm:$0xff]  ;;  %v4987_v48 = vld [vmem:[%s8865_s5 + $0x2c0] sm:$0xff] }
 0x29a   : > { %6382 = vmatprep.subr.bf16.mxu1 %v6381_v36 }
 0x29c   : > { %5859 = vmatmul.mubr.f32.gmra.mrb[14].mxu1 %v8429_v35 }
 0x29d   : > { %6384 = vmatpush3.bf16.msra.mxu1 %v6381_v36  ;;  %5893 = vmatprep.mubr.f32.mxu1 %v3181_v6  ;;  %v6425_v36 = vpack.c.bf16 %v4968_v16, %v4967_v62  ;;  %v4972_v6 = vld [vmem:[%s8865_s5 + $0x248] sm:$0xff] }
 0x29e   : > { %6386 = vmatprep.subr.bf16.mxu1 %v6385_v60  ;;  %v8616_v16 = vld [vmem:[#allocation2 + $0x69] sm:$0xff] }
 0x2a0   : > { %5894 = vmatmul.mubr.f32.vlgmr.msra.gmra.mrb[0].mxu1 %v3182_v20  ;;  %v6437_v20 = vpack.c.bf16 %v4974_v46, %v4973_v14  ;;  %v8637_v14 = vld [vmem:[#allocation2 + $0x91] sm:$0xff] }
 0x2a1   : > { %6388 = vmatpush3.bf16.msra.mxu1 %v6385_v60  ;;  %5896 = vmatprep.mubr.f32.mxu1 %v8444_v53  ;;  %v6433_v60 = vpack.c.bf16 %v4972_v6, %v4971_v54  ;;  %v8628_v54 = vld [vmem:[#allocation2 + $0x81] sm:$0xff] }
 0x2a2   : > { %6390 = vmatprep.subr.bf16.mxu1 %v6389_v8  ;;  %v4991_v6 = vld [vmem:[%s8865_s5 + $0x2e0] sm:$0xff] }
 0x2a4   : > { %5897 = vmatmul.mubr.f32.gmra.mrb[2].mxu1 %v8447_v22 }
 0x2a5   : > { %6392 = vmatpush3.bf16.msra.mxu1 %v6389_v8  ;;  %5899 = vmatprep.mubr.f32.mxu1 %v8033_v39  ;;  %v4957_v39 = vld [vmem:[%s8865_s5 + $0x1d0] sm:$0xff]  ;;  %v4975_v8 = vld [vmem:[%s8865_s5 + $0x260] sm:$0xff] }
 0x2a6   : > { %6394 = vmatprep.subr.bf16.mxu1 %v6393_v43  ;;  %v6441_v7 = vpack.c.bf16 %v4976_v42, %v4975_v8  ;;  %v4993_v8 = vld [vmem:[%s8865_s5 + $0x2f0] sm:$0xff]  ;;  %v4994_v42 = vld [vmem:[%s8865_s5 + $0x2f8] sm:$0xff] }
 0x2a8   : > { %5900 = vmatmul.mubr.f32.gmra.mrb[4].mxu1 %v8040_v10  ;;  %v6405_v10 = vpack.c.bf16 %v4958_v44, %v4957_v39  ;;  %v8575_v39 = vld [vmem:[#allocation2 + $0xc8] sm:$0xff]  ;;  %v4981_v44 = vld [vmem:[%s8865_s5 + $0x290] sm:$0xff] }
 0x2a9   : > { %6396 = vmatpush3.bf16.msra.mxu1 %v6393_v43  ;;  %5902 = vmatprep.mubr.f32.mxu1 %v8108_v25  ;;  %v4959_v25 = vld [vmem:[%s8865_s5 + $0x1e0] sm:$0xff]  ;;  %v4977_v43 = vld [vmem:[%s8865_s5 + $0x270] sm:$0xff] }
 0x2aa   : > { %6398 = vmatprep.subr.bf16.mxu1 %v6397_v52  ;;  %v6445_v29 = vpack.c.bf16 %v4978_v59, %v4977_v43  ;;  %v8650_v43 = vld [vmem:[#allocation2 + $0xb1] sm:$0xff]  ;;  %v4995_v59 = vld [vmem:[%s8865_s5 + $0x300] sm:$0xff] }
 0x2ac   : > { %5903 = vmatmul.mubr.f32.gmra.mrb[6].mxu1 %v8120_v31  ;;  %v6409_v31 = vpack.c.bf16 %v4960_v19, %v4959_v25  ;;  %v6926_v25 = vld [vmem:[#allocation2 + $0x19] sm:$0xff] }
 0x2ad   : > { %6400 = vmatpush3.bf16.msra.mxu1 %v6397_v52  ;;  %5905 = vmatprep.mubr.f32.mxu1 %v8173_v38  ;;  %v4979_v52 = vld [vmem:[%s8865_s5 + $0x280] sm:$0xff] }
 0x2ae   : > { %6402 = vmatprep.subr.bf16.mxu1 %v6401_v18 }
 0x2b0   : > { %5906 = vmatmul.mubr.f32.gmra.mrb[8].mxu1 %v8180_v32 }
 0x2b1   : > { %6404 = vmatpush3.bf16.msra.mxu1 %v6401_v18  ;;  %5908 = vmatprep.mubr.f32.mxu1 %v8480_v61  ;;  %v6449_v18 = vpack.c.bf16 %v4980_v11, %v4979_v52  ;;  %v4998_v11 = vld [vmem:[%s8865_s5 + $0x318] sm:$0xff] }
 0x2b2   : > { %6406 = vmatprep.subr.bf16.mxu1 %v6405_v10 }
 0x2b4   : > { %5909 = vmatmul.mubr.f32.gmra.mrb[10].mxu1 %v8483_v30 }
 0x2b5   : > { %6408 = vmatpush3.bf16.msra.mxu1 %v6405_v10  ;;  %5911 = vmatprep.mubr.f32.mxu1 %v8492_v3  ;;  %v4982_v10 = vld [vmem:[%s8865_s5 + $0x298] sm:$0xff] }
 0x2b6   : > { %6410 = vmatprep.subr.bf16.mxu1 %v6409_v31  ;;  %v6453_v19 = vpack.c.bf16 %v4982_v10, %v4981_v44  ;;  %v5000_v44 = vld [vmem:[%s8865_s5 + $0x328] sm:$0xff]  ;;  %v6927_v10 = vld [vmem:[#allocation2 + $0x32] sm:$0xff] }
 0x2b8   : > { %5912 = vmatmul.mubr.f32.gmra.mrb[12].mxu1 %v8495_v37 }
 0x2b9   : > { %6412 = vmatpush3.bf16.msra.mxu1 %v6409_v31  ;;  %5914 = vmatprep.mubr.f32.mxu1 %v8504_v23  ;;  %v4983_v31 = vld [vmem:[%s8865_s5 + $0x2a0] sm:$0xff] }
 0x2ba   : > { %6414 = vmatprep.subr.bf16.mxu1 %v6413_v47 }
 0x2bc   : > { %5915 = vmatmul.mubr.f32.gmra.mrb[14].mxu1 %v8507_v50 }
 0x2bd   : > { %6416 = vmatpush3.bf16.msra.mxu1 %v6413_v47  ;;  %5949 = vmatprep.mubr.f32.mxu1 %v8346_v24  ;;  %v4969_v24 = vld [vmem:[%s8865_s5 + $0x230] sm:$0xff]  ;;  %v6457_v47 = vpack.c.bf16 %v4984_v33, %v4983_v31  ;;  %v5003_v33 = vld [vmem:[%s8865_s5 + $0x340] sm:$0xff] }
 0x2be   : > { %6418 = vmatprep.subr.bf16.mxu1 %v6417_v40  ;;  %v6929_v31 = vld [vmem:[#allocation2 + $0x4a] sm:$0xff] }
 0x2c0   : > { %5950 = vmatmul.mubr.f32.vlgmr.msra.gmra.mrb[0].mxu1 %v8354_v45  ;;  %v6429_v45 = vpack.c.bf16 %v4970_v57, %v4969_v24  ;;  %v4990_v24 = vld [vmem:[%s8865_s5 + $0x2d8] sm:$0xff] }
 0x2c1   : > { %6420 = vmatpush3.bf16.msra.mxu1 %v6417_v40  ;;  %5952 = vmatprep.mubr.f32.mxu1 %v8365_v9  ;;  %v8601_v40 = vld [vmem:[#allocation2 + $0x49] sm:$0xff]  ;;  %v8625_v57 = vld [vmem:[#allocation2 + $0x79] sm:$0xff] }
 0x2c2   : > { %6422 = vmatprep.subr.bf16.mxu1 %v6421_v4 }
 0x2c4   : > { %5953 = vmatmul.mubr.f32.gmra.mrb[2].mxu1 %v8369_v27 }
 0x2c5   : > { %6424 = vmatpush3.bf16.msra.mxu1 %v6421_v4  ;;  %5955 = vmatprep.mubr.f32.mxu1 %v8378_v58  ;;  %v4988_v4 = vld [vmem:[%s8865_s5 + $0x2c8] sm:$0xff] }
 0x2c6   : > { %6426 = vmatprep.subr.bf16.mxu1 %v6425_v36  ;;  %v6465_v62 = vpack.c.bf16 %v4988_v4, %v4987_v48  ;;  %v5006_v48 = vld [vmem:[%s8865_s5 + $0x358] sm:$0xff] }
 0x2c8   : > { %5956 = vmatmul.mubr.f32.gmra.mrb[4].mxu1 %v8381_v15 }
 0x2c9   : > { %6428 = vmatpush3.bf16.msra.mxu1 %v6425_v36  ;;  %5958 = vmatprep.mubr.f32.mxu1 %v8390_v21  ;;  %v4989_v36 = vld [vmem:[%s8865_s5 + $0x2d0] sm:$0xff] }
 0x2ca   : > { %6430 = vmatprep.subr.bf16.mxu1 %v6429_v45 }
 0x2cc   : > { %5959 = vmatmul.mubr.f32.gmra.mrb[6].mxu1 %v8393_v34 }
 0x2cd   : > { %6432 = vmatpush3.bf16.msra.mxu1 %v6429_v45  ;;  %5961 = vmatprep.mubr.f32.mxu1 %v8402_v56  ;;  %v6469_v45 = vpack.c.bf16 %v4990_v24, %v4989_v36  ;;  %v5009_v36 = vld [vmem:[%s8865_s5 + $0x370] sm:$0xff]  ;;  %v5010_v24 = vld [vmem:[%s8865_s5 + $0x378] sm:$0xff] }
 0x2ce   : > { %6434 = vmatprep.subr.bf16.mxu1 %v6433_v60 }
 0x2d0   : > { %5962 = vmatmul.mubr.f32.gmra.mrb[8].mxu1 %v8405_v17 }
 0x2d1   : > { %6436 = vmatpush3.bf16.msra.mxu1 %v6433_v60  ;;  %5964 = vmatprep.mubr.f32.mxu1 %v8414_v1  ;;  %v4992_v60 = vld [vmem:[%s8865_s5 + $0x2e8] sm:$0xff] }
 0x2d2   : > { %6438 = vmatprep.subr.bf16.mxu1 %v6437_v20  ;;  %v6473_v46 = vpack.c.bf16 %v4992_v60, %v4991_v6  ;;  %v5011_v60 = vld [vmem:[%s8865_s5 + $0x380] sm:$0xff] }
 0x2d4   : > { %5965 = vmatmul.mubr.f32.gmra.mrb[10].mxu1 %v8417_v49 }
 0x2d5   : > { %6440 = vmatpush3.bf16.msra.mxu1 %v6437_v20  ;;  %5967 = vmatprep.mubr.f32.mxu1 %v8426_v41  ;;  %v8640_v20 = vld [vmem:[#allocation2 + $0x99] sm:$0xff] }
 0x2d6   : > { %6442 = vmatprep.subr.bf16.mxu1 %v6441_v7 }
 0x2d8   : > { %5968 = vmatmul.mubr.f32.gmra.mrb[12].mxu1 %v8429_v35 }
 0x2d9   : > { %6444 = vmatpush3.bf16.msra.mxu1 %v6441_v7  ;;  %5970 = vmatprep.mubr.f32.mxu1 %v8572_v12  ;;  %v6477_v7 = vpack.c.bf16 %v4994_v42, %v4993_v8  ;;  %v8723_v42 = vld [vmem:[#allocation2 + $0xc2] sm:$0xff] }
 0x2da   : > { %6446 = vmatprep.subr.bf16.mxu1 %v6445_v29 }
 0x2dc   : > { %5971 = vmatmul.mubr.f32.gmra.mrb[14].mxu1 %v8575_v39 }
 0x2dd   : > { %6448 = vmatpush3.bf16.msra.mxu1 %v6445_v29  ;;  %6005 = vmatprep.mubr.f32.mxu1 %v6926_v25  ;;  %v4996_v29 = vld [vmem:[%s8865_s5 + $0x308] sm:$0xff]  ;;  %v5002_v25 = vld [vmem:[%s8865_s5 + $0x338] sm:$0xff] }
 0x2de   : > { %6450 = vmatprep.subr.bf16.mxu1 %v6449_v18  ;;  %v6481_v52 = vpack.c.bf16 %v4996_v29, %v4995_v59  ;;  %v8726_v59 = vld [vmem:[#allocation2 + $0xca] sm:$0xff] }
 0x2df   : > { %v5013_v29 = vld [vmem:[%s8865_s5 + $0x390] sm:$0xff] }
 0x2e0   : > { %6006 = vmatmul.mubr.f32.vlgmr.msra.gmra.mrb[0].mxu1 %v8012_v55  ;;  %v6461_v55 = vpack.c.bf16 %v4986_v51, %v4985_v63  ;;  %v6930_v63 = vld [vmem:[#allocation2 + $0x52] sm:$0xff] }
 0x2e1   : > { %6452 = vmatpush3.bf16.msra.mxu1 %v6449_v18  ;;  %6008 = vmatprep.mubr.f32.mxu1 %v8591_v5 }
 0x2e2   : > { %6454 = vmatprep.subr.bf16.mxu1 %v6453_v19 }
 0x2e4   : > { %6009 = vmatmul.mubr.f32.gmra.mrb[2].mxu1 %v8038_v13  ;;  %v8613_v13 = vld [vmem:[#allocation2 + $0x61] sm:$0xff] }
 0x2e5   : > { %6456 = vmatpush3.bf16.msra.mxu1 %v6453_v19  ;;  %6011 = vmatprep.mubr.f32.mxu1 %v8601_v40  ;;  %v6928_v19 = vld [vmem:[#allocation2 + $0x3a] sm:$0xff] }
 0x2e6   : > { %6458 = vmatprep.subr.bf16.mxu1 %v6457_v47 }
 0x2e8   : > { %6012 = vmatmul.mubr.f32.gmra.mrb[4].mxu1 %v8604_v28 }
 0x2e9   : > { %6460 = vmatpush3.bf16.msra.mxu1 %v6457_v47  ;;  %6014 = vmatprep.mubr.f32.mxu1 %v8613_v13  ;;  %v5004_v47 = vld [vmem:[%s8865_s5 + $0x348] sm:$0xff] }
 0x2ea   : > { %6462 = vmatprep.subr.bf16.mxu1 %v6461_v55  ;;  %v6497_v51 = vpack.c.bf16 %v5004_v47, %v5003_v33  ;;  %v5026_v33 = vld [vmem:[%s8865_s5 + $0x3f8] sm:$0xff]  ;;  %v8939_v47 = vld [vmem:[#allocation7_spill] sm:$0xff] }
 0x2ec   : > { %6015 = vmatmul.mubr.f32.gmra.mrb[6].mxu1 %v8616_v16 }
 0x2ed   : > { %6464 = vmatpush3.bf16.msra.mxu1 %v6461_v55  ;;  %6017 = vmatprep.mubr.f32.mxu1 %v8625_v57  ;;  %v5005_v55 = vld [vmem:[%s8865_s5 + $0x350] sm:$0xff] }
 0x2ee   : > { %6466 = vmatprep.subr.bf16.mxu1 %v6465_v62  ;;  %v6501_v4 = vpack.c.bf16 %v5006_v48, %v5005_v55 }
 0x2f0   : > { %6018 = vmatmul.mubr.f32.gmra.mrb[8].mxu1 %v8628_v54 }
 0x2f1   : > { %6468 = vmatpush3.bf16.msra.mxu1 %v6465_v62  ;;  %6020 = vmatprep.mubr.f32.mxu1 %v8637_v14  ;;  %v5008_v62 = vld [vmem:[%s8865_s5 + $0x368] sm:$0xff] }
 0x2f2   : > { %6470 = vmatprep.subr.bf16.mxu1 %v6469_v45 }
 0x2f4   : > { %6021 = vmatmul.mubr.f32.gmra.mrb[10].mxu1 %v8640_v20 }
 0x2f5   : > { %6472 = vmatpush3.bf16.msra.mxu1 %v6469_v45  ;;  %6023 = vmatprep.mubr.f32.mxu1 %v8303_v2  ;;  %v4997_v2 = vld [vmem:[%s8865_s5 + $0x310] sm:$0xff]  ;;  %v6509_v45 = vpack.c.bf16 %v5010_v24, %v5009_v36 }
 0x2f6   : > { %6474 = vmatprep.subr.bf16.mxu1 %v6473_v46  ;;  %v6485_v18 = vpack.c.bf16 %v4998_v11, %v4997_v2  ;;  %v5015_v11 = vld [vmem:[%s8865_s5 + $0x3a0] sm:$0xff] }
 0x2f8   : > { %6024 = vmatmul.mubr.f32.gmra.mrb[12].mxu1 %v8650_v43 }
 0x2f9   : > { %6476 = vmatpush3.bf16.msra.mxu1 %v6473_v46  ;;  %6026 = vmatprep.mubr.f32.mxu1 %v8362_v0  ;;  %v4999_v0 = vld [vmem:[%s8865_s5 + $0x320] sm:$0xff]  ;;  %v5012_v46 = vld [vmem:[%s8865_s5 + $0x388] sm:$0xff] }
 0x2fa   : > { %6478 = vmatprep.subr.bf16.mxu1 %v6477_v7 }
 0x2fc   : > { %6027 = vmatmul.mubr.f32.gmra.mrb[14].mxu1 %v8342_v26  ;;  %v6489_v26 = vpack.c.bf16 %v5000_v44, %v4999_v0 }
 0x2fd   : > { %6480 = vmatpush3.bf16.msra.mxu1 %v6477_v7  ;;  %6061 = vmatprep.mubr.f32.mxu1 %v8444_v53  ;;  %v5001_v53 = vld [vmem:[%s8865_s5 + $0x330] sm:$0xff]  ;;  %v6513_v7 = vpack.c.bf16 %v5012_v46, %v5011_v60 }
 0x2fe   : > { %6482 = vmatprep.subr.bf16.mxu1 %v6481_v52 }
 0x300   : > { %6062 = vmatmul.mubr.f32.vlgmr.msra.gmra.mrb[0].mxu1 %v8447_v22  ;;  %v6493_v22 = vpack.c.bf16 %v5002_v25, %v5001_v53  ;;  %v5020_v53 = vld [vmem:[%s8865_s5 + $0x3c8] sm:$0xff] }
 0x301   : > { %6484 = vmatpush3.bf16.msra.mxu1 %v6481_v52  ;;  %6064 = vmatprep.mubr.f32.mxu1 %v6927_v10  ;;  %v5014_v52 = vld [vmem:[%s8865_s5 + $0x398] sm:$0xff]  ;;  %v5017_v10 = vld [vmem:[%s8865_s5 + $0x3b0] sm:$0xff] }
 0x302   : > { %6486 = vmatprep.subr.bf16.mxu1 %v6485_v18  ;;  %v6517_v2 = vpack.c.bf16 %v5014_v52, %v5013_v29 }
 0x304   : > { %6065 = vmatmul.mubr.f32.gmra.mrb[2].mxu1 %v6928_v19  ;;  %v5021_v19 = vld [vmem:[%s8865_s5 + $0x3d0] sm:$0xff] }
 0x305   : > { %6488 = vmatpush3.bf16.msra.mxu1 %v6485_v18  ;;  %6067 = vmatprep.mubr.f32.mxu1 %v6929_v31  ;;  %v5016_v18 = vld [vmem:[%s8865_s5 + $0x3a8] sm:$0xff]  ;;  %v5022_v31 = vld [vmem:[%s8865_s5 + $0x3d8] sm:$0xff] }
 0x306   : > { %6490 = vmatprep.subr.bf16.mxu1 %v6489_v26 }
 0x308   : > { %6068 = vmatmul.mubr.f32.gmra.mrb[4].mxu1 %v6930_v63  ;;  %v6932_v63 = vld [vmem:[#allocation2 + $0x39] sm:$0xff] }
 0x309   : > { %6492 = vmatpush3.bf16.msra.mxu1 %v6489_v26  ;;  %6070 = vmatprep.mubr.f32.mxu1 %v8173_v38  ;;  %v5007_v38 = vld [vmem:[%s8865_s5 + $0x360] sm:$0xff]  ;;  %v5018_v26 = vld [vmem:[%s8865_s5 + $0x3b8] sm:$0xff] }
 0x30a   : > { %6494 = vmatprep.subr.bf16.mxu1 %v6493_v22 }
 0x30c   : > { %6071 = vmatmul.mubr.f32.gmra.mrb[6].mxu1 %v8180_v32  ;;  %v6505_v32 = vpack.c.bf16 %v5008_v62, %v5007_v38 }
 0x30d   : > { %6496 = vmatpush3.bf16.msra.mxu1 %v6493_v22  ;;  %6073 = vmatprep.mubr.f32.mxu1 %v8480_v61  ;;  %v5024_v22 = vld [vmem:[%s8865_s5 + $0x3e8] sm:$0xff] }
 0x30e   : > { %6498 = vmatprep.subr.bf16.mxu1 %v6497_v51 }
 0x310   : > { %6074 = vmatmul.mubr.f32.gmra.mrb[8].mxu1 %v8483_v30 }
 0x311   : > { %6500 = vmatpush3.bf16.msra.mxu1 %v6497_v51  ;;  %6076 = vmatprep.mubr.f32.mxu1 %v8492_v3  ;;  %v4361_v51 = vld [vmem:[#allocation2 + $0xe2] sm:$0xff] }
 0x312   : > { %6502 = vmatprep.subr.bf16.mxu1 %v6501_v4 }
 0x314   : > { %6077 = vmatmul.mubr.f32.gmra.mrb[10].mxu1 %v8495_v37 }
 0x315   : > { %6504 = vmatpush3.bf16.msra.mxu1 %v6501_v4  ;;  %6079 = vmatprep.mubr.f32.mxu1 %v8504_v23 }
 0x316   : > { %6506 = vmatprep.subr.bf16.mxu1 %v6505_v32 }
 0x318   : > { %v8712_v6 = vpop.f32.mrb[16].mxu0  ;;  %6080 = vmatmul.mubr.f32.gmra.mrb[12].mxu1 %v8507_v50 }
 0x319   : > { %v8720_v8 = vpop.f32.mrb[17].mxu0  ;;  %6508 = vmatpush3.bf16.msra.mxu1 %v6505_v32  ;;  %6082 = vmatprep.mubr.f32.mxu1 %v8723_v42 }
 0x31a   : > { %6510 = vmatprep.subr.bf16.mxu1 %v6509_v45 }
 0x31c   : > { %6083 = vmatmul.mubr.f32.gmra.mrb[14].mxu1 %v8726_v59 }
 0x31d   : > { %6512 = vmatpush3.bf16.msra.mxu1 %v6509_v45  ;;  %6117 = vmatprep.mubr.f32.mxu1 %v8365_v9  ;;  %v6521_v9 = vpack.c.bf16 %v5016_v18, %v5015_v11 }
 0x31e   : > { %6514 = vmatprep.subr.bf16.mxu1 %v6513_v7  ;;  %v8742_v0 = vpop.f32.mrb[18].mxu0 }
 0x31f   : > { %v8745_v44 = vpop.f32.mrb[19].mxu0 }
 0x320   : > { %6118 = vmatmul.mubr.f32.vlgmr.msra.gmra.mrb[0].mxu1 %v8369_v27  ;;  %v6525_v27 = vpack.c.bf16 %v5018_v26, %v5017_v10 }
 0x321   : > { %6516 = vmatpush3.bf16.msra.mxu1 %v6513_v7  ;;  %6120 = vmatprep.mubr.f32.mxu1 %v8378_v58  ;;  %v5019_v58 = vld [vmem:[%s8865_s5 + $0x3c0] sm:$0xff] }
 0x322   : > { %6518 = vmatprep.subr.bf16.mxu1 %v6517_v2 }
 0x324   : > { %6121 = vmatmul.mubr.f32.gmra.mrb[2].mxu1 %v8381_v15 }
 0x325   : > { %6520 = vmatpush3.bf16.msra.mxu1 %v6517_v2  ;;  %6123 = vmatprep.mubr.f32.mxu1 %v8390_v21  ;;  %v6529_v21 = vpack.c.bf16 %v5020_v53, %v5019_v58 }
 0x326   : > { %6522 = vmatprep.subr.bf16.mxu1 %v6521_v9 }
 0x328   : > { %6124 = vmatmul.mubr.f32.gmra.mrb[4].mxu1 %v8393_v34  ;;  %v6533_v34 = vpack.c.bf16 %v5022_v31, %v5021_v19 }
 0x329   : > { %v8763_v25 = vpop.f32.mrb[20].mxu0  ;;  %6524 = vmatpush3.bf16.msra.mxu1 %v6521_v9  ;;  %6126 = vmatprep.mubr.f32.mxu1 %v8402_v56  ;;  %v5023_v56 = vld [vmem:[%s8865_s5 + $0x3e0] sm:$0xff] }
 0x32a   : > { %v8766_v15 = vpop.f32.mrb[21].mxu0  ;;  %6526 = vmatprep.subr.bf16.mxu1 %v6525_v27 }
 0x32c   : > { %6127 = vmatmul.mubr.f32.gmra.mrb[6].mxu1 %v8405_v17  ;;  %v6537_v17 = vpack.c.bf16 %v5024_v22, %v5023_v56 }
 0x32d   : > { %6528 = vmatpush3.bf16.msra.mxu1 %v6525_v27  ;;  %6129 = vmatprep.mubr.f32.mxu1 %v8414_v1  ;;  %v5025_v1 = vld [vmem:[%s8865_s5 + $0x3f0] sm:$0xff] }
 0x32e   : > { %6530 = vmatprep.subr.bf16.mxu1 %v6529_v21 }
 0x330   : > { %6130 = vmatmul.mubr.f32.gmra.mrb[8].mxu1 %v8417_v49  ;;  %v6541_v49 = vpack.c.bf16 %v5026_v33, %v5025_v1 }
 0x331   : > { %6532 = vmatpush3.bf16.msra.mxu1 %v6529_v21  ;;  %6132 = vmatprep.mubr.f32.mxu1 %v8426_v41  ;;  %v6931_v41 = vld [vmem:[#allocation2] sm:$0xff] }
 0x332   : > { %6534 = vmatprep.subr.bf16.mxu1 %v6533_v34 }
 0x334   : > { %6133 = vmatmul.mubr.f32.gmra.mrb[10].mxu1 %v8429_v35  ;;  %v8940_v35 = vld [vmem:[#allocation8_spill] sm:$0xff] }
 0x335   : > { %6536 = vmatpush3.bf16.msra.mxu1 %v6533_v34  ;;  %6135 = vmatprep.mubr.f32.mxu1 %v8572_v12  ;;  %v8941_v12 = vld [vmem:[#allocation9_spill] sm:$0xff] }
 0x336   : > { %6538 = vmatprep.subr.bf16.mxu1 %v6537_v17 }
 0x338   : > { %6136 = vmatmul.mubr.f32.gmra.mrb[12].mxu1 %v8575_v39  ;;  %v8942_v39 = vld [vmem:[#allocation10_spill] sm:$0xff] }
 0x339   : > { %6540 = vmatpush3.bf16.msra.mxu1 %v6537_v17  ;;  %6138 = vmatprep.mubr.f32.mxu1 %v6931_v41 }
 0x33a   : > { %6542 = vmatprep.subr.bf16.mxu1 %v6541_v49 }
 0x33c   : > { %6139 = vmatmul.mubr.f32.gmra.mrb[14].mxu1 %v6931_v41 }
 0x33d   : > { %6544 = vmatpush3.bf16.msra.mxu1 %v6541_v49  ;;  %6173 = vmatprep.mubr.f32.mxu1 %v8591_v5  ;;  %v8943_v5 = vld [vmem:[#allocation11_spill] sm:$0xff] }
 0x33e   : > { %6577 = vmatprep.subr.bf16.mxu1 %v8939_v47 }
 0x340   : > { %6174 = vmatmul.mubr.f32.vlgmr.msra.gmra.mrb[0].mxu1 %v6932_v63 }
 0x341   : > { %6585 = vmatpush3.bf16.msra.mxu1 %v8939_v47  ;;  %6176 = vmatprep.mubr.f32.mxu1 %v8601_v40  ;;  %v4162_v40 = vld [vmem:[#allocation2 + $0xa9] sm:$0xff] }
 0x342   : > { %6578 = vmatprep.subr.bf16.mxu1 %v8940_v35 }
 0x344   : > { %6177 = vmatmul.mubr.f32.gmra.mrb[2].mxu1 %v8604_v28  ;;  %v8944_v28 = vld [vmem:[#allocation12_spill] sm:$0xff] }
 0x345   : > { %6586 = vmatpush3.bf16.msra.mxu1 %v8940_v35  ;;  %6179 = vmatprep.mubr.f32.mxu1 %v8613_v13  ;;  %v4164_v13 = vld [vmem:[#allocation2 + $0xc1] sm:$0xff] }
 0x346   : > { %6579 = vmatprep.subr.bf16.mxu1 %v8941_v12 }
 0x348   : > { %6180 = vmatmul.mubr.f32.gmra.mrb[4].mxu1 %v8616_v16  ;;  %v8945_v16 = vld [vmem:[#allocation13_spill] sm:$0xff] }
 0x349   : > { %6587 = vmatpush3.bf16.msra.mxu1 %v8941_v12  ;;  %6182 = vmatprep.mubr.f32.mxu1 %v8625_v57  ;;  %v4166_v57 = vld [vmem:[#allocation2 + $0xd9] sm:$0xff] }
 0x34a   : > { %6580 = vmatprep.subr.bf16.mxu1 %v8942_v39 }
 0x34c   : > { %6183 = vmatmul.mubr.f32.gmra.mrb[6].mxu1 %v8628_v54  ;;  %v4165_v54 = vld [vmem:[#allocation2 + $0xc9] sm:$0xff] }
 0x34d   : > { %6588 = vmatpush3.bf16.msra.mxu1 %v8942_v39  ;;  %6185 = vmatprep.mubr.f32.mxu1 %v8637_v14  ;;  %v4167_v14 = vld [vmem:[#allocation2 + $0xe1] sm:$0xff] }
 0x34e   : > { %6581 = vmatprep.subr.bf16.mxu1 %v8943_v5 }
 0x350   : > { %6186 = vmatmul.mubr.f32.gmra.mrb[8].mxu1 %v8640_v20  ;;  %v8946_v20 = vld [vmem:[#allocation14_spill] sm:$0xff] }
 0x351   : > { %6589 = vmatpush3.bf16.msra.mxu1 %v8943_v5  ;;  %6188 = vmatprep.mubr.f32.mxu1 %v4162_v40 }
 0x352   : > { %6582 = vmatprep.subr.bf16.mxu1 %v8944_v28 }
 0x354   : > { %6189 = vmatmul.mubr.f32.gmra.mrb[10].mxu1 %v8650_v43  ;;  %v4360_v43 = vld [vmem:[#allocation2 + $0xda] sm:$0xff] }
 0x355   : > { %6590 = vmatpush3.bf16.msra.mxu1 %v8944_v28  ;;  %6191 = vmatprep.mubr.f32.mxu1 %v4164_v13 }
 0x356   : > { %6583 = vmatprep.subr.bf16.mxu1 %v8945_v16 }
 0x358   : > { %6192 = vmatmul.mubr.f32.gmra.mrb[12].mxu1 %v4165_v54 }
 0x359   : > { %6591 = vmatpush3.bf16.msra.mxu1 %v8945_v16  ;;  %6194 = vmatprep.mubr.f32.mxu1 %v4166_v57 }
 0x35a   : > { %6584 = vmatprep.subr.bf16.mxu1 %v8946_v20 }
 0x35c   : > { %6195 = vmatmul.mubr.f32.gmra.mrb[14].mxu1 %v4167_v14 }
 0x35d   : > { %6592 = vmatpush3.bf16.msra.mxu1 %v8946_v20  ;;  %6238 = vmatprep.mubr.f32.mxu1 %v8480_v61 }
 0x360   : > { %6239 = vmatmul.mubr.f32.vlgmr.msra.gmra.mrb[6].mxu1 %v8483_v30  ;;  %v5043_v30 = vld [vmem:[%s8866_s6] ss:$0 sm:$0xff] }
 0x361   : > { %6241 = vmatprep.mubr.f32.mxu1 %v8492_v3 }
 0x364   : > { %6242 = vmatmul.mubr.f32.gmra.mrb[8].mxu1 %v8495_v37 }
 0x365   : > { %6244 = vmatprep.mubr.f32.mxu1 %v8504_v23 }
 0x368   : > { %6245 = vmatmul.mubr.f32.gmra.mrb[10].mxu1 %v8507_v50 }
 0x369   : > { %6247 = vmatprep.mubr.f32.mxu1 %v8723_v42 }
 0x36c   : > { %6248 = vmatmul.mubr.f32.gmra.mrb[12].mxu1 %v8726_v59 }
 0x36d   : > { %6250 = vmatprep.mubr.f32.mxu1 %v4360_v43 }
 0x370   : > { %6251 = vmatmul.mubr.f32.gmra.mrb[14].mxu1 %v4361_v51 }
 0x413   : > { %v6175_v61 = vpop.f32.mrb[0].mxu1 }
 0x414   : > { %v6593_v3 = vadd.f32 %v8712_v6, %v6175_v61  ;;  %v4251_v37 = vpop.f32.mrb[1].mxu1 }
 0x415   : > { %v6594_v23 = vadd.f32 %v8720_v8, %v4251_v37 }
 0x416   : > { %v4548_v50 = vadd.f32 %v6593_v3, %v5043_v30 }
 0x417   : > { %v4547_v55 = vadd.f32 %v6594_v23, %v5043_v30  ;;  %v6178_v48 = vpop.f32.mrb[2].mxu1 }
 0x418   : > { %4564 = vst [vmem:[%s8835_s9 + $0x8] sm:$0xff] %v4548_v50  ;;  %v6595_v4 = vadd.f32 %v8742_v0, %v6178_v48  ;;  %v4261_v38 = vpop.f32.mrb[3].mxu1 }
 0x419   : > { %4563 = vst [vmem:[%s8835_s9] sm:$0xff] %v4547_v55  ;;  %v6596_v62 = vadd.f32 %v8745_v44, %v4261_v38 }
 0x41a   : > { %v4550_v32 = vadd.f32 %v6595_v4, %v5043_v30 }
 0x41b   : > { %v4549_v36 = vadd.f32 %v6596_v62, %v5043_v30  ;;  %v6181_v24 = vpop.f32.mrb[4].mxu1 }
 0x41c   : > { %4566 = vst [vmem:[%s8835_s9 + $0x18] sm:$0xff] %v4550_v32  ;;  %v6597_v45 = vadd.f32 %v8763_v25, %v6181_v24  ;;  %v4271_v6 = vpop.f32.mrb[5].mxu1 }
 0x41d   : > { %4565 = vst [vmem:[%s8835_s9 + $0x10] sm:$0xff] %v4549_v36  ;;  %v6598_v60 = vadd.f32 %v8766_v15, %v4271_v6 }
 0x41e   : > { %v4552_v46 = vadd.f32 %v6597_v45, %v5043_v30 }
 0x41f   : > { %v4551_v8 = vadd.f32 %v6598_v60, %v5043_v30 }
 0x420   : > { %4568 = vst [vmem:[%s8835_s9 + $0x28] sm:$0xff] %v4552_v46 }
 0x421   : > { %4567 = vst [vmem:[%s8835_s9 + $0x20] sm:$0xff] %v4551_v8 }
 0x433   : > { %v6240_v42 = vpop.f32.mrb[6].mxu1 }
 0x434   : > { %v4554_v7 = vadd.f32 %v6240_v42, %v5043_v30  ;;  %v4475_v59 = vpop.f32.mrb[7].mxu1 }
 0x435   : > { %v4553_v29 = vadd.f32 %v5043_v30, %v4475_v59 }
 0x436   : > { %4570 = vst [vmem:[%s8835_s9 + $0x38] sm:$0xff] %v4554_v7 }
 0x437   : > { %4569 = vst [vmem:[%s8835_s9 + $0x30] sm:$0xff] %v4553_v29  ;;  %v6243_v52 = vpop.f32.mrb[8].mxu1 }
 0x438   : > { %v4556_v2 = vadd.f32 %v6243_v52, %v5043_v30  ;;  %v4485_v11 = vpop.f32.mrb[9].mxu1 }
 0x439   : > { %v4555_v18 = vadd.f32 %v5043_v30, %v4485_v11 }
 0x43a   : > { %4572 = vst [vmem:[%s8835_s9 + $0x48] sm:$0xff] %v4556_v2 }
 0x43b   : > { %4571 = vst [vmem:[%s8835_s9 + $0x40] sm:$0xff] %v4555_v18  ;;  %v6246_v0 = vpop.f32.mrb[10].mxu1 }
 0x43c   : > { %v4558_v44 = vadd.f32 %v6246_v0, %v5043_v30  ;;  %v4495_v9 = vpop.f32.mrb[11].mxu1 }
 0x43d   : > { %v4557_v10 = vadd.f32 %v5043_v30, %v4495_v9 }
 0x43e   : > { %4574 = vst [vmem:[%s8835_s9 + $0x58] sm:$0xff] %v4558_v44 }
 0x43f   : > { %4573 = vst [vmem:[%s8835_s9 + $0x50] sm:$0xff] %v4557_v10  ;;  %v6249_v26 = vpop.f32.mrb[12].mxu1 }
 0x440   : > { %v4560_v27 = vadd.f32 %v6249_v26, %v5043_v30  ;;  %v4505_v58 = vpop.f32.mrb[13].mxu1 }
 0x441   : > { %v4559_v53 = vadd.f32 %v5043_v30, %v4505_v58 }
 0x442   : > { %4576 = vst [vmem:[%s8835_s9 + $0x68] sm:$0xff] %v4560_v27 }
 0x443   : > { %4575 = vst [vmem:[%s8835_s9 + $0x60] sm:$0xff] %v4559_v53  ;;  %v6252_v25 = vpop.f32.mrb[14].mxu1 }
 0x444   : > { %v4562_v15 = vadd.f32 %v6252_v25, %v5043_v30  ;;  %v4515_v21 = vpop.f32.mrb[15].mxu1 }
 0x445   : > { %v4561_v19 = vadd.f32 %v5043_v30, %v4515_v21 }
 0x446   : > { %4578 = vst [vmem:[%s8835_s9 + $0x78] sm:$0xff] %v4562_v15 }
 0x447   : > { %4577 = vst [vmem:[%s8835_s9 + $0x70] sm:$0xff] %v4561_v19 }
 0x448 PF: > { %s27_s1 = sadd.s32 1, %s6965_s1  }
 0x449   : > { %p24_p0 = scmp.ge.s32.totalorder %s27_s1, 10  }
 0x44b   :  { %26 = sbr.rel (!%p24_p0) target bundleno = 26 (0x1a), region = 90 }

// kernel: _lambda_.11
= control target key start
LH: loop header
LB: loop body
LE: loop exit
PB: predicated region body
PF: predicated region fallthrough
CT: control target
= control target key end

     0   :  { %vm41_vm0 = vcmask 130048   ;;  %s374_s0 = inlined_call_operand.vmem [shape: f32[64,16], index: 0, kind: input, shape index: {}]   ;;  %s375_s1 = inlined_call_operand.vmem [shape: f32[64,16], index: 1, kind: input, shape index: {}]   ;;  %s376_s2 = inlined_call_operand.vmem [shape: f32[1,16], index: 2, kind: input, shape index: {}]   ;;  %s377_s3 = inlined_call_operand.vmem [shape: f32[1,16], index: 3, kind: input, shape index: {}]   ;;  %s378_s4 = inlined_call_operand.vmem [shape: f32[64,16], index: 4, kind: output, shape index: {}]  }
   0x1   :  { %v17_v0 = vld [vmem:[%s374_s0] sm:$0xff]  ;;  %v19_v2 = vld [vmem:[%s374_s0 + $0x10] sm:$0xff]  ;;  %v18_v5 = vld [vmem:[%s374_s0 + $0x8] sm:$0xff] }
   0x2   :  { %v25_v1 = vld [vmem:[%s375_s1] sm:$0xff]  ;;  %v27_v4 = vld [vmem:[%s375_s1 + $0x10] sm:$0xff]  ;;  %v26_v6 = vld [vmem:[%s375_s1 + $0x8] sm:$0xff] }
   0x3   :  { %v33_v3 = vadd.f32 %v25_v1, %v17_v0  ;;  %v35_v7 = vadd.f32 %v27_v4, %v19_v2  ;;  %v34_v8 = vadd.f32 %v26_v6, %v18_v5  ;;  %v20_v9 = vld [vmem:[%s374_s0 + $0x18] sm:$0xff]  ;;  %v21_v11 = vld [vmem:[%s374_s0 + $0x20] sm:$0xff]  ;;  %v22_v15 = vld [vmem:[%s374_s0 + $0x28] sm:$0xff] }
   0x4   :  { %v28_v10 = vld [vmem:[%s375_s1 + $0x18] sm:$0xff]  ;;  %v29_v14 = vld [vmem:[%s375_s1 + $0x20] sm:$0xff]  ;;  %v30_v16 = vld [vmem:[%s375_s1 + $0x28] sm:$0xff] }
   0x5   :  { %v42_v12 = vsel %vm41_vm0, %v33_v3, 0.0  ;;  %v36_v13 = vadd.f32 %v28_v10, %v20_v9  ;;  %v48_v17 = vsel %vm41_vm0, %v35_v7, 0.0  ;;  %v45_v18 = vsel %vm41_vm0, %v34_v8, 0.0  ;;  %v23_v22 = vld [vmem:[%s374_s0 + $0x30] sm:$0xff]  ;;  %v24_v24 = vld [vmem:[%s374_s0 + $0x38] sm:$0xff] }
   0x6   :  { %43 = vadd.xlane.f32.xlu0 %v42_v12  ;;  %49 = vadd.xlane.f32.xlu1 %v48_v17  ;;  %v37_v19 = vadd.f32 %v29_v14, %v21_v11  ;;  %v38_v21 = vadd.f32 %v30_v16, %v22_v15  ;;  %v31_v23 = vld [vmem:[%s375_s1 + $0x30] sm:$0xff]  ;;  %v32_v25 = vld [vmem:[%s375_s1 + $0x38] sm:$0xff] }
   0x7   :  { %v51_v20 = vsel %vm41_vm0, %v36_v13, 0.0  ;;  %v39_v27 = vadd.f32 %v31_v23, %v23_v22  ;;  %v40_v29 = vadd.f32 %v32_v25, %v24_v24 }
   0x8   :  { %v54_v26 = vsel %vm41_vm0, %v37_v19, 0.0  ;;  %v57_v28 = vsel %vm41_vm0, %v38_v21, 0.0 }
   0x9   :  { %v60_v30 = vsel %vm41_vm0, %v39_v27, 0.0  ;;  %v63_v31 = vsel %vm41_vm0, %v40_v29, 0.0 }
   0xa   :  { %46 = vadd.xlane.f32.xlu0 %v45_v18  ;;  %52 = vadd.xlane.f32.xlu1 %v51_v20 }
   0xe   :  { %55 = vadd.xlane.f32.xlu0 %v54_v26  ;;  %58 = vadd.xlane.f32.xlu1 %v57_v28  ;;  %v189_v28 = vld [vmem:[%s376_s2] ss:$0 sm:$0xff] }
  0x12   :  { %61 = vadd.xlane.f32.xlu0 %v60_v30  ;;  %64 = vadd.xlane.f32.xlu1 %v63_v31 }
  0x93   :  { %v44_v32 = vpop.xlane.xlu0 %43  ;;  %v50_v34 = vpop.xlane.xlu1 %49 }
  0x94   :  { %v67_v33 = vmul.f32 0.0625, %v44_v32  ;;  %v69_v35 = vmul.f32 0.0625, %v50_v34 }
  0x96   :  { %v288_v36 = vsub.f32 %v33_v3, %v67_v33  ;;  %v290_v37 = vsub.f32 %v35_v7, %v69_v35  ;;  %v190_v33 = vld [vmem:[%s377_s3] ss:$0 sm:$0xff] }
  0x97   :  { %v47_v38 = vpop.xlane.xlu0 %46  ;;  %v53_v40 = vpop.xlane.xlu1 %52 }
  0x98   :  { %v68_v39 = vmul.f32 0.0625, %v47_v38  ;;  %v83_v41 = vmul.f32 %v288_v36, %v288_v36  ;;  %v70_v42 = vmul.f32 0.0625, %v53_v40  ;;  %v85_v43 = vmul.f32 %v290_v37, %v290_v37 }
  0x9a   :  { %v296_v44 = vsub.f32 %v34_v8, %v68_v39  ;;  %v91_v45 = vsel %vm41_vm0, %v83_v41, 0.0  ;;  %v299_v46 = vsub.f32 %v36_v13, %v70_v42  ;;  %v97_v50 = vsel %vm41_vm0, %v85_v43, 0.0 }
  0x9b   :  { %92 = vadd.xlane.f32.xlu0 %v91_v45  ;;  %v56_v47 = vpop.xlane.xlu0 %55  ;;  %v59_v49 = vpop.xlane.xlu1 %58 }
  0x9c   :  { %v71_v48 = vmul.f32 0.0625, %v56_v47  ;;  %v84_v51 = vmul.f32 %v296_v44, %v296_v44  ;;  %v72_v52 = vmul.f32 0.0625, %v59_v49  ;;  %v86_v53 = vmul.f32 %v299_v46, %v299_v46 }
  0x9e   :  { %v306_v54 = vsub.f32 %v37_v19, %v71_v48  ;;  %v94_v55 = vsel %vm41_vm0, %v84_v51, 0.0  ;;  %v309_v56 = vsub.f32 %v38_v21, %v72_v52  ;;  %v100_v60 = vsel %vm41_vm0, %v86_v53, 0.0 }
  0x9f   :  { %98 = vadd.xlane.f32.xlu0 %v97_v50  ;;  %95 = vadd.xlane.f32.xlu1 %v94_v55  ;;  %v62_v57 = vpop.xlane.xlu0 %61  ;;  %v65_v59 = vpop.xlane.xlu1 %64 }
  0xa0   :  { %v73_v58 = vmul.f32 0.0625, %v62_v57  ;;  %v87_v61 = vmul.f32 %v306_v54, %v306_v54  ;;  %v74_v62 = vmul.f32 0.0625, %v65_v59  ;;  %v88_v63 = vmul.f32 %v309_v56, %v309_v56 }
  0xa2   :  { %v316_v0 = vsub.f32 %v39_v27, %v73_v58  ;;  %v103_v1 = vsel %vm41_vm0, %v87_v61, 0.0  ;;  %v319_v2 = vsub.f32 %v40_v29, %v74_v62  ;;  %v106_v3 = vsel %vm41_vm0, %v88_v63, 0.0 }
  0xa3   :  { %101 = vadd.xlane.f32.xlu1 %v100_v60  ;;  %104 = vadd.xlane.f32.xlu0 %v103_v1 }
  0xa4   :  { %v89_v4 = vmul.f32 %v316_v0, %v316_v0  ;;  %v90_v5 = vmul.f32 %v319_v2, %v319_v2 }
  0xa6   :  { %v109_v6 = vsel %vm41_vm0, %v89_v4, 0.0  ;;  %v112_v7 = vsel %vm41_vm0, %v90_v5, 0.0 }
  0xa7   :  { %107 = vadd.xlane.f32.xlu1 %v106_v3  ;;  %110 = vadd.xlane.f32.xlu0 %v109_v6 }
  0xab   :  { %113 = vadd.xlane.f32.xlu1 %v112_v7 }
 0x128   :  { %v93_v8 = vpop.xlane.xlu0 %92 }
 0x129   :  { %v115_v9 = vmul.f32 0.0625, %v93_v8 }
 0x12b   :  { %v123_v10 = vadd.f32 1e-05, %v115_v9 }
 0x12c   :  { %v96_v11 = vpop.xlane.xlu1 %95  ;;  %v99_v12 = vpop.xlane.xlu0 %98 }
 0x12d   :  { %191 = vrsqrt.f32 %v123_v10  ;;  %v116_v13 = vmul.f32 0.0625, %v96_v11  ;;  %v117_v14 = vmul.f32 0.0625, %v99_v12 }
 0x12f   :  { %v124_v15 = vadd.f32 1e-05, %v116_v13  ;;  %v125_v16 = vadd.f32 1e-05, %v117_v14 }
 0x130   :  { %v102_v17 = vpop.xlane.xlu1 %101  ;;  %v105_v18 = vpop.xlane.xlu0 %104 }
 0x131   :  { %193 = vrsqrt.f32 %v124_v15  ;;  %v118_v19 = vmul.f32 0.0625, %v102_v17  ;;  %v119_v20 = vmul.f32 0.0625, %v105_v18 }
 0x132   :  { %195 = vrsqrt.f32 %v125_v16 }
 0x133   :  { %v126_v21 = vadd.f32 1e-05, %v118_v19  ;;  %v127_v22 = vadd.f32 1e-05, %v119_v20 }
 0x134   :  { %v108_v23 = vpop.xlane.xlu1 %107  ;;  %v111_v24 = vpop.xlane.xlu0 %110 }
 0x135   :  { %197 = vrsqrt.f32 %v126_v21  ;;  %v120_v25 = vmul.f32 0.0625, %v108_v23  ;;  %v121_v26 = vmul.f32 0.0625, %v111_v24 }
 0x136   :  { %199 = vrsqrt.f32 %v127_v22 }
 0x137   :  { %v192_v27 = vpop.eup %191  ;;  %v128_v29 = vadd.f32 1e-05, %v120_v25  ;;  %v129_v30 = vadd.f32 1e-05, %v121_v26 }
 0x138   :  { %v139_v31 = vmul.f32 %v192_v27, %v288_v36  ;;  %v114_v32 = vpop.xlane.xlu1 %113 }
 0x139   :  { %201 = vrsqrt.f32 %v128_v29  ;;  %v122_v34 = vmul.f32 0.0625, %v114_v32 }
 0x13a   :  { %v154_v35 = vmul.f32 %v189_v28, %v139_v31  ;;  %203 = vrsqrt.f32 %v129_v30 }
 0x13b   :  { %v194_v38 = vpop.eup %193  ;;  %v130_v39 = vadd.f32 1e-05, %v122_v34 }
 0x13c   :  { %v196_v40 = vpop.eup %195  ;;  %v169_v41 = vadd.f32 %v190_v33, %v154_v35  ;;  %v140_v42 = vmul.f32 %v194_v38, %v296_v44 }
 0x13d   :  { %v141_v43 = vmul.f32 %v196_v40, %v290_v37  ;;  %205 = vrsqrt.f32 %v130_v39 }
 0x13e   :  { %177 = vst.msk [vmem:[%s378_s4] sm:$0xff] %vm41_vm0, %v169_v41  ;;  %v155_v36 = vmul.f32 %v189_v28, %v140_v42 }
 0x13f   :  { %v198_v45 = vpop.eup %197  ;;  %v156_v47 = vmul.f32 %v189_v28, %v141_v43 }
 0x140   :  { %v200_v48 = vpop.eup %199  ;;  %v170_v49 = vadd.f32 %v190_v33, %v155_v36  ;;  %v142_v50 = vmul.f32 %v198_v45, %v299_v46 }
 0x141   :  { %v171_v51 = vadd.f32 %v190_v33, %v156_v47  ;;  %v143_v52 = vmul.f32 %v200_v48, %v306_v54 }
 0x142   :  { %178 = vst.msk [vmem:[%s378_s4 + $0x8] sm:$0xff] %vm41_vm0, %v170_v49  ;;  %v157_v37 = vmul.f32 %v189_v28, %v142_v50 }
 0x143   :  { %v202_v44 = vpop.eup %201  ;;  %179 = vst.msk [vmem:[%s378_s4 + $0x10] sm:$0xff] %vm41_vm0, %v171_v51  ;;  %v158_v53 = vmul.f32 %v189_v28, %v143_v52 }
 0x144   :  { %v204_v55 = vpop.eup %203  ;;  %v172_v57 = vadd.f32 %v190_v33, %v157_v37  ;;  %v144_v46 = vmul.f32 %v202_v44, %v309_v56 }
 0x145   :  { %v173_v58 = vadd.f32 %v190_v33, %v158_v53  ;;  %v145_v54 = vmul.f32 %v204_v55, %v316_v0 }
 0x146   :  { %180 = vst.msk [vmem:[%s378_s4 + $0x18] sm:$0xff] %vm41_vm0, %v172_v57  ;;  %v159_v59 = vmul.f32 %v189_v28, %v144_v46 }
 0x147   :  { %v206_v60 = vpop.eup %205  ;;  %181 = vst.msk [vmem:[%s378_s4 + $0x20] sm:$0xff] %vm41_vm0, %v173_v58  ;;  %v160_v61 = vmul.f32 %v189_v28, %v145_v54 }
 0x148   :  { %v174_v62 = vadd.f32 %v190_v33, %v159_v59  ;;  %v146_v63 = vmul.f32 %v206_v60, %v319_v2 }
 0x149   :  { %v175_v56 = vadd.f32 %v190_v33, %v160_v61 }
 0x14a   :  { %182 = vst.msk [vmem:[%s378_s4 + $0x28] sm:$0xff] %vm41_vm0, %v174_v62  ;;  %v161_v0 = vmul.f32 %v189_v28, %v146_v63 }
 0x14b   :  { %183 = vst.msk [vmem:[%s378_s4 + $0x30] sm:$0xff] %vm41_vm0, %v175_v56 }
 0x14c   :  { %v176_v1 = vadd.f32 %v190_v33, %v161_v0 }
 0x14e   :  { %184 = vst.msk [vmem:[%s378_s4 + $0x38] sm:$0xff] %vm41_vm0, %v176_v1 }

// kernel: _lambda_.14
= control target key start
LH: loop header
LB: loop body
LE: loop exit
PB: predicated region body
PF: predicated region fallthrough
CT: control target
= control target key end

     0   :  { %v737_v3 = vmov 0.0   ;;  %vm144_vm3 = vcmask 130048   ;;  %vm578_vm13 = vcmask 31744   ;;  %s1078_s1 = inlined_call_operand.vmem [shape: f32[16,256], index: 1, kind: input, shape index: {}]   ;;  %s1079_s0 = inlined_call_operand.vmem [shape: f32[32,16], index: 0, kind: input, shape index: {}]   ;;  %s1080_s3 = inlined_call_operand.vmem [shape: f32[256,4], index: 3, kind: input, shape index: {}]   ;;  %s1081_s2 = inlined_call_operand.vmem [shape: f32[1,256], index: 2, kind: input, shape index: {}]   ;;  %s1082_s4 = inlined_call_operand.vmem [shape: f32[1,4], index: 4, kind: input, shape index: {}]   ;;  %s1083_s5 = inlined_call_operand.vmem [shape: f32[32,4], index: 5, kind: output, shape index: {}]  }
   0x1   :  { %v129_v0 = vld [vmem:[%s1078_s1 + $0x8] sm:$0xff]  ;;  %v131_v1 = vld [vmem:[%s1078_s1 + $0x18] sm:$0xff]  ;;  %v128_v2 = vld [vmem:[%s1078_s1] sm:$0xff]  ;;  %221 = vmatprep.mubr.f32.mxu0 %v737_v3 }
   0x2   :  { %v636_v4 = vpack.c.bf16 %v131_v1, %v129_v0  ;;  %v130_v5 = vld [vmem:[%s1078_s1 + $0x10] sm:$0xff]  ;;  %v784_v6 = vld [vmem:[%s1079_s0] sm:$0xff]  ;;  %v789_v7 = vld [vmem:[%s1079_s0 + $0x8] sm:$0xff] }
   0x3   :  { %v638_v8 = vpack.c.bf16 %v130_v5, %v128_v2  ;;  %v792_v9 = vmul.f32 0.70710677, %v784_v6  ;;  %v797_v10 = vld [vmem:[%s1079_s0 + $0x10] sm:$0xff]  ;;  %v802_v11 = vld [vmem:[%s1079_s0 + $0x18] sm:$0xff]  ;;  %v805_v12 = vmul.f32 0.70710677, %v789_v7 }
   0x4   :  { %637 = vmatprep.subr.bf16.mxu0 %v636_v4  ;;  %v808_v13 = vmul.f32 0.70710677, %v797_v10  ;;  %v812_v15 = vmul.f32 0.70710677, %v802_v11 }
   0x5   :  { %639 = vmatpush1.bf16.msra.mxu0 %v638_v8  ;;  %v32_v14 = vand.u32 2147483647, %v792_v9  ;;  %v33_v16 = vand.u32 2147483647, %v805_v12  ;;  %vm108_vm0 = vcmp.ge.f32.partialorder %v792_v9, 0.0  ;;  %vm109_vm1 = vcmp.ge.f32.partialorder %v805_v12, 0.0 }
   0x6   :  { %v34_v17 = vand.u32 2147483647, %v808_v13  ;;  %v35_v19 = vand.u32 2147483647, %v812_v15  ;;  %vm110_vm2 = vcmp.ge.f32.partialorder %v808_v13, 0.0  ;;  %vm111_vm4 = vcmp.ge.f32.partialorder %v812_v15, 0.0 }
   0x7   :  { %v36_v18 = vmul.f32 0.3275911, %v32_v14  ;;  %v37_v20 = vmul.f32 0.3275911, %v33_v16  ;;  %v84_v27 = vsub.f32 0.0, %v32_v14  ;;  %v85_v28 = vsub.f32 0.0, %v33_v16 }
   0x8   :  { %v38_v21 = vmul.f32 0.3275911, %v34_v17  ;;  %v39_v23 = vmul.f32 0.3275911, %v35_v19  ;;  %v86_v30 = vsub.f32 0.0, %v34_v17  ;;  %v87_v33 = vsub.f32 0.0, %v35_v19 }
   0x9   :  { %v40_v22 = vadd.f32 1.0, %v36_v18  ;;  %v41_v24 = vadd.f32 1.0, %v37_v20  ;;  %v88_v29 = vmul.f32 %v84_v27, %v32_v14  ;;  %v89_v31 = vmul.f32 %v85_v28, %v33_v16 }
   0xa   :  { %v42_v25 = vadd.f32 1.0, %v38_v21  ;;  %v43_v26 = vadd.f32 1.0, %v39_v23  ;;  %v90_v38 = vmul.f32 %v86_v30, %v34_v17  ;;  %v91_v43 = vmul.f32 %v87_v33, %v35_v19 }
   0xb   :  { %689 = vrcp.f32 %v40_v22  ;;  %v92_v36 = vmul.f32 1.442695, %v88_v29  ;;  %v94_v40 = vmul.f32 1.442695, %v89_v31 }
   0xc   :  { %691 = vrcp.f32 %v41_v24  ;;  %v96_v48 = vmul.f32 1.442695, %v90_v38  ;;  %v98_v53 = vmul.f32 1.442695, %v91_v43 }
   0xd   :  { %693 = vrcp.f32 %v42_v25 }
   0xe   :  { %695 = vrcp.f32 %v43_v26 }
   0xf   :  { %697 = vpow2.f32 %v92_v36 }
  0x10   :  { %699 = vpow2.f32 %v94_v40  ;;  %v25_v40 = vmul.f32 0.5, %v789_v7 }
  0x11   :  { %701 = vpow2.f32 %v96_v48  ;;  %v27_v48 = vmul.f32 0.5, %v802_v11  ;;  %v454_v11 = vld [vmem:[%s1080_s3] sm:$0xff] }
  0x12   :  { %703 = vpow2.f32 %v98_v53  ;;  %v472_v53 = vld [vmem:[%s1080_s3 + $0x90] sm:$0xff] }
  0x15   :  { %v690_v32 = vpop.eup %689 }
  0x16   :  { %v692_v34 = vpop.eup %691  ;;  %v48_v35 = vmul.f32 1.0614054, %v690_v32 }
  0x17   :  { %v49_v37 = vmul.f32 1.0614054, %v692_v34  ;;  %v694_v41 = vpop.eup %693 }
  0x18   :  { %v52_v39 = vadd.f32 -1.4531521, %v48_v35  ;;  %v50_v45 = vmul.f32 1.0614054, %v694_v41  ;;  %v696_v46 = vpop.eup %695  ;;  %v24_v35 = vmul.f32 0.5, %v784_v6 }
  0x19   :  { %v53_v42 = vadd.f32 -1.4531521, %v49_v37  ;;  %v51_v51 = vmul.f32 1.0614054, %v696_v46  ;;  %v698_v8 = vpop.eup %697 }
  0x1a   :  { %v56_v44 = vmul.f32 %v690_v32, %v52_v39  ;;  %v54_v50 = vadd.f32 -1.4531521, %v50_v45  ;;  %v700_v16 = vpop.eup %699 }
  0x1b   :  { %v57_v47 = vmul.f32 %v692_v34, %v53_v42  ;;  %v55_v56 = vadd.f32 -1.4531521, %v51_v51  ;;  %v702_v24 = vpop.eup %701 }
  0x1c   :  { %v60_v49 = vadd.f32 1.4214138, %v56_v44  ;;  %v58_v55 = vmul.f32 %v694_v41, %v54_v50  ;;  %v704_v29 = vpop.eup %703  ;;  %v471_v50 = vld [vmem:[%s1080_s3 + $0x88] sm:$0xff] }
  0x1d   :  { %v61_v52 = vadd.f32 1.4214138, %v57_v47  ;;  %v59_v60 = vmul.f32 %v696_v46, %v55_v56  ;;  %v456_v56 = vld [vmem:[%s1080_s3 + $0x10] sm:$0xff] }
  0x1e   :  { %v64_v54 = vmul.f32 %v690_v32, %v60_v49  ;;  %v62_v59 = vadd.f32 1.4214138, %v58_v55 }
  0x1f   :  { %v65_v57 = vmul.f32 %v692_v34, %v61_v52  ;;  %v63_v0 = vadd.f32 1.4214138, %v59_v60  ;;  %v455_v52 = vld [vmem:[%s1080_s3 + $0x8] sm:$0xff] }
  0x20   :  { %v68_v58 = vadd.f32 -0.28449672, %v64_v54  ;;  %v66_v63 = vmul.f32 %v694_v41, %v62_v59  ;;  %v473_v54 = vld [vmem:[%s1080_s3 + $0x98] sm:$0xff]  ;;  %v474_v59 = vld [vmem:[%s1080_s3 + $0xa0] sm:$0xff]  ;;  %v475_v60 = vld [vmem:[%s1080_s3 + $0xa8] sm:$0xff] }
  0x21   :  { %v69_v61 = vadd.f32 -0.28449672, %v65_v57  ;;  %v67_v5 = vmul.f32 %v696_v46, %v63_v0  ;;  %v644_v55 = vpack.c.bf16 %v473_v54, %v472_v53  ;;  %v457_v57 = vld [vmem:[%s1080_s3 + $0x18] sm:$0xff] }
  0x22   :  { %v72_v62 = vmul.f32 %v690_v32, %v68_v58  ;;  %v70_v4 = vadd.f32 -0.28449672, %v66_v63  ;;  %v646_v58 = vpack.c.bf16 %v457_v57, %v456_v56  ;;  %v459_v63 = vld [vmem:[%s1080_s3 + $0x28] sm:$0xff] }
  0x23   :  { %v73_v1 = vmul.f32 %v692_v34, %v69_v61  ;;  %v71_v19 = vadd.f32 -0.28449672, %v67_v5  ;;  %v648_v61 = vpack.c.bf16 %v475_v60, %v474_v59  ;;  %v460_v5 = vld [vmem:[%s1080_s3 + $0x30] sm:$0xff] }
  0x24   :  { %v76_v2 = vadd.f32 0.2548296, %v72_v62  ;;  %v74_v18 = vmul.f32 %v694_v41, %v70_v4  ;;  %v458_v62 = vld [vmem:[%s1080_s3 + $0x20] sm:$0xff] }
  0x25   :  { %v77_v14 = vadd.f32 0.2548296, %v73_v1  ;;  %v75_v23 = vmul.f32 %v696_v46, %v71_v19  ;;  %v650_v0 = vpack.c.bf16 %v459_v63, %v458_v62  ;;  %v476_v1 = vld [vmem:[%s1080_s3 + $0xb0] sm:$0xff]  ;;  %v462_v19 = vld [vmem:[%s1080_s3 + $0x40] sm:$0xff] }
  0x26   :  { %v80_v17 = vmul.f32 %v690_v32, %v76_v2  ;;  %v78_v22 = vadd.f32 0.2548296, %v74_v18  ;;  %v477_v2 = vld [vmem:[%s1080_s3 + $0xb8] sm:$0xff] }
  0x27   :  { %v81_v20 = vmul.f32 %v692_v34, %v77_v14  ;;  %v79_v28 = vadd.f32 0.2548296, %v75_v23  ;;  %v652_v4 = vpack.c.bf16 %v477_v2, %v476_v1  ;;  %v481_v23 = vld [vmem:[%s1080_s3 + $0xd8] sm:$0xff] }
  0x28   :  { %v100_v21 = vmul.f32 %v698_v8, %v80_v17  ;;  %v82_v27 = vmul.f32 %v694_v41, %v78_v22  ;;  %v461_v8 = vld [vmem:[%s1080_s3 + $0x38] sm:$0xff]  ;;  %v479_v17 = vld [vmem:[%s1080_s3 + $0xc8] sm:$0xff]  ;;  %v480_v22 = vld [vmem:[%s1080_s3 + $0xd0] sm:$0xff] }
  0x29   :  { %v101_v25 = vmul.f32 %v700_v16, %v81_v20  ;;  %v83_v32 = vmul.f32 %v696_v46, %v79_v28  ;;  %v26_v46 = vmul.f32 0.5, %v797_v10  ;;  %v470_v10 = vld [vmem:[%s1080_s3 + $0x80] sm:$0xff]  ;;  %v654_v14 = vpack.c.bf16 %v461_v8, %v460_v5  ;;  %v463_v20 = vld [vmem:[%s1080_s3 + $0x48] sm:$0xff] }
  0x2a   :  { %v104_v26 = vsub.f32 1.0, %v100_v21  ;;  %v102_v33 = vmul.f32 %v702_v24, %v82_v27  ;;  %v640_v51 = vpack.c.bf16 %v471_v50, %v470_v10  ;;  %v478_v16 = vld [vmem:[%s1080_s3 + $0xc0] sm:$0xff]  ;;  %v658_v21 = vpack.c.bf16 %v463_v20, %v462_v19 }
  0x2b   :  { %v105_v30 = vsub.f32 1.0, %v101_v25  ;;  %v103_v38 = vmul.f32 %v704_v29, %v83_v32  ;;  %v656_v18 = vpack.c.bf16 %v479_v17, %v478_v16  ;;  %v660_v24 = vpack.c.bf16 %v481_v23, %v480_v22  ;;  %v464_v25 = vld [vmem:[%s1080_s3 + $0x50] sm:$0xff]  ;;  %v482_v28 = vld [vmem:[%s1080_s3 + $0xe0] sm:$0xff]  ;;  %v483_v29 = vld [vmem:[%s1080_s3 + $0xe8] sm:$0xff] }
  0x2c   :  { %v112_v31 = vsub.f32 0.0, %v104_v26  ;;  %v106_v37 = vsub.f32 1.0, %v102_v33  ;;  %641 = vmatprep.subr.bf16.mxu0 %v640_v51  ;;  %672 = vmatprep.subr.bf16.mxu1 %v640_v51  ;;  %v467_v33 = vld [vmem:[%s1080_s3 + $0x68] sm:$0xff]  ;;  %v484_v32 = vld [vmem:[%s1080_s3 + $0xf0] sm:$0xff] }
  0x2d   :  { %v113_v34 = vsub.f32 0.0, %v105_v30  ;;  %v107_v43 = vsub.f32 1.0, %v103_v38 }
  0x2e   :  { %v116_v36 = vsel %vm108_vm0, %v104_v26, %v112_v31  ;;  %v114_v42 = vsub.f32 0.0, %v106_v37  ;;  %v465_v26 = vld [vmem:[%s1080_s3 + $0x58] sm:$0xff]  ;;  %v466_v31 = vld [vmem:[%s1080_s3 + $0x60] sm:$0xff] }
  0x2f   :  { %v120_v39 = vadd.f32 1.0, %v116_v36  ;;  %v117_v41 = vsel %vm109_vm1, %v105_v30, %v113_v34  ;;  %v115_v45 = vsub.f32 0.0, %v107_v43  ;;  %v662_v27 = vpack.c.bf16 %v465_v26, %v464_v25  ;;  %v485_v34 = vld [vmem:[%s1080_s3 + $0xf8] sm:$0xff]  ;;  %v468_v36 = vld [vmem:[%s1080_s3 + $0x70] sm:$0xff] }
  0x30   :  { %v121_v9 = vadd.f32 1.0, %v117_v41  ;;  %v118_v12 = vsel %vm110_vm2, %v106_v37, %v114_v42  ;;  %v664_v30 = vpack.c.bf16 %v483_v29, %v482_v28  ;;  %v469_v37 = vld [vmem:[%s1080_s3 + $0x78] sm:$0xff]  ;;  %v668_v38 = vpack.c.bf16 %v485_v34, %v484_v32  ;;  %v132_v42 = vld [vmem:[%s1081_s2] sm:$0x3] }
  0x31   :  { %v124_v44 = vmul.f32 %v120_v39, %v24_v35  ;;  %v122_v47 = vadd.f32 1.0, %v118_v12  ;;  %v119_v7 = vsel %vm111_vm4, %v107_v43, %v115_v45  ;;  %v666_v35 = vpack.c.bf16 %v467_v33, %v466_v31 }
  0x32   :  { %v125_v6 = vmul.f32 %v121_v9, %v25_v40  ;;  %v123_v49 = vadd.f32 1.0, %v119_v7  ;;  %v670_v39 = vpack.c.bf16 %v469_v37, %v468_v36  ;;  %v134_v40 = vlaneseq }
  0x33   :  { %587 = vmatmul.mubr.msk.f32.vlgmr.msra.gmra.mrb[0].mxu0 %vm144_vm3, %v124_v44  ;;  %v126_v13 = vmul.f32 %v122_v47, %v26_v46 }
  0x34   :  { %227 = vmatprep.mubr.f32.mxu0 %v737_v3  ;;  %v127_v15 = vmul.f32 %v123_v49, %v27_v48  ;;  %v135_v41 = vshrl.u32 %v134_v40, 7 }
  0x36   :  { %v136_v9 = vsub.s32 0, %v135_v41  ;;  %v140_v43 = vsub.s32 1, %v135_v41 }
  0x37   :  { %588 = vmatmul.mubr.msk.f32.gmra.mrb[2].mxu0 %vm144_vm3, %v125_v6 }
  0x38   :  { %233 = vmatprep.mubr.f32.mxu0 %v737_v3  ;;  %v137_v44 = vrot.slane %v132_v42, %v136_v9  ;;  %v141_v12 = vrot.slane %v132_v42, %v140_v43 }
  0x3b   :  { %589 = vmatmul.mubr.msk.f32.gmra.mrb[4].mxu0 %vm144_vm3, %v126_v13 }
  0x3c   :  { %239 = vmatprep.mubr.f32.mxu0 %v737_v3  ;;  %v642_v3 = vpack.c.bf16 %v455_v52, %v454_v11 }
  0x3e   :  { %643 = vmatpush3.bf16.msra.mxu0 %v642_v3  ;;  %680 = vmatpush3.bf16.msra.mxu1 %v642_v3 }
  0x3f   :  { %590 = vmatmul.mubr.msk.f32.gmra.mrb[6].mxu0 %vm144_vm3, %v127_v15  ;;  %645 = vmatprep.subr.bf16.mxu0 %v644_v55 }
  0x40   :  { %673 = vmatprep.subr.bf16.mxu1 %v644_v55 }
  0x42   :  { %647 = vmatpush3.bf16.msra.mxu0 %v646_v58  ;;  %681 = vmatpush3.bf16.msra.mxu1 %v646_v58 }
  0x43   :  { %649 = vmatprep.subr.bf16.mxu0 %v648_v61  ;;  %674 = vmatprep.subr.bf16.mxu1 %v648_v61 }
  0x46   :  { %651 = vmatpush3.bf16.msra.mxu0 %v650_v0  ;;  %682 = vmatpush3.bf16.msra.mxu1 %v650_v0 }
  0x47   :  { %653 = vmatprep.subr.bf16.mxu0 %v652_v4  ;;  %675 = vmatprep.subr.bf16.mxu1 %v652_v4 }
  0x4a   :  { %655 = vmatpush3.bf16.msra.mxu0 %v654_v14  ;;  %683 = vmatpush3.bf16.msra.mxu1 %v654_v14 }
  0x4b   :  { %657 = vmatprep.subr.bf16.mxu0 %v656_v18  ;;  %676 = vmatprep.subr.bf16.mxu1 %v656_v18 }
  0x4e   :  { %659 = vmatpush3.bf16.msra.mxu0 %v658_v21  ;;  %684 = vmatpush3.bf16.msra.mxu1 %v658_v21 }
  0x4f   :  { %661 = vmatprep.subr.bf16.mxu0 %v660_v24  ;;  %677 = vmatprep.subr.bf16.mxu1 %v660_v24 }
  0x52   :  { %663 = vmatpush3.bf16.msra.mxu0 %v662_v27  ;;  %685 = vmatpush3.bf16.msra.mxu1 %v662_v27 }
  0x53   :  { %665 = vmatprep.subr.bf16.mxu0 %v664_v30  ;;  %678 = vmatprep.subr.bf16.mxu1 %v664_v30 }
  0x56   :  { %667 = vmatpush3.bf16.msra.mxu0 %v666_v35  ;;  %686 = vmatpush3.bf16.msra.mxu1 %v666_v35 }
  0x57   :  { %669 = vmatprep.subr.bf16.mxu0 %v668_v38  ;;  %679 = vmatprep.subr.bf16.mxu1 %v668_v38 }
  0x5a   :  { %671 = vmatpush3.bf16.msra.mxu0 %v670_v39  ;;  %687 = vmatpush3.bf16.msra.mxu1 %v670_v39 }
 0x106   :  { %v223_v45 = vpop.f32.mrb[0].mxu0 }
 0x107   :  { %v224_v6 = vadd.f32 %v223_v45, %v137_v44  ;;  %v225_v46 = vpop.f32.mrb[1].mxu0 }
 0x108   :  { %v226_v47 = vadd.f32 %v225_v46, %v141_v12 }
 0x109   :  { %v931_v7 = vmul.f32 0.70710677, %v224_v6  ;;  %v959_v19 = vmul.f32 0.5, %v224_v6 }
 0x10a   :  { %v933_v13 = vmul.f32 0.70710677, %v226_v47  ;;  %v229_v48 = vpop.f32.mrb[2].mxu0  ;;  %v964_v22 = vmul.f32 0.5, %v226_v47 }
 0x10b   :  { %v262_v49 = vand.u32 2147483647, %v931_v7  ;;  %v230_v15 = vadd.f32 %v229_v48, %v137_v44  ;;  %v231_v10 = vpop.f32.mrb[3].mxu0  ;;  %vm414_vm5 = vcmp.ge.f32.partialorder %v931_v7, 0.0 }
 0x10c   :  { %v263_v50 = vand.u32 2147483647, %v933_v13  ;;  %v937_v51 = vadd.f32 %v231_v10, %v141_v12  ;;  %vm415_vm6 = vcmp.ge.f32.partialorder %v933_v13, 0.0 }
 0x10d   :  { %v270_v11 = vmul.f32 0.3275911, %v262_v49  ;;  %v939_v52 = vmul.f32 0.70710677, %v230_v15  ;;  %v366_v14 = vsub.f32 0.0, %v262_v49  ;;  %v976_v36 = vmul.f32 0.5, %v230_v15 }
 0x10e   :  { %v271_v3 = vmul.f32 0.3275911, %v263_v50  ;;  %v942_v53 = vmul.f32 0.70710677, %v937_v51  ;;  %v235_v54 = vpop.f32.mrb[4].mxu0  ;;  %v367_v17 = vsub.f32 0.0, %v263_v50 }
 0x10f   :  { %v278_v55 = vadd.f32 1.0, %v270_v11  ;;  %v264_v56 = vand.u32 2147483647, %v939_v52  ;;  %v237_v57 = vpop.f32.mrb[5].mxu0  ;;  %v946_v60 = vadd.f32 %v235_v54, %v137_v44  ;;  %v374_v26 = vmul.f32 %v366_v14, %v262_v49 }
 0x110   :  { %v279_v58 = vadd.f32 1.0, %v271_v3  ;;  %v265_v59 = vand.u32 2147483647, %v942_v53  ;;  %v951_v5 = vadd.f32 %v237_v57, %v141_v12  ;;  %v375_v31 = vmul.f32 %v367_v17, %v263_v50 }
 0x111   :  { %705 = vrcp.f32 %v278_v55  ;;  %v272_v61 = vmul.f32 0.3275911, %v264_v56  ;;  %v949_v4 = vmul.f32 0.70710677, %v946_v60  ;;  %v368_v23 = vsub.f32 0.0, %v264_v56 }
 0x112   :  { %v273_v62 = vmul.f32 0.3275911, %v265_v59  ;;  %v241_v63 = vpop.f32.mrb[6].mxu0  ;;  %707 = vrcp.f32 %v279_v58  ;;  %v957_v18 = vmul.f32 0.70710677, %v951_v5  ;;  %v369_v27 = vsub.f32 0.0, %v265_v59 }
 0x113   :  { %v280_v0 = vadd.f32 1.0, %v272_v61  ;;  %v243_v1 = vpop.f32.mrb[7].mxu0  ;;  %v953_v8 = vadd.f32 %v241_v63, %v137_v44  ;;  %v266_v16 = vand.u32 2147483647, %v949_v4  ;;  %v376_v39 = vmul.f32 %v368_v23, %v264_v56 }
 0x114   :  { %v281_v2 = vadd.f32 1.0, %v273_v62  ;;  %v267_v24 = vand.u32 2147483647, %v957_v18  ;;  %v967_v25 = vadd.f32 %v243_v1, %v141_v12  ;;  %v382_v43 = vmul.f32 1.442695, %v374_v26 }
 0x115   :  { %709 = vrcp.f32 %v280_v0  ;;  %v274_v20 = vmul.f32 0.3275911, %v266_v16  ;;  %v962_v21 = vmul.f32 0.70710677, %v953_v8  ;;  %v370_v33 = vsub.f32 0.0, %v266_v16 }
 0x116   :  { %711 = vrcp.f32 %v281_v2  ;;  %v275_v32 = vmul.f32 0.3275911, %v267_v24  ;;  %v973_v35 = vmul.f32 0.70710677, %v967_v25  ;;  %v371_v41 = vsub.f32 0.0, %v267_v24 }
 0x117   :  { %v282_v28 = vadd.f32 1.0, %v274_v20  ;;  %v268_v29 = vand.u32 2147483647, %v962_v21  ;;  %v377_v44 = vmul.f32 %v369_v27, %v265_v59  ;;  %v384_v6 = vmul.f32 1.442695, %v375_v31 }
 0x118   :  { %v283_v40 = vadd.f32 1.0, %v275_v32  ;;  %v269_v9 = vand.u32 2147483647, %v973_v35  ;;  %v378_v46 = vmul.f32 %v370_v33, %v266_v16  ;;  %v386_v50 = vmul.f32 1.442695, %v376_v39 }
 0x119   :  { %713 = vrcp.f32 %v282_v28  ;;  %v276_v37 = vmul.f32 0.3275911, %v268_v29  ;;  %v372_v15 = vsub.f32 0.0, %v268_v29  ;;  %v379_v11 = vmul.f32 %v371_v41, %v267_v24 }
 0x11a   :  { %715 = vrcp.f32 %v283_v40  ;;  %v277_v47 = vmul.f32 0.3275911, %v269_v9  ;;  %v388_v56 = vmul.f32 1.442695, %v377_v44  ;;  %v390_v58 = vmul.f32 1.442695, %v378_v46 }
 0x11b   :  { %v970_v30 = vpop.eup %705  ;;  %v284_v12 = vadd.f32 1.0, %v276_v37  ;;  %v380_v63 = vmul.f32 %v372_v15, %v268_v29  ;;  %v392_v1 = vmul.f32 1.442695, %v379_v11  ;;  %v373_v20 = vsub.f32 0.0, %v269_v9 }
 0x11c   :  { %v294_v34 = vmul.f32 1.0614054, %v970_v30  ;;  %v978_v38 = vpop.eup %707  ;;  %v285_v3 = vadd.f32 1.0, %v277_v47  ;;  %v995_v24 = vmul.f32 0.5, %v937_v51  ;;  %vm417_vm7 = vcmp.ge.f32.partialorder %v942_v53, 0.0 }
 0x11d   :  { %717 = vrcp.f32 %v284_v12  ;;  %v295_v10 = vmul.f32 1.0614054, %v978_v38  ;;  %v394_v31 = vmul.f32 1.442695, %v380_v63  ;;  %v381_v41 = vmul.f32 %v373_v20, %v269_v9 }
 0x11e   :  { %v302_v42 = vadd.f32 -1.4531521, %v294_v34  ;;  %719 = vpow2.f32 %v382_v43  ;;  %vm416_vm8 = vcmp.ge.f32.partialorder %v939_v52, 0.0  ;;  %vm418_vm9 = vcmp.ge.f32.partialorder %v949_v4, 0.0 }
 0x11f   :  { %v981_v45 = vpop.eup %709  ;;  %v303_v57 = vadd.f32 -1.4531521, %v295_v10  ;;  %721 = vpow2.f32 %v384_v6  ;;  %vm419_vm10 = vcmp.ge.f32.partialorder %v957_v18, 0.0  ;;  %v251_v4 = vmul.f32 0.5, %v951_v5 }
 0x120   :  { %v983_v48 = vpop.eup %711  ;;  %v310_v49 = vmul.f32 %v970_v30, %v302_v42  ;;  %v296_v61 = vmul.f32 1.0614054, %v981_v45  ;;  %723 = vrcp.f32 %v285_v3  ;;  %vm420_vm11 = vcmp.ge.f32.partialorder %v962_v21, 0.0 }
 0x121   :  { %v297_v54 = vmul.f32 1.0614054, %v983_v48  ;;  %v311_v0 = vmul.f32 %v978_v38, %v303_v57  ;;  %725 = vpow2.f32 %v386_v50  ;;  %v396_v57 = vmul.f32 1.442695, %v381_v41 }
 0x122   :  { %v318_v55 = vadd.f32 1.4214138, %v310_v49  ;;  %v304_v14 = vadd.f32 -1.4531521, %v296_v61  ;;  %727 = vpow2.f32 %v388_v56  ;;  %vm421_vm12 = vcmp.ge.f32.partialorder %v973_v35, 0.0 }
 0x123   :  { %v305_v59 = vadd.f32 -1.4531521, %v297_v54  ;;  %v992_v16 = vpop.eup %713  ;;  %v319_v23 = vadd.f32 1.4214138, %v311_v0  ;;  %729 = vpow2.f32 %v390_v58 }
 0x124   :  { %v326_v62 = vmul.f32 %v970_v30, %v318_v55  ;;  %v312_v27 = vmul.f32 %v981_v45, %v304_v14  ;;  %v298_v28 = vmul.f32 1.0614054, %v992_v16  ;;  %v1001_v32 = vpop.eup %715  ;;  %731 = vpow2.f32 %v392_v1 }
 0x125   :  { %v313_v2 = vmul.f32 %v983_v48, %v305_v59  ;;  %v327_v33 = vmul.f32 %v978_v38, %v319_v23  ;;  %v299_v43 = vmul.f32 1.0614054, %v1001_v32  ;;  %733 = vpow2.f32 %v394_v31 }
 0x126   :  { %v334_v17 = vadd.f32 -0.28449672, %v326_v62  ;;  %v320_v37 = vadd.f32 1.4214138, %v312_v27  ;;  %v306_v39 = vadd.f32 -1.4531521, %v298_v28  ;;  %735 = vpow2.f32 %v396_v57 }
 0x127   :  { %v321_v26 = vadd.f32 1.4214138, %v313_v2  ;;  %v1004_v51 = vpop.eup %717  ;;  %v335_v42 = vadd.f32 -0.28449672, %v327_v33  ;;  %v307_v10 = vadd.f32 -1.4531521, %v299_v43 }
 0x128   :  { %v342_v29 = vmul.f32 %v970_v30, %v334_v17  ;;  %v328_v12 = vmul.f32 %v981_v45, %v320_v37  ;;  %v314_v6 = vmul.f32 %v992_v16, %v306_v39  ;;  %v300_v46 = vmul.f32 1.0614054, %v1004_v51  ;;  %v720_v47 = vpop.eup %719 }
 0x129   :  { %v329_v34 = vmul.f32 %v983_v48, %v321_v26  ;;  %v343_v15 = vmul.f32 %v978_v38, %v335_v42  ;;  %v722_v9 = vpop.eup %721  ;;  %v315_v59 = vmul.f32 %v1001_v32, %v307_v10 }
 0x12a   :  { %v350_v40 = vadd.f32 0.2548296, %v342_v29  ;;  %v336_v11 = vadd.f32 -0.28449672, %v328_v12  ;;  %v322_v3 = vadd.f32 1.4214138, %v314_v6  ;;  %v1014_v55 = vpop.eup %723 }
 0x12b   :  { %v337_v44 = vadd.f32 -0.28449672, %v329_v34  ;;  %v308_v54 = vadd.f32 -1.4531521, %v300_v46  ;;  %v351_v58 = vadd.f32 0.2548296, %v343_v15  ;;  %v726_v61 = vpop.eup %725 }
 0x12c   :  { %v358_v49 = vmul.f32 %v970_v30, %v350_v40  ;;  %v344_v62 = vmul.f32 %v981_v45, %v336_v11  ;;  %v330_v63 = vmul.f32 %v992_v16, %v322_v3  ;;  %v301_v0 = vmul.f32 1.0614054, %v1014_v55  ;;  %v728_v1 = vpop.eup %727 }
 0x12d   :  { %v345_v50 = vmul.f32 %v983_v48, %v337_v44  ;;  %v359_v14 = vmul.f32 %v978_v38, %v351_v58  ;;  %v323_v17 = vadd.f32 1.4214138, %v315_v59  ;;  %v316_v20 = vmul.f32 %v1004_v51, %v308_v54  ;;  %v730_v29 = vpop.eup %729 }
 0x12e   :  { %v398_v56 = vmul.f32 %v720_v47, %v358_v49  ;;  %v352_v26 = vadd.f32 0.2548296, %v344_v62  ;;  %v338_v27 = vadd.f32 -0.28449672, %v330_v63  ;;  %v309_v28 = vadd.f32 -1.4531521, %v301_v0  ;;  %v732_v39 = vpop.eup %731 }
 0x12f   :  { %v353_v30 = vadd.f32 0.2548296, %v345_v50  ;;  %v399_v33 = vmul.f32 %v722_v9, %v359_v14  ;;  %v331_v34 = vmul.f32 %v1001_v32, %v323_v17  ;;  %v324_v37 = vadd.f32 1.4214138, %v316_v20  ;;  %v734_v49 = vpop.eup %733 }
 0x130   :  { %v406_v2 = vsub.f32 1.0, %v398_v56  ;;  %v360_v40 = vmul.f32 %v981_v45, %v352_v26  ;;  %v346_v41 = vmul.f32 %v992_v16, %v338_v27  ;;  %v317_v42 = vmul.f32 %v1014_v55, %v309_v28  ;;  %v736_v28 = vpop.eup %735 }
 0x131   :  { %v361_v23 = vmul.f32 %v983_v48, %v353_v30  ;;  %v407_v43 = vsub.f32 1.0, %v399_v33  ;;  %v339_v44 = vadd.f32 -0.28449672, %v331_v34  ;;  %v332_v12 = vmul.f32 %v1004_v51, %v324_v37 }
 0x132   :  { %v422_v31 = vsub.f32 0.0, %v406_v2  ;;  %v400_v46 = vmul.f32 %v726_v61, %v360_v40  ;;  %v354_v47 = vadd.f32 0.2548296, %v346_v41  ;;  %v325_v45 = vadd.f32 1.4214138, %v317_v42 }
 0x133   :  { %v401_v38 = vmul.f32 %v728_v1, %v361_v23  ;;  %v423_v15 = vsub.f32 0.0, %v407_v43  ;;  %v347_v10 = vmul.f32 %v1001_v32, %v339_v44  ;;  %v340_v9 = vadd.f32 -0.28449672, %v332_v12 }
 0x134   :  { %v430_v48 = vsel %vm414_vm5, %v406_v2, %v422_v31  ;;  %v408_v3 = vsub.f32 1.0, %v400_v46  ;;  %v362_v7 = vmul.f32 %v992_v16, %v354_v47  ;;  %v333_v57 = vmul.f32 %v1014_v55, %v325_v45  ;;  %v591_v47 = vld [vmem:[%s1082_s4] ss:$0 sm:$0xff] }
 0x135   :  { %v409_v6 = vsub.f32 1.0, %v401_v38  ;;  %v438_v50 = vadd.f32 1.0, %v430_v48  ;;  %v431_v54 = vsel %vm415_vm6, %v407_v43, %v423_v15  ;;  %v355_v56 = vadd.f32 0.2548296, %v347_v10 }
 0x136   :  { %v348_v58 = vmul.f32 %v1004_v51, %v340_v9  ;;  %v439_v59 = vadd.f32 1.0, %v431_v54  ;;  %v424_v30 = vsub.f32 0.0, %v408_v3  ;;  %v402_v62 = vmul.f32 %v730_v29, %v362_v7 }
 0x137   :  { %v425_v11 = vsub.f32 0.0, %v409_v6  ;;  %v363_v0 = vmul.f32 %v1001_v32, %v355_v56  ;;  %v341_v1 = vadd.f32 -0.28449672, %v333_v57  ;;  %v446_v16 = vmul.f32 %v438_v50, %v959_v19 }
 0x138   :  { %v356_v2 = vadd.f32 0.2548296, %v348_v58  ;;  %v447_v13 = vmul.f32 %v439_v59, %v964_v22  ;;  %v432_v14 = vsel %vm416_vm8, %v408_v3, %v424_v30  ;;  %v410_v17 = vsub.f32 1.0, %v402_v62 }
 0x139   :  { %v433_v61 = vsel %vm417_vm7, %v409_v6, %v425_v11  ;;  %v440_v23 = vadd.f32 1.0, %v432_v14  ;;  %v403_v53 = vmul.f32 %v732_v39, %v363_v0  ;;  %v349_v26 = vmul.f32 %v1014_v55, %v341_v1 }
 0x13a   :  { %v441_v63 = vadd.f32 1.0, %v433_v61  ;;  %557 = vmatprep.mubr.f32.mxu0 %v447_v13  ;;  %v426_v27 = vsub.f32 0.0, %v410_v17  ;;  %v364_v32 = vmul.f32 %v1004_v51, %v356_v2  ;;  %v253_v12 = vmul.f32 0.5, %v967_v25 }
 0x13b   :  { %558 = vmatmul.mubr.f32.vlgmr.msra.gmra.mrb[8].mxu0 %v446_v16  ;;  %v448_v19 = vmul.f32 %v440_v23, %v976_v36  ;;  %v411_v22 = vsub.f32 1.0, %v403_v53  ;;  %v357_v52 = vadd.f32 0.2548296, %v349_v26  ;;  %v250_v36 = vmul.f32 0.5, %v946_v60 }
 0x13c   :  { %v449_v20 = vmul.f32 %v441_v63, %v995_v24  ;;  %v434_v29 = vsel %vm418_vm9, %v410_v17, %v426_v27  ;;  %v404_v31 = vmul.f32 %v734_v49, %v364_v32  ;;  %v252_v6 = vmul.f32 0.5, %v953_v8 }
 0x13d   :  { %v427_v24 = vsub.f32 0.0, %v411_v22  ;;  %v365_v33 = vmul.f32 %v1014_v55, %v357_v52  ;;  %v442_v51 = vadd.f32 1.0, %v434_v29 }
 0x13e   :  { %562 = vmatprep.mubr.f32.mxu1 %v449_v20  ;;  %v412_v34 = vsub.f32 1.0, %v404_v31 }
 0x13f   :  { %563 = vmatmul.mubr.f32.vlgmr.msra.gmra.mrb[0].mxu1 %v448_v19  ;;  %v435_v37 = vsel %vm419_vm10, %v411_v22, %v427_v24  ;;  %v405_v39 = vmul.f32 %v736_v28, %v365_v33  ;;  %v450_v43 = vmul.f32 %v442_v51, %v250_v36 }
 0x140   :  { %v443_v38 = vadd.f32 1.0, %v435_v37  ;;  %v428_v40 = vsub.f32 0.0, %v412_v34 }
 0x141   :  { %v413_v41 = vsub.f32 1.0, %v405_v39 }
 0x142   :  { %v451_v42 = vmul.f32 %v443_v38, %v251_v4  ;;  %v436_v48 = vsel %vm420_vm11, %v412_v34, %v428_v40 }
 0x143   :  { %v429_v44 = vsub.f32 0.0, %v413_v41  ;;  %v444_v55 = vadd.f32 1.0, %v436_v48 }
 0x144   :  { %567 = vmatprep.mubr.f32.mxu1 %v451_v42 }
 0x145   :  { %568 = vmatmul.mubr.f32.gmra.mrb[2].mxu1 %v450_v43  ;;  %v437_v18 = vsel %vm421_vm12, %v413_v41, %v429_v44  ;;  %v452_v60 = vmul.f32 %v444_v55, %v252_v6 }
 0x146   :  { %v445_v5 = vadd.f32 1.0, %v437_v18 }
 0x148   :  { %v453_v46 = vmul.f32 %v445_v5, %v253_v12 }
 0x14a   :  { %572 = vmatprep.mubr.f32.mxu1 %v453_v46 }
 0x14b   :  { %573 = vmatmul.mubr.f32.gmra.mrb[4].mxu1 %v452_v60 }
 0x20e   :  { %v624_v21 = vpop.f32.mrb[8].mxu0 }
 0x20f   :  { %v625_v49 = vpop.f32.mrb[9].mxu0 }
 0x210   :  { %v626_v35 = vadd.f32 %v625_v49, %v624_v21 }
 0x212   :  { %v627_v15 = vpop.f32.mrb[0].mxu1  ;;  %v560_v45 = vadd.f32 %v626_v35, %v591_v47 }
 0x213   :  { %v628_v10 = vpop.f32.mrb[1].mxu1 }
 0x214   :  { %v629_v9 = vadd.f32 %v628_v10, %v627_v15  ;;  %579 = vst.msk [vmem:[%s1083_s5] sm:$0xff] %vm578_vm13, %v560_v45 }
 0x216   :  { %v565_v8 = vadd.f32 %v629_v9, %v591_v47 }
 0x218   :  { %580 = vst.msk [vmem:[%s1083_s5 + $0x8] sm:$0xff] %vm578_vm13, %v565_v8  ;;  %v630_v25 = vpop.f32.mrb[2].mxu1 }
 0x219   :  { %v631_v50 = vpop.f32.mrb[3].mxu1 }
 0x21a   :  { %v632_v11 = vadd.f32 %v631_v50, %v630_v25 }
 0x21c   :  { %v570_v3 = vadd.f32 %v632_v11, %v591_v47 }
 0x21e   :  { %581 = vst.msk [vmem:[%s1083_s5 + $0x10] sm:$0xff] %vm578_vm13, %v570_v3  ;;  %v633_v7 = vpop.f32.mrb[4].mxu1 }
 0x21f   :  { %v634_v54 = vpop.f32.mrb[5].mxu1 }
 0x220   :  { %v635_v56 = vadd.f32 %v634_v54, %v633_v7 }
 0x222   :  { %v575_v57 = vadd.f32 %v635_v56, %v591_v47 }
 0x224   :  { %582 = vst.msk [vmem:[%s1083_s5 + $0x18] sm:$0xff] %vm578_vm13, %v575_v57 }

</bundles_post_ra>
